<compile_context>
chip_gen: v6e
topology: v6e:2x2x1
jax: 0.10.0
libtpu: 0.0.40
codegen_flags: <defaults>
</compile_context>

<pallas_src>
import functools

import jax
import jax.numpy as jnp
from jax import lax
from jax.experimental import pallas as pl
from jax.experimental.pallas import tpu as pltpu

_EPS = 1e-5
_LANE = 128
_VMEM_LIMIT_BYTES = 32 * 1024 * 1024


def _round_up(x, m):
    return (x + m - 1) // m * m


def _compiler_params():
    return pltpu.CompilerParams(
        dimension_semantics=("parallel",),
        vmem_limit_bytes=_VMEM_LIMIT_BYTES,
    )


# --------------------------------------------------------------------------- #
# Kernel 1: per-channel batch statistics (BN pass 1), row-tiled reduction.
# --------------------------------------------------------------------------- #

def _bn_stats_kernel(x_ref, st_ref):
    x = x_ref[...]                                             # (tm, Cp) f32
    st_ref[:, 0:1, :] = jnp.sum(x, axis=0, keepdims=True)[None]
    st_ref[:, 1:2, :] = jnp.sum(x * x, axis=0, keepdims=True)[None]


def bn_batch_stats(x2d, tm):
    """x2d: (M, Cp) f32 with M % tm == 0 -> per-tile (G, 2, Cp) partial sums."""
    m, cp = x2d.shape
    g = m // tm
    return pl.pallas_call(
        _bn_stats_kernel,
        out_shape=jax.ShapeDtypeStruct((g, 2, cp), jnp.float32),
        grid=(g,),
        in_specs=[pl.BlockSpec((tm, cp), lambda i: (i, 0))],
        out_specs=pl.BlockSpec((1, 2, cp), lambda i: (i, 0, 0)),
        compiler_params=_compiler_params(),
    )(x2d)


# --------------------------------------------------------------------------- #
# Kernel 2: 3x3 conv (stride folded into pre-built space-to-depth phases),
#           computed as 9 shifted full-width bf16 MXU matmuls per image, plus a
#           fused per-image BN-statistics side output of the conv result.
# --------------------------------------------------------------------------- #

def _conv_bnstats_kernel(ph_ref, w_ref, vmask_ref, z_ref, st_ref, *,
                         tap_offsets, m_rows):
    cop = w_ref.shape[-1]
    acc = jnp.zeros((m_rows, cop), jnp.float32)
    for t, off in enumerate(tap_offsets):                      # 9 static taps
        lhs = ph_ref[0, off:off + m_rows, :]                   # (m_rows, Cp) bf16
        acc = acc + jnp.dot(lhs, w_ref[t], preferred_element_type=jnp.float32)
    acc = acc * vmask_ref[...]                                 # zero overhang columns
    z_ref[...] = acc[None].astype(z_ref.dtype)
    st_ref[:, 0:1, :] = jnp.sum(acc, axis=0, keepdims=True)[None]
    st_ref[:, 1:2, :] = jnp.sum(acc * acc, axis=0, keepdims=True)[None]


def conv3x3_with_bnstats(phases, w_taps, vmask, *, tap_offsets, m_rows):
    n, s2l, cp = phases.shape
    cop = w_taps.shape[-1]
    kern = functools.partial(_conv_bnstats_kernel,
                             tap_offsets=tap_offsets, m_rows=m_rows)
    return pl.pallas_call(
        kern,
        out_shape=(jax.ShapeDtypeStruct((n, m_rows, cop), jnp.bfloat16),
                   jax.ShapeDtypeStruct((n, 2, cop), jnp.float32)),
        grid=(n,),
        in_specs=[
            pl.BlockSpec((1, s2l, cp), lambda b: (b, 0, 0)),
            pl.BlockSpec((9, cp, cop), lambda b: (0, 0, 0)),
            pl.BlockSpec((m_rows, 1), lambda b: (0, 0)),
        ],
        out_specs=(
            pl.BlockSpec((1, m_rows, cop), lambda b: (b, 0, 0)),
            pl.BlockSpec((1, 2, cop), lambda b: (b, 0, 0)),
        ),
        compiler_params=_compiler_params(),
    )(phases, w_taps, vmask)


# --------------------------------------------------------------------------- #
# Kernel 3: fused [BN affine + ReLU] -> 3x3 conv (stride 1) -> residual add.
#           Normalize+ReLU is applied per tap on the fly (VPU work hidden under
#           the MXU); the shortcut is a 1x1-conv matmul (downsample) or a plain
#           f32 add (identity) -- no eye-matmul.
# --------------------------------------------------------------------------- #

def _conv2_tap_accumulate(zflat_ref, mflat_ref, sc, bi, w_ref, m_rows, wacc):
    cop = w_ref.shape[-1]
    acc = jnp.zeros((m_rows, cop), jnp.float32)
    for kh in range(3):
        for kw in range(3):
            off = kh * wacc + kw
            zt = zflat_ref[0, off:off + m_rows, :].astype(jnp.float32)
            mt = mflat_ref[off:off + m_rows, :]                # (m_rows, 1) border mask
            yt = (jnp.maximum(zt * sc + bi, 0.0) * mt).astype(jnp.bfloat16)
            acc = acc + jnp.dot(yt, w_ref[kh * 3 + kw],
                                preferred_element_type=jnp.float32)
    return acc


def _conv2_downsample_kernel(zflat_ref, mflat_ref, sc_ref, bi_ref, w_ref,
                             id_ref, wd_ref, o_ref, *, m_rows, wacc):
    acc = _conv2_tap_accumulate(zflat_ref, mflat_ref, sc_ref[...], bi_ref[...],
                                w_ref, m_rows, wacc)
    acc = acc + jnp.dot(id_ref[0], wd_ref[...],
                        preferred_element_type=jnp.float32)    # 1x1-conv shortcut
    o_ref[...] = acc[None].astype(o_ref.dtype)


def _conv2_identity_kernel(zflat_ref, mflat_ref, sc_ref, bi_ref, w_ref,
                           id_ref, o_ref, *, m_rows, wacc):
    acc = _conv2_tap_accumulate(zflat_ref, mflat_ref, sc_ref[...], bi_ref[...],
                                w_ref, m_rows, wacc)
    acc = acc + id_ref[0]                                      # plain residual add
    o_ref[...] = acc[None].astype(o_ref.dtype)


def bn_relu_conv3x3_residual(zflat, mflat, scale, bias, w_taps, idflat, wd, *,
                             m_rows, wacc):
    n, lz, cop = zflat.shape
    cid = idflat.shape[-1]
    in_specs = [
        pl.BlockSpec((1, lz, cop), lambda b: (b, 0, 0)),
        pl.BlockSpec((lz, 1), lambda b: (0, 0)),
        pl.BlockSpec((1, cop), lambda b: (0, 0)),
        pl.BlockSpec((1, cop), lambda b: (0, 0)),
        pl.BlockSpec((9, cop, cop), lambda b: (0, 0, 0)),
        pl.BlockSpec((1, m_rows, cid), lambda b: (b, 0, 0)),
    ]
    if wd is not None:
        kern = functools.partial(_conv2_downsample_kernel, m_rows=m_rows, wacc=wacc)
        in_specs = in_specs + [pl.BlockSpec((cid, cop), lambda b: (0, 0))]
        args = (zflat, mflat, scale, bias, w_taps, idflat, wd)
    else:
        kern = functools.partial(_conv2_identity_kernel, m_rows=m_rows, wacc=wacc)
        args = (zflat, mflat, scale, bias, w_taps, idflat)
    return pl.pallas_call(
        kern,
        out_shape=jax.ShapeDtypeStruct((n, m_rows, cop), jnp.float32),
        grid=(n,),
        in_specs=in_specs,
        out_specs=pl.BlockSpec((1, m_rows, cop), lambda b: (b, 0, 0)),
        compiler_params=_compiler_params(),
    )(*args)


# ------------------------------- weight prep -------------------------------- #

def _w3x3_to_taps(w_oihw, cin_p, cout_p):
    cout, cin, kh, kw = w_oihw.shape
    wt = jnp.transpose(w_oihw.astype(jnp.float32), (2, 3, 1, 0))   # (KH,KW,Cin,Cout)
    wt = jnp.pad(wt, ((0, 0), (0, 0), (0, cin_p - cin), (0, cout_p - cout)))
    return wt.reshape(kh * kw, cin_p, cout_p).astype(jnp.bfloat16)


def _w1x1_to_mat(w_oihw, cin_p, cout_p):
    cout, cin = w_oihw.shape[0], w_oihw.shape[1]
    wt = w_oihw.astype(jnp.float32).reshape(cout, cin).T           # (Cin, Cout)
    wt = jnp.pad(wt, ((0, cin_p - cin), (0, cout_p - cout)))
    return wt.astype(jnp.bfloat16)


# ------------------------------- forward glue -------------------------------- #

def resnet_block_bnreluconv(x_nchw, params, *, stride):
    n, c, h, w = x_nchw.shape
    cout = params["w1"].shape[0]
    s = int(stride)
    assert s in (1, 2), "WideResNet blocks use stride 1 or 2"
    cp = _round_up(c, _LANE)
    cop = _round_up(cout, _LANE)
    ho = (h - 1) // s + 1
    wo = (w - 1) // s + 1

    x = jnp.transpose(x_nchw, (0, 2, 3, 1)).astype(jnp.float32)          # NHWC
    xcp = jnp.pad(x, ((0, 0), (0, 0), (0, 0), (0, cp - c)))              # lane-dense channels

    # ---- op_1: BN(C) -- pass 1 = Pallas row-tiled stats, pass 2 = affine+ReLU ----
    m = n * h * w
    x2d = xcp.reshape(m, cp)
    tm = 512 if m >= 512 else _round_up(m, 8)
    mp = _round_up(m, tm)
    x2dp = x2d if mp == m else jnp.pad(x2d, ((0, mp - m), (0, 0)))
    st1 = bn_batch_stats(x2dp, tm)
    mean1 = jnp.sum(st1[:, 0, :], axis=0) / m
    var1 = jnp.maximum(jnp.sum(st1[:, 1, :], axis=0) / m - mean1 * mean1, 0.0)
    g1 = jnp.pad(params["g1"].astype(jnp.float32), (0, cp - c))
    b1 = jnp.pad(params["b1"].astype(jnp.float32), (0, cp - c))
    scale1 = g1 * lax.rsqrt(var1 + _EPS)
    bias1 = b1 - mean1 * scale1
    # Elementwise affine+ReLU: XLA fuses this with the pad / phase staging below,
    # so it costs no standalone HBM round trip.
    y = jnp.maximum(xcp * scale1 + bias1, 0.0)

    # ---- conv1 input staging: zero-pad, space-to-depth phases, flatten, bf16 ----
    hph = -(-(h + 2) // s)
    wph = -(-(w + 2) // s)
    yp = jnp.pad(y, ((0, 0), (1, hph * s - h - 1), (1, wph * s - w - 1), (0, 0)))
    lp = hph * wph + 2                                   # +2 rows of tap-overrun slack
    phase_list = []
    for pa in range(s):
        for pb in range(s):
            ph = yp[:, pa::s, pb::s, :].reshape(n, hph * wph, cp)
            phase_list.append(jnp.pad(ph, ((0, 0), (0, 2), (0, 0))))
    phases = jnp.concatenate(phase_list, axis=1).astype(jnp.bfloat16)

    m1 = ho * wph
    tap_off1 = tuple(((kh % s) * s + (kw % s)) * lp + (kh // s) * wph + (kw // s)
                     for kh in range(3) for kw in range(3))
    vmask1 = (jnp.arange(m1) % wph < wo).astype(jnp.float32).reshape(m1, 1)
    w1_taps = _w3x3_to_taps(params["w1"], cp, cop)

    # ---- op_2: Conv3x3(C->Cout, stride) with fused BN(Cout) stat reduction ----
    z, st2 = conv3x3_with_bnstats(phases, w1_taps, vmask1,
                                  tap_offsets=tap_off1, m_rows=m1)

    m2_count = n * ho * wo
    mean2 = jnp.sum(st2[:, 0, :], axis=0) / m2_count
    var2 = jnp.maximum(jnp.sum(st2[:, 1, :], axis=0) / m2_count - mean2 * mean2, 0.0)
    g2 = jnp.pad(params["g2"].astype(jnp.float32), (0, cop - cout))
    b2 = jnp.pad(params["b2"].astype(jnp.float32), (0, cop - cout))
    inv2 = lax.rsqrt(var2 + _EPS)
    scale2 = (g2 * inv2).reshape(1, cop)
    bias2 = (b2 - mean2 * g2 * inv2).reshape(1, cop)

    # ---- conv2 input staging: crop overhang, zero-pad spatially, flatten ----
    z_img = z.reshape(n, ho, wph, cop)[:, :, :wo, :]
    hp2, wp2 = ho + 2, wo + 2
    zp = jnp.pad(z_img, ((0, 0), (1, 1), (1, 1), (0, 0)))
    lz = hp2 * wp2 + 2
    zflat = jnp.pad(zp.reshape(n, hp2 * wp2, cop), ((0, 0), (0, 2), (0, 0)))
    jj = jnp.arange(lz)
    hh, ww = jj // wp2, jj % wp2
    mflat = ((jj < hp2 * wp2) & (hh >= 1) & (hh <= ho) & (ww >= 1) & (ww <= wo))
    mflat = mflat.astype(jnp.float32).reshape(lz, 1)
    mrows2 = ho * wp2
    w2_taps = _w3x3_to_taps(params["w2"], cop, cop)

    # ---- shortcut, laid out row-compatibly with the conv2 output ----
    downsample = (s != 1) or (c != cout)
    if downsample:
        xs = xcp[:, ::s, ::s, :]                                         # (n, ho, wo, cp)
        idflat = jnp.pad(xs, ((0, 0), (0, 0), (0, wp2 - wo), (0, 0)))
        idflat = idflat.reshape(n, mrows2, cp).astype(jnp.bfloat16)
        wd = _w1x1_to_mat(params["wd"], cp, cop)
    else:
        idflat = jnp.pad(xcp, ((0, 0), (0, 0), (0, wp2 - wo), (0, 0)))
        idflat = idflat.reshape(n, mrows2, cp)                           # f32 exact add
        wd = None

    # ---- dropout(p=0.0) == identity; op_3 conv + fused BN2-apply/ReLU + residual ----
    # TODO(synk): dropout_rate > 0 would need pltpu.prng_seed/prng_random_bits masking.
    out = bn_relu_conv3x3_residual(zflat, mflat, scale2, bias2, w2_taps, idflat, wd,
                                   m_rows=mrows2, wacc=wp2)
    out = out.reshape(n, ho, wp2, cop)[:, :, :wo, :cout]
    return jnp.transpose(out, (0, 3, 1, 2)).astype(x_nchw.dtype)


# ---------------------------- pure-JAX reference ----------------------------- #

def _reference(x, params, stride):
    def bn_relu_ref(t, g, b):
        mean = t.mean(axis=(0, 2, 3), keepdims=True)
        var = t.var(axis=(0, 2, 3), keepdims=True)
        tn = (t - mean) / jnp.sqrt(var + _EPS)
        return jax.nn.relu(tn * g[None, :, None, None] + b[None, :, None, None])

    def conv(t, wt, s, p):
        return lax.conv_general_dilated(
            t, wt, (s, s), [(p, p), (p, p)],
            dimension_numbers=("NCHW", "OIHW", "NCHW"),
            precision=lax.Precision.HIGHEST)

    c = x.shape[1]
    cout = params["w1"].shape[0]
    out = bn_relu_ref(x, params["g1"], params["b1"])
    out = conv(out, params["w1"], stride, 1)
    out = bn_relu_ref(out, params["g2"], params["b2"])
    out = conv(out, params["w2"], 1, 1)
    identity = x if (stride == 1 and c == cout) else conv(x, params["wd"], stride, 0)
    return out + identity


# ----------------------------------- main ------------------------------------ #

def _make_params(key, c, cout, downsample):
    ks = jax.random.split(key, 8)
    p = {
        "g1": 1.0 + 0.1 * jax.random.normal(ks[1], (c,), jnp.float32),
        "b1": 0.1 * jax.random.normal(ks[2], (c,), jnp.float32),
        "w1": 0.1 * jax.random.normal(ks[3], (cout, c, 3, 3), jnp.float32),
        "g2": 1.0 + 0.1 * jax.random.normal(ks[4], (cout,), jnp.float32),
        "b2": 0.1 * jax.random.normal(ks[5], (cout,), jnp.float32),
        "w2": 0.1 * jax.random.normal(ks[6], (cout, cout, 3, 3), jnp.float32),
    }
    if downsample:
        p["wd"] = 0.1 * jax.random.normal(ks[7], (cout, c, 1, 1), jnp.float32)
    return p


if __name__ == "__main__":
    key = jax.random.PRNGKey(0)
    configs = [
        # (N, C, C_out, H, W, stride)
        (2, 4, 8, 16, 16, 2),    # downsample path (stride 2, C != C_out)
        (2, 8, 8, 16, 16, 1),    # identity-shortcut path
    ]
    for (N, C, COUT, H, W, STRIDE) in configs:
        k_x, k_p, key = jax.random.split(key, 3)
        x = jax.random.normal(k_x, (N, C, H, W), jnp.float32)
        params = _make_params(k_p, C, COUT, STRIDE != 1 or C != COUT)
        fwd = jax.jit(functools.partial(resnet_block_bnreluconv, stride=STRIDE))
        out = jax.block_until_ready(fwd(x, params))
        ref = _reference(x, params, STRIDE)
        Ho = (H - 1) // STRIDE + 1
        assert out.shape == (N, COUT, Ho, Ho), out.shape
        err = float(jnp.max(jnp.abs(out - ref)))
        assert err < 5e-2, f"stride={STRIDE}: max abs error vs reference = {err}"
    print("KERNEL_OK")
</pallas_src>

<mosaic_0001>
module attributes {stable_mosaic.version = 11 : i64} {
  func.func @_bn_stats_kernel(%arg0: i32, %arg1: memref<512x128xf32, #tpu.memory_space<vmem>>, %arg2: memref<1x2x128xf32, #tpu.memory_space<vmem>>) attributes {dimension_semantics = [#tpu.dimension_semantics<parallel>], iteration_bounds = array<i64: 1>, scalar_prefetch = 0 : i64, scratch_operands = 0 : i64, tpu.core_type = #tpu.core_type<tc>, window_params = [{transform_indices = @transform_0, window_bounds = array<i64: 512, 128>}, {transform_indices = @transform_1, window_bounds = array<i64: 1, 2, 128>}]} {
    %c0 = arith.constant 0 : index
    %c0_0 = arith.constant 0 : index
    %0 = vector.load %arg1[%c0, %c0_0] : memref<512x128xf32, #tpu.memory_space<vmem>>, vector<512x128xf32>
    %cst = arith.constant dense<0.000000e+00> : vector<128xf32>
    %1 = vector.multi_reduction <add>, %0, %cst [0] : vector<512x128xf32> to vector<128xf32>
    %2 = vector.shape_cast %1 : vector<128xf32> to vector<1x128xf32>
    %3 = vector.shape_cast %2 : vector<1x128xf32> to vector<1x1x128xf32>
    %c0_1 = arith.constant 0 : index
    %c0_2 = arith.constant 0 : index
    %c0_3 = arith.constant 0 : index
    %4 = vector.load %arg2[%c0_1, %c0_2, %c0_3] : memref<1x2x128xf32, #tpu.memory_space<vmem>>, vector<1x1x128xf32>
    tpu.vector_store %arg2[%c0_1, %c0_2, %c0_3], %3 {strides = array<i32>} : memref<1x2x128xf32, #tpu.memory_space<vmem>>, vector<1x1x128xf32>,
    %5 = arith.mulf %0, %0 : vector<512x128xf32>
    %cst_4 = arith.constant dense<0.000000e+00> : vector<128xf32>
    %6 = vector.multi_reduction <add>, %5, %cst_4 [0] : vector<512x128xf32> to vector<128xf32>
    %7 = vector.shape_cast %6 : vector<128xf32> to vector<1x128xf32>
    %8 = vector.shape_cast %7 : vector<1x128xf32> to vector<1x1x128xf32>
    %c0_5 = arith.constant 0 : index
    %c1 = arith.constant 1 : index
    %c0_6 = arith.constant 0 : index
    %9 = vector.load %arg2[%c0_5, %c1, %c0_6] : memref<1x2x128xf32, #tpu.memory_space<vmem>>, vector<1x1x128xf32>
    tpu.vector_store %arg2[%c0_5, %c1, %c0_6], %8 {strides = array<i32>} : memref<1x2x128xf32, #tpu.memory_space<vmem>>, vector<1x1x128xf32>,
    return
  }
  func.func @transform_0(%arg0: i32) -> (i32, i32) {
    %c0_i32 = arith.constant 0 : i32
    %c0_i32_0 = arith.constant 0 : i32
    return %arg0, %c0_i32 : i32, i32
  }
  func.func @transform_1(%arg0: i32) -> (i32, i32, i32) {
    %c0_i32 = arith.constant 0 : i32
    %c0_i32_0 = arith.constant 0 : i32
    %c0_i32_1 = arith.constant 0 : i32
    return %arg0, %c0_i32, %c0_i32_0 : i32, i32, i32
  }
}

module attributes {stable_mosaic.version = 11 : i64} {
  func.func @_conv_bnstats_kernel(%arg0: i32, %arg1: memref<1x332x128xbf16, #tpu.memory_space<vmem>>, %arg2: memref<9x128x128xbf16, #tpu.memory_space<vmem>>, %arg3: memref<72x1xf32, #tpu.memory_space<vmem>>, %arg4: memref<1x72x128xbf16, #tpu.memory_space<vmem>>, %arg5: memref<1x2x128xf32, #tpu.memory_space<vmem>>) attributes {dimension_semantics = [#tpu.dimension_semantics<parallel>], iteration_bounds = array<i64: 2>, scalar_prefetch = 0 : i64, scratch_operands = 0 : i64, tpu.core_type = #tpu.core_type<tc>, window_params = [{transform_indices = @transform_0, window_bounds = array<i64: 1, 332, 128>}, {pipeline_mode = #tpu.pipeline_mode<synchronous>, transform_indices = @transform_1, window_bounds = array<i64: 9, 128, 128>}, {pipeline_mode = #tpu.pipeline_mode<synchronous>, transform_indices = @transform_2, window_bounds = array<i64: 72, 1>}, {transform_indices = @transform_3, window_bounds = array<i64: 1, 72, 128>}, {transform_indices = @transform_4, window_bounds = array<i64: 1, 2, 128>}]} {
    %cst = arith.constant 0.000000e+00 : f32
    %0 = vector.broadcast %cst : f32 to vector<72x128xf32>
    %c0 = arith.constant 0 : index
    %c0_0 = arith.constant 0 : index
    %c0_1 = arith.constant 0 : index
    %1 = vector.load %arg1[%c0, %c0_0, %c0_1] : memref<1x332x128xbf16, #tpu.memory_space<vmem>>, vector<1x72x128xbf16>
    %2 = vector.shape_cast %1 : vector<1x72x128xbf16> to vector<72x128xbf16>
    %c0_2 = arith.constant 0 : index
    %c0_3 = arith.constant 0 : index
    %c0_4 = arith.constant 0 : index
    %3 = vector.load %arg2[%c0_2, %c0_3, %c0_4] : memref<9x128x128xbf16, #tpu.memory_space<vmem>>, vector<1x128x128xbf16>
    %4 = vector.shape_cast %3 : vector<1x128x128xbf16> to vector<128x128xbf16>
    %cst_5 = arith.constant dense<0.000000e+00> : vector<72x128xf32>
    %5 = tpu.matmul %2, %4, %cst_5 {dimension_numbers = #tpu.dot_dimension_numbers<[1], [0], [0], [1], [0, 0, 1, 1], [], []>} : vector<72x128xbf16>, vector<128x128xbf16>, vector<72x128xf32> -> vector<72x128xf32>
    %6 = arith.addf %0, %5 : vector<72x128xf32>
    %c0_6 = arith.constant 0 : index
    %c83 = arith.constant 83 : index
    %c0_7 = arith.constant 0 : index
    %7 = vector.load %arg1[%c0_6, %c83, %c0_7] : memref<1x332x128xbf16, #tpu.memory_space<vmem>>, vector<1x72x128xbf16>
    %8 = vector.shape_cast %7 : vector<1x72x128xbf16> to vector<72x128xbf16>
    %c1 = arith.constant 1 : index
    %c0_8 = arith.constant 0 : index
    %c0_9 = arith.constant 0 : index
    %9 = vector.load %arg2[%c1, %c0_8, %c0_9] : memref<9x128x128xbf16, #tpu.memory_space<vmem>>, vector<1x128x128xbf16>
    %10 = vector.shape_cast %9 : vector<1x128x128xbf16> to vector<128x128xbf16>
    %cst_10 = arith.constant dense<0.000000e+00> : vector<72x128xf32>
    %11 = tpu.matmul %8, %10, %cst_10 {dimension_numbers = #tpu.dot_dimension_numbers<[1], [0], [0], [1], [0, 0, 1, 1], [], []>} : vector<72x128xbf16>, vector<128x128xbf16>, vector<72x128xf32> -> vector<72x128xf32>
    %12 = arith.addf %6, %11 : vector<72x128xf32>
    %c0_11 = arith.constant 0 : index
    %c1_12 = arith.constant 1 : index
    %c0_13 = arith.constant 0 : index
    %13 = vector.load %arg1[%c0_11, %c1_12, %c0_13] : memref<1x332x128xbf16, #tpu.memory_space<vmem>>, vector<1x72x128xbf16>
    %14 = vector.shape_cast %13 : vector<1x72x128xbf16> to vector<72x128xbf16>
    %c2 = arith.constant 2 : index
    %c0_14 = arith.constant 0 : index
    %c0_15 = arith.constant 0 : index
    %15 = vector.load %arg2[%c2, %c0_14, %c0_15] : memref<9x128x128xbf16, #tpu.memory_space<vmem>>, vector<1x128x128xbf16>
    %16 = vector.shape_cast %15 : vector<1x128x128xbf16> to vector<128x128xbf16>
    %cst_16 = arith.constant dense<0.000000e+00> : vector<72x128xf32>
    %17 = tpu.matmul %14, %16, %cst_16 {dimension_numbers = #tpu.dot_dimension_numbers<[1], [0], [0], [1], [0, 0, 1, 1], [], []>} : vector<72x128xbf16>, vector<128x128xbf16>, vector<72x128xf32> -> vector<72x128xf32>
    %18 = arith.addf %12, %17 : vector<72x128xf32>
    %c0_17 = arith.constant 0 : index
    %c166 = arith.constant 166 : index
    %c0_18 = arith.constant 0 : index
    %19 = vector.load %arg1[%c0_17, %c166, %c0_18] : memref<1x332x128xbf16, #tpu.memory_space<vmem>>, vector<1x72x128xbf16>
    %20 = vector.shape_cast %19 : vector<1x72x128xbf16> to vector<72x128xbf16>
    %c3 = arith.constant 3 : index
    %c0_19 = arith.constant 0 : index
    %c0_20 = arith.constant 0 : index
    %21 = vector.load %arg2[%c3, %c0_19, %c0_20] : memref<9x128x128xbf16, #tpu.memory_space<vmem>>, vector<1x128x128xbf16>
    %22 = vector.shape_cast %21 : vector<1x128x128xbf16> to vector<128x128xbf16>
    %cst_21 = arith.constant dense<0.000000e+00> : vector<72x128xf32>
    %23 = tpu.matmul %20, %22, %cst_21 {dimension_numbers = #tpu.dot_dimension_numbers<[1], [0], [0], [1], [0, 0, 1, 1], [], []>} : vector<72x128xbf16>, vector<128x128xbf16>, vector<72x128xf32> -> vector<72x128xf32>
    %24 = arith.addf %18, %23 : vector<72x128xf32>
    %c0_22 = arith.constant 0 : index
    %c249 = arith.constant 249 : index
    %c0_23 = arith.constant 0 : index
    %25 = vector.load %arg1[%c0_22, %c249, %c0_23] : memref<1x332x128xbf16, #tpu.memory_space<vmem>>, vector<1x72x128xbf16>
    %26 = vector.shape_cast %25 : vector<1x72x128xbf16> to vector<72x128xbf16>
    %c4 = arith.constant 4 : index
    %c0_24 = arith.constant 0 : index
    %c0_25 = arith.constant 0 : index
    %27 = vector.load %arg2[%c4, %c0_24, %c0_25] : memref<9x128x128xbf16, #tpu.memory_space<vmem>>, vector<1x128x128xbf16>
    %28 = vector.shape_cast %27 : vector<1x128x128xbf16> to vector<128x128xbf16>
    %cst_26 = arith.constant dense<0.000000e+00> : vector<72x128xf32>
    %29 = tpu.matmul %26, %28, %cst_26 {dimension_numbers = #tpu.dot_dimension_numbers<[1], [0], [0], [1], [0, 0, 1, 1], [], []>} : vector<72x128xbf16>, vector<128x128xbf16>, vector<72x128xf32> -> vector<72x128xf32>
    %30 = arith.addf %24, %29 : vector<72x128xf32>
    %c0_27 = arith.constant 0 : index
    %c167 = arith.constant 167 : index
    %c0_28 = arith.constant 0 : index
    %31 = vector.load %arg1[%c0_27, %c167, %c0_28] : memref<1x332x128xbf16, #tpu.memory_space<vmem>>, vector<1x72x128xbf16>
    %32 = vector.shape_cast %31 : vector<1x72x128xbf16> to vector<72x128xbf16>
    %c5 = arith.constant 5 : index
    %c0_29 = arith.constant 0 : index
    %c0_30 = arith.constant 0 : index
    %33 = vector.load %arg2[%c5, %c0_29, %c0_30] : memref<9x128x128xbf16, #tpu.memory_space<vmem>>, vector<1x128x128xbf16>
    %34 = vector.shape_cast %33 : vector<1x128x128xbf16> to vector<128x128xbf16>
    %cst_31 = arith.constant dense<0.000000e+00> : vector<72x128xf32>
    %35 = tpu.matmul %32, %34, %cst_31 {dimension_numbers = #tpu.dot_dimension_numbers<[1], [0], [0], [1], [0, 0, 1, 1], [], []>} : vector<72x128xbf16>, vector<128x128xbf16>, vector<72x128xf32> -> vector<72x128xf32>
    %36 = arith.addf %30, %35 : vector<72x128xf32>
    %c0_32 = arith.constant 0 : index
    %c9 = arith.constant 9 : index
    %c0_33 = arith.constant 0 : index
    %37 = vector.load %arg1[%c0_32, %c9, %c0_33] : memref<1x332x128xbf16, #tpu.memory_space<vmem>>, vector<1x72x128xbf16>
    %38 = vector.shape_cast %37 : vector<1x72x128xbf16> to vector<72x128xbf16>
    %c6 = arith.constant 6 : index
    %c0_34 = arith.constant 0 : index
    %c0_35 = arith.constant 0 : index
    %39 = vector.load %arg2[%c6, %c0_34, %c0_35] : memref<9x128x128xbf16, #tpu.memory_space<vmem>>, vector<1x128x128xbf16>
    %40 = vector.shape_cast %39 : vector<1x128x128xbf16> to vector<128x128xbf16>
    %cst_36 = arith.constant dense<0.000000e+00> : vector<72x128xf32>
    %41 = tpu.matmul %38, %40, %cst_36 {dimension_numbers = #tpu.dot_dimension_numbers<[1], [0], [0], [1], [0, 0, 1, 1], [], []>} : vector<72x128xbf16>, vector<128x128xbf16>, vector<72x128xf32> -> vector<72x128xf32>
    %42 = arith.addf %36, %41 : vector<72x128xf32>
    %c0_37 = arith.constant 0 : index
    %c92 = arith.constant 92 : index
    %c0_38 = arith.constant 0 : index
    %43 = vector.load %arg1[%c0_37, %c92, %c0_38] : memref<1x332x128xbf16, #tpu.memory_space<vmem>>, vector<1x72x128xbf16>
    %44 = vector.shape_cast %43 : vector<1x72x128xbf16> to vector<72x128xbf16>
    %c7 = arith.constant 7 : index
    %c0_39 = arith.constant 0 : index
    %c0_40 = arith.constant 0 : index
    %45 = vector.load %arg2[%c7, %c0_39, %c0_40] : memref<9x128x128xbf16, #tpu.memory_space<vmem>>, vector<1x128x128xbf16>
    %46 = vector.shape_cast %45 : vector<1x128x128xbf16> to vector<128x128xbf16>
    %cst_41 = arith.constant dense<0.000000e+00> : vector<72x128xf32>
    %47 = tpu.matmul %44, %46, %cst_41 {dimension_numbers = #tpu.dot_dimension_numbers<[1], [0], [0], [1], [0, 0, 1, 1], [], []>} : vector<72x128xbf16>, vector<128x128xbf16>, vector<72x128xf32> -> vector<72x128xf32>
    %48 = arith.addf %42, %47 : vector<72x128xf32>
    %c0_42 = arith.constant 0 : index
    %c10 = arith.constant 10 : index
    %c0_43 = arith.constant 0 : index
    %49 = vector.load %arg1[%c0_42, %c10, %c0_43] : memref<1x332x128xbf16, #tpu.memory_space<vmem>>, vector<1x72x128xbf16>
    %50 = vector.shape_cast %49 : vector<1x72x128xbf16> to vector<72x128xbf16>
    %c8 = arith.constant 8 : index
    %c0_44 = arith.constant 0 : index
    %c0_45 = arith.constant 0 : index
    %51 = vector.load %arg2[%c8, %c0_44, %c0_45] : memref<9x128x128xbf16, #tpu.memory_space<vmem>>, vector<1x128x128xbf16>
    %52 = vector.shape_cast %51 : vector<1x128x128xbf16> to vector<128x128xbf16>
    %cst_46 = arith.constant dense<0.000000e+00> : vector<72x128xf32>
    %53 = tpu.matmul %50, %52, %cst_46 {dimension_numbers = #tpu.dot_dimension_numbers<[1], [0], [0], [1], [0, 0, 1, 1], [], []>} : vector<72x128xbf16>, vector<128x128xbf16>, vector<72x128xf32> -> vector<72x128xf32>
    %54 = arith.addf %48, %53 : vector<72x128xf32>
    %c0_47 = arith.constant 0 : index
    %c0_48 = arith.constant 0 : index
    %55 = vector.load %arg3[%c0_47, %c0_48] : memref<72x1xf32, #tpu.memory_space<vmem>>, vector<72x1xf32>
    %56 = vector.broadcast %55 : vector<72x1xf32> to vector<72x128xf32>
    %57 = arith.mulf %54, %56 : vector<72x128xf32>
    %58 = vector.shape_cast %57 : vector<72x128xf32> to vector<1x72x128xf32>
    %59 = arith.truncf %58 : vector<1x72x128xf32> to vector<1x72x128xbf16>
    %c0_49 = arith.constant 0 : index
    %c0_50 = arith.constant 0 : index
    %c0_51 = arith.constant 0 : index
    %60 = vector.load %arg4[%c0_49, %c0_50, %c0_51] : memref<1x72x128xbf16, #tpu.memory_space<vmem>>, vector<1x72x128xbf16>
    tpu.vector_store %arg4[%c0_49, %c0_50, %c0_51], %59 {strides = array<i32>} : memref<1x72x128xbf16, #tpu.memory_space<vmem>>, vector<1x72x128xbf16>,
    %cst_52 = arith.constant dense<0.000000e+00> : vector<128xf32>
    %61 = vector.multi_reduction <add>, %57, %cst_52 [0] : vector<72x128xf32> to vector<128xf32>
    %62 = vector.shape_cast %61 : vector<128xf32> to vector<1x128xf32>
    %63 = vector.shape_cast %62 : vector<1x128xf32> to vector<1x1x128xf32>
    %c0_53 = arith.constant 0 : index
    %c0_54 = arith.constant 0 : index
    %c0_55 = arith.constant 0 : index
    %64 = vector.load %arg5[%c0_53, %c0_54, %c0_55] : memref<1x2x128xf32, #tpu.memory_space<vmem>>, vector<1x1x128xf32>
    tpu.vector_store %arg5[%c0_53, %c0_54, %c0_55], %63 {strides = array<i32>} : memref<1x2x128xf32, #tpu.memory_space<vmem>>, vector<1x1x128xf32>,
    %65 = arith.mulf %57, %57 : vector<72x128xf32>
    %cst_56 = arith.constant dense<0.000000e+00> : vector<128xf32>
    %66 = vector.multi_reduction <add>, %65, %cst_56 [0] : vector<72x128xf32> to vector<128xf32>
    %67 = vector.shape_cast %66 : vector<128xf32> to vector<1x128xf32>
    %68 = vector.shape_cast %67 : vector<1x128xf32> to vector<1x1x128xf32>
    %c0_57 = arith.constant 0 : index
    %c1_58 = arith.constant 1 : index
    %c0_59 = arith.constant 0 : index
    %69 = vector.load %arg5[%c0_57, %c1_58, %c0_59] : memref<1x2x128xf32, #tpu.memory_space<vmem>>, vector<1x1x128xf32>
    tpu.vector_store %arg5[%c0_57, %c1_58, %c0_59], %68 {strides = array<i32>} : memref<1x2x128xf32, #tpu.memory_space<vmem>>, vector<1x1x128xf32>,
    return
  }
  func.func @transform_0(%arg0: i32) -> (i32, i32, i32) {
    %c0_i32 = arith.constant 0 : i32
    %c0_i32_0 = arith.constant 0 : i32
    %c0_i32_1 = arith.constant 0 : i32
    return %arg0, %c0_i32, %c0_i32_0 : i32, i32, i32
  }
  func.func @transform_1(%arg0: i32) -> (i32, i32, i32) {
    %c0_i32 = arith.constant 0 : i32
    %c0_i32_0 = arith.constant 0 : i32
    %c0_i32_1 = arith.constant 0 : i32
    %c0_i32_2 = arith.constant 0 : i32
    return %c0_i32, %c0_i32_0, %c0_i32_1 : i32, i32, i32
  }
  func.func @transform_2(%arg0: i32) -> (i32, i32) {
    %c0_i32 = arith.constant 0 : i32
    %c0_i32_0 = arith.constant 0 : i32
    %c0_i32_1 = arith.constant 0 : i32
    return %c0_i32, %c0_i32_0 : i32, i32
  }
  func.func @transform_3(%arg0: i32) -> (i32, i32, i32) {
    %c0_i32 = arith.constant 0 : i32
    %c0_i32_0 = arith.constant 0 : i32
    %c0_i32_1 = arith.constant 0 : i32
    return %arg0, %c0_i32, %c0_i32_0 : i32, i32, i32
  }
  func.func @transform_4(%arg0: i32) -> (i32, i32, i32) {
    %c0_i32 = arith.constant 0 : i32
    %c0_i32_0 = arith.constant 0 : i32
    %c0_i32_1 = arith.constant 0 : i32
    return %arg0, %c0_i32, %c0_i32_0 : i32, i32, i32
  }
}

module attributes {stable_mosaic.version = 11 : i64} {
  func.func @_conv2_downsample_kernel(%arg0: i32, %arg1: memref<1x102x128xbf16, #tpu.memory_space<vmem>>, %arg2: memref<102x1xf32, #tpu.memory_space<vmem>>, %arg3: memref<1x128xf32, #tpu.memory_space<vmem>>, %arg4: memref<1x128xf32, #tpu.memory_space<vmem>>, %arg5: memref<9x128x128xbf16, #tpu.memory_space<vmem>>, %arg6: memref<1x80x128xbf16, #tpu.memory_space<vmem>>, %arg7: memref<128x128xbf16, #tpu.memory_space<vmem>>, %arg8: memref<1x80x128xf32, #tpu.memory_space<vmem>>) attributes {dimension_semantics = [#tpu.dimension_semantics<parallel>], iteration_bounds = array<i64: 2>, scalar_prefetch = 0 : i64, scratch_operands = 0 : i64, tpu.core_type = #tpu.core_type<tc>, window_params = [{transform_indices = @transform_0, window_bounds = array<i64: 1, 102, 128>}, {pipeline_mode = #tpu.pipeline_mode<synchronous>, transform_indices = @transform_1, window_bounds = array<i64: 102, 1>}, {pipeline_mode = #tpu.pipeline_mode<synchronous>, transform_indices = @transform_2, window_bounds = array<i64: 1, 128>}, {pipeline_mode = #tpu.pipeline_mode<synchronous>, transform_indices = @transform_3, window_bounds = array<i64: 1, 128>}, {pipeline_mode = #tpu.pipeline_mode<synchronous>, transform_indices = @transform_4, window_bounds = array<i64: 9, 128, 128>}, {transform_indices = @transform_5, window_bounds = array<i64: 1, 80, 128>}, {pipeline_mode = #tpu.pipeline_mode<synchronous>, transform_indices = @transform_6, window_bounds = array<i64: 128, 128>}, {transform_indices = @transform_7, window_bounds = array<i64: 1, 80, 128>}]} {
    %c0 = arith.constant 0 : index
    %c0_0 = arith.constant 0 : index
    %0 = vector.load %arg3[%c0, %c0_0] : memref<1x128xf32, #tpu.memory_space<vmem>>, vector<1x128xf32>
    %c0_1 = arith.constant 0 : index
    %c0_2 = arith.constant 0 : index
    %1 = vector.load %arg4[%c0_1, %c0_2] : memref<1x128xf32, #tpu.memory_space<vmem>>, vector<1x128xf32>
    %cst = arith.constant 0.000000e+00 : f32
    %2 = vector.broadcast %cst : f32 to vector<80x128xf32>
    %c0_3 = arith.constant 0 : index
    %c0_4 = arith.constant 0 : index
    %c0_5 = arith.constant 0 : index
    %3 = vector.load %arg1[%c0_3, %c0_4, %c0_5] : memref<1x102x128xbf16, #tpu.memory_space<vmem>>, vector<1x80x128xbf16>
    %4 = vector.shape_cast %3 : vector<1x80x128xbf16> to vector<80x128xbf16>
    %5 = arith.extf %4 : vector<80x128xbf16> to vector<80x128xf32>
    %c0_6 = arith.constant 0 : index
    %c0_7 = arith.constant 0 : index
    %6 = vector.load %arg2[%c0_6, %c0_7] : memref<102x1xf32, #tpu.memory_space<vmem>>, vector<80x1xf32>
    %7 = vector.broadcast %0 : vector<1x128xf32> to vector<80x128xf32>
    %8 = arith.mulf %5, %7 : vector<80x128xf32>
    %9 = vector.broadcast %1 : vector<1x128xf32> to vector<80x128xf32>
    %10 = arith.addf %8, %9 : vector<80x128xf32>
    %cst_8 = arith.constant 0.000000e+00 : f32
    %11 = vector.broadcast %cst_8 : f32 to vector<80x128xf32>
    %12 = arith.maximumf %10, %11 : vector<80x128xf32>
    %13 = vector.broadcast %6 : vector<80x1xf32> to vector<80x128xf32>
    %14 = arith.mulf %12, %13 : vector<80x128xf32>
    %15 = arith.truncf %14 : vector<80x128xf32> to vector<80x128xbf16>
    %c0_9 = arith.constant 0 : index
    %c0_10 = arith.constant 0 : index
    %c0_11 = arith.constant 0 : index
    %16 = vector.load %arg5[%c0_9, %c0_10, %c0_11] : memref<9x128x128xbf16, #tpu.memory_space<vmem>>, vector<1x128x128xbf16>
    %17 = vector.shape_cast %16 : vector<1x128x128xbf16> to vector<128x128xbf16>
    %cst_12 = arith.constant dense<0.000000e+00> : vector<80x128xf32>
    %18 = tpu.matmul %15, %17, %cst_12 {dimension_numbers = #tpu.dot_dimension_numbers<[1], [0], [0], [1], [0, 0, 1, 1], [], []>} : vector<80x128xbf16>, vector<128x128xbf16>, vector<80x128xf32> -> vector<80x128xf32>
    %19 = arith.addf %2, %18 : vector<80x128xf32>
    %c0_13 = arith.constant 0 : index
    %c1 = arith.constant 1 : index
    %c0_14 = arith.constant 0 : index
    %20 = vector.load %arg1[%c0_13, %c1, %c0_14] : memref<1x102x128xbf16, #tpu.memory_space<vmem>>, vector<1x80x128xbf16>
    %21 = vector.shape_cast %20 : vector<1x80x128xbf16> to vector<80x128xbf16>
    %22 = arith.extf %21 : vector<80x128xbf16> to vector<80x128xf32>
    %c1_15 = arith.constant 1 : index
    %c0_16 = arith.constant 0 : index
    %23 = vector.load %arg2[%c1_15, %c0_16] : memref<102x1xf32, #tpu.memory_space<vmem>>, vector<80x1xf32>
    %24 = vector.broadcast %0 : vector<1x128xf32> to vector<80x128xf32>
    %25 = arith.mulf %22, %24 : vector<80x128xf32>
    %26 = vector.broadcast %1 : vector<1x128xf32> to vector<80x128xf32>
    %27 = arith.addf %25, %26 : vector<80x128xf32>
    %cst_17 = arith.constant 0.000000e+00 : f32
    %28 = vector.broadcast %cst_17 : f32 to vector<80x128xf32>
    %29 = arith.maximumf %27, %28 : vector<80x128xf32>
    %30 = vector.broadcast %23 : vector<80x1xf32> to vector<80x128xf32>
    %31 = arith.mulf %29, %30 : vector<80x128xf32>
    %32 = arith.truncf %31 : vector<80x128xf32> to vector<80x128xbf16>
    %c1_18 = arith.constant 1 : index
    %c0_19 = arith.constant 0 : index
    %c0_20 = arith.constant 0 : index
    %33 = vector.load %arg5[%c1_18, %c0_19, %c0_20] : memref<9x128x128xbf16, #tpu.memory_space<vmem>>, vector<1x128x128xbf16>
    %34 = vector.shape_cast %33 : vector<1x128x128xbf16> to vector<128x128xbf16>
    %cst_21 = arith.constant dense<0.000000e+00> : vector<80x128xf32>
    %35 = tpu.matmul %32, %34, %cst_21 {dimension_numbers = #tpu.dot_dimension_numbers<[1], [0], [0], [1], [0, 0, 1, 1], [], []>} : vector<80x128xbf16>, vector<128x128xbf16>, vector<80x128xf32> -> vector<80x128xf32>
    %36 = arith.addf %19, %35 : vector<80x128xf32>
    %c0_22 = arith.constant 0 : index
    %c2 = arith.constant 2 : index
    %c0_23 = arith.constant 0 : index
    %37 = vector.load %arg1[%c0_22, %c2, %c0_23] : memref<1x102x128xbf16, #tpu.memory_space<vmem>>, vector<1x80x128xbf16>
    %38 = vector.shape_cast %37 : vector<1x80x128xbf16> to vector<80x128xbf16>
    %39 = arith.extf %38 : vector<80x128xbf16> to vector<80x128xf32>
    %c2_24 = arith.constant 2 : index
    %c0_25 = arith.constant 0 : index
    %40 = vector.load %arg2[%c2_24, %c0_25] : memref<102x1xf32, #tpu.memory_space<vmem>>, vector<80x1xf32>
    %41 = vector.broadcast %0 : vector<1x128xf32> to vector<80x128xf32>
    %42 = arith.mulf %39, %41 : vector<80x128xf32>
    %43 = vector.broadcast %1 : vector<1x128xf32> to vector<80x128xf32>
    %44 = arith.addf %42, %43 : vector<80x128xf32>
    %cst_26 = arith.constant 0.000000e+00 : f32
    %45 = vector.broadcast %cst_26 : f32 to vector<80x128xf32>
    %46 = arith.maximumf %44, %45 : vector<80x128xf32>
    %47 = vector.broadcast %40 : vector<80x1xf32> to vector<80x128xf32>
    %48 = arith.mulf %46, %47 : vector<80x128xf32>
    %49 = arith.truncf %48 : vector<80x128xf32> to vector<80x128xbf16>
    %c2_27 = arith.constant 2 : index
    %c0_28 = arith.constant 0 : index
    %c0_29 = arith.constant 0 : index
    %50 = vector.load %arg5[%c2_27, %c0_28, %c0_29] : memref<9x128x128xbf16, #tpu.memory_space<vmem>>, vector<1x128x128xbf16>
    %51 = vector.shape_cast %50 : vector<1x128x128xbf16> to vector<128x128xbf16>
    %cst_30 = arith.constant dense<0.000000e+00> : vector<80x128xf32>
    %52 = tpu.matmul %49, %51, %cst_30 {dimension_numbers = #tpu.dot_dimension_numbers<[1], [0], [0], [1], [0, 0, 1, 1], [], []>} : vector<80x128xbf16>, vector<128x128xbf16>, vector<80x128xf32> -> vector<80x128xf32>
    %53 = arith.addf %36, %52 : vector<80x128xf32>
    %c0_31 = arith.constant 0 : index
    %c10 = arith.constant 10 : index
    %c0_32 = arith.constant 0 : index
    %54 = vector.load %arg1[%c0_31, %c10, %c0_32] : memref<1x102x128xbf16, #tpu.memory_space<vmem>>, vector<1x80x128xbf16>
    %55 = vector.shape_cast %54 : vector<1x80x128xbf16> to vector<80x128xbf16>
    %56 = arith.extf %55 : vector<80x128xbf16> to vector<80x128xf32>
    %c10_33 = arith.constant 10 : index
    %c0_34 = arith.constant 0 : index
    %57 = vector.load %arg2[%c10_33, %c0_34] : memref<102x1xf32, #tpu.memory_space<vmem>>, vector<80x1xf32>
    %58 = vector.broadcast %0 : vector<1x128xf32> to vector<80x128xf32>
    %59 = arith.mulf %56, %58 : vector<80x128xf32>
    %60 = vector.broadcast %1 : vector<1x128xf32> to vector<80x128xf32>
    %61 = arith.addf %59, %60 : vector<80x128xf32>
    %cst_35 = arith.constant 0.000000e+00 : f32
    %62 = vector.broadcast %cst_35 : f32 to vector<80x128xf32>
    %63 = arith.maximumf %61, %62 : vector<80x128xf32>
    %64 = vector.broadcast %57 : vector<80x1xf32> to vector<80x128xf32>
    %65 = arith.mulf %63, %64 : vector<80x128xf32>
    %66 = arith.truncf %65 : vector<80x128xf32> to vector<80x128xbf16>
    %c3 = arith.constant 3 : index
    %c0_36 = arith.constant 0 : index
    %c0_37 = arith.constant 0 : index
    %67 = vector.load %arg5[%c3, %c0_36, %c0_37] : memref<9x128x128xbf16, #tpu.memory_space<vmem>>, vector<1x128x128xbf16>
    %68 = vector.shape_cast %67 : vector<1x128x128xbf16> to vector<128x128xbf16>
    %cst_38 = arith.constant dense<0.000000e+00> : vector<80x128xf32>
    %69 = tpu.matmul %66, %68, %cst_38 {dimension_numbers = #tpu.dot_dimension_numbers<[1], [0], [0], [1], [0, 0, 1, 1], [], []>} : vector<80x128xbf16>, vector<128x128xbf16>, vector<80x128xf32> -> vector<80x128xf32>
    %70 = arith.addf %53, %69 : vector<80x128xf32>
    %c0_39 = arith.constant 0 : index
    %c11 = arith.constant 11 : index
    %c0_40 = arith.constant 0 : index
    %71 = vector.load %arg1[%c0_39, %c11, %c0_40] : memref<1x102x128xbf16, #tpu.memory_space<vmem>>, vector<1x80x128xbf16>
    %72 = vector.shape_cast %71 : vector<1x80x128xbf16> to vector<80x128xbf16>
    %73 = arith.extf %72 : vector<80x128xbf16> to vector<80x128xf32>
    %c11_41 = arith.constant 11 : index
    %c0_42 = arith.constant 0 : index
    %74 = vector.load %arg2[%c11_41, %c0_42] : memref<102x1xf32, #tpu.memory_space<vmem>>, vector<80x1xf32>
    %75 = vector.broadcast %0 : vector<1x128xf32> to vector<80x128xf32>
    %76 = arith.mulf %73, %75 : vector<80x128xf32>
    %77 = vector.broadcast %1 : vector<1x128xf32> to vector<80x128xf32>
    %78 = arith.addf %76, %77 : vector<80x128xf32>
    %cst_43 = arith.constant 0.000000e+00 : f32
    %79 = vector.broadcast %cst_43 : f32 to vector<80x128xf32>
    %80 = arith.maximumf %78, %79 : vector<80x128xf32>
    %81 = vector.broadcast %74 : vector<80x1xf32> to vector<80x128xf32>
    %82 = arith.mulf %80, %81 : vector<80x128xf32>
    %83 = arith.truncf %82 : vector<80x128xf32> to vector<80x128xbf16>
    %c4 = arith.constant 4 : index
    %c0_44 = arith.constant 0 : index
    %c0_45 = arith.constant 0 : index
    %84 = vector.load %arg5[%c4, %c0_44, %c0_45] : memref<9x128x128xbf16, #tpu.memory_space<vmem>>, vector<1x128x128xbf16>
    %85 = vector.shape_cast %84 : vector<1x128x128xbf16> to vector<128x128xbf16>
    %cst_46 = arith.constant dense<0.000000e+00> : vector<80x128xf32>
    %86 = tpu.matmul %83, %85, %cst_46 {dimension_numbers = #tpu.dot_dimension_numbers<[1], [0], [0], [1], [0, 0, 1, 1], [], []>} : vector<80x128xbf16>, vector<128x128xbf16>, vector<80x128xf32> -> vector<80x128xf32>
    %87 = arith.addf %70, %86 : vector<80x128xf32>
    %c0_47 = arith.constant 0 : index
    %c12 = arith.constant 12 : index
    %c0_48 = arith.constant 0 : index
    %88 = vector.load %arg1[%c0_47, %c12, %c0_48] : memref<1x102x128xbf16, #tpu.memory_space<vmem>>, vector<1x80x128xbf16>
    %89 = vector.shape_cast %88 : vector<1x80x128xbf16> to vector<80x128xbf16>
    %90 = arith.extf %89 : vector<80x128xbf16> to vector<80x128xf32>
    %c12_49 = arith.constant 12 : index
    %c0_50 = arith.constant 0 : index
    %91 = vector.load %arg2[%c12_49, %c0_50] : memref<102x1xf32, #tpu.memory_space<vmem>>, vector<80x1xf32>
    %92 = vector.broadcast %0 : vector<1x128xf32> to vector<80x128xf32>
    %93 = arith.mulf %90, %92 : vector<80x128xf32>
    %94 = vector.broadcast %1 : vector<1x128xf32> to vector<80x128xf32>
    %95 = arith.addf %93, %94 : vector<80x128xf32>
    %cst_51 = arith.constant 0.000000e+00 : f32
    %96 = vector.broadcast %cst_51 : f32 to vector<80x128xf32>
    %97 = arith.maximumf %95, %96 : vector<80x128xf32>
    %98 = vector.broadcast %91 : vector<80x1xf32> to vector<80x128xf32>
    %99 = arith.mulf %97, %98 : vector<80x128xf32>
    %100 = arith.truncf %99 : vector<80x128xf32> to vector<80x128xbf16>
    %c5 = arith.constant 5 : index
    %c0_52 = arith.constant 0 : index
    %c0_53 = arith.constant 0 : index
    %101 = vector.load %arg5[%c5, %c0_52, %c0_53] : memref<9x128x128xbf16, #tpu.memory_space<vmem>>, vector<1x128x128xbf16>
    %102 = vector.shape_cast %101 : vector<1x128x128xbf16> to vector<128x128xbf16>
    %cst_54 = arith.constant dense<0.000000e+00> : vector<80x128xf32>
    %103 = tpu.matmul %100, %102, %cst_54 {dimension_numbers = #tpu.dot_dimension_numbers<[1], [0], [0], [1], [0, 0, 1, 1], [], []>} : vector<80x128xbf16>, vector<128x128xbf16>, vector<80x128xf32> -> vector<80x128xf32>
    %104 = arith.addf %87, %103 : vector<80x128xf32>
    %c0_55 = arith.constant 0 : index
    %c20 = arith.constant 20 : index
    %c0_56 = arith.constant 0 : index
    %105 = vector.load %arg1[%c0_55, %c20, %c0_56] : memref<1x102x128xbf16, #tpu.memory_space<vmem>>, vector<1x80x128xbf16>
    %106 = vector.shape_cast %105 : vector<1x80x128xbf16> to vector<80x128xbf16>
    %107 = arith.extf %106 : vector<80x128xbf16> to vector<80x128xf32>
    %c20_57 = arith.constant 20 : index
    %c0_58 = arith.constant 0 : index
    %108 = vector.load %arg2[%c20_57, %c0_58] : memref<102x1xf32, #tpu.memory_space<vmem>>, vector<80x1xf32>
    %109 = vector.broadcast %0 : vector<1x128xf32> to vector<80x128xf32>
    %110 = arith.mulf %107, %109 : vector<80x128xf32>
    %111 = vector.broadcast %1 : vector<1x128xf32> to vector<80x128xf32>
    %112 = arith.addf %110, %111 : vector<80x128xf32>
    %cst_59 = arith.constant 0.000000e+00 : f32
    %113 = vector.broadcast %cst_59 : f32 to vector<80x128xf32>
    %114 = arith.maximumf %112, %113 : vector<80x128xf32>
    %115 = vector.broadcast %108 : vector<80x1xf32> to vector<80x128xf32>
    %116 = arith.mulf %114, %115 : vector<80x128xf32>
    %117 = arith.truncf %116 : vector<80x128xf32> to vector<80x128xbf16>
    %c6 = arith.constant 6 : index
    %c0_60 = arith.constant 0 : index
    %c0_61 = arith.constant 0 : index
    %118 = vector.load %arg5[%c6, %c0_60, %c0_61] : memref<9x128x128xbf16, #tpu.memory_space<vmem>>, vector<1x128x128xbf16>
    %119 = vector.shape_cast %118 : vector<1x128x128xbf16> to vector<128x128xbf16>
    %cst_62 = arith.constant dense<0.000000e+00> : vector<80x128xf32>
    %120 = tpu.matmul %117, %119, %cst_62 {dimension_numbers = #tpu.dot_dimension_numbers<[1], [0], [0], [1], [0, 0, 1, 1], [], []>} : vector<80x128xbf16>, vector<128x128xbf16>, vector<80x128xf32> -> vector<80x128xf32>
    %121 = arith.addf %104, %120 : vector<80x128xf32>
    %c0_63 = arith.constant 0 : index
    %c21 = arith.constant 21 : index
    %c0_64 = arith.constant 0 : index
    %122 = vector.load %arg1[%c0_63, %c21, %c0_64] : memref<1x102x128xbf16, #tpu.memory_space<vmem>>, vector<1x80x128xbf16>
    %123 = vector.shape_cast %122 : vector<1x80x128xbf16> to vector<80x128xbf16>
    %124 = arith.extf %123 : vector<80x128xbf16> to vector<80x128xf32>
    %c21_65 = arith.constant 21 : index
    %c0_66 = arith.constant 0 : index
    %125 = vector.load %arg2[%c21_65, %c0_66] : memref<102x1xf32, #tpu.memory_space<vmem>>, vector<80x1xf32>
    %126 = vector.broadcast %0 : vector<1x128xf32> to vector<80x128xf32>
    %127 = arith.mulf %124, %126 : vector<80x128xf32>
    %128 = vector.broadcast %1 : vector<1x128xf32> to vector<80x128xf32>
    %129 = arith.addf %127, %128 : vector<80x128xf32>
    %cst_67 = arith.constant 0.000000e+00 : f32
    %130 = vector.broadcast %cst_67 : f32 to vector<80x128xf32>
    %131 = arith.maximumf %129, %130 : vector<80x128xf32>
    %132 = vector.broadcast %125 : vector<80x1xf32> to vector<80x128xf32>
    %133 = arith.mulf %131, %132 : vector<80x128xf32>
    %134 = arith.truncf %133 : vector<80x128xf32> to vector<80x128xbf16>
    %c7 = arith.constant 7 : index
    %c0_68 = arith.constant 0 : index
    %c0_69 = arith.constant 0 : index
    %135 = vector.load %arg5[%c7, %c0_68, %c0_69] : memref<9x128x128xbf16, #tpu.memory_space<vmem>>, vector<1x128x128xbf16>
    %136 = vector.shape_cast %135 : vector<1x128x128xbf16> to vector<128x128xbf16>
    %cst_70 = arith.constant dense<0.000000e+00> : vector<80x128xf32>
    %137 = tpu.matmul %134, %136, %cst_70 {dimension_numbers = #tpu.dot_dimension_numbers<[1], [0], [0], [1], [0, 0, 1, 1], [], []>} : vector<80x128xbf16>, vector<128x128xbf16>, vector<80x128xf32> -> vector<80x128xf32>
    %138 = arith.addf %121, %137 : vector<80x128xf32>
    %c0_71 = arith.constant 0 : index
    %c22 = arith.constant 22 : index
    %c0_72 = arith.constant 0 : index
    %139 = vector.load %arg1[%c0_71, %c22, %c0_72] : memref<1x102x128xbf16, #tpu.memory_space<vmem>>, vector<1x80x128xbf16>
    %140 = vector.shape_cast %139 : vector<1x80x128xbf16> to vector<80x128xbf16>
    %141 = arith.extf %140 : vector<80x128xbf16> to vector<80x128xf32>
    %c22_73 = arith.constant 22 : index
    %c0_74 = arith.constant 0 : index
    %142 = vector.load %arg2[%c22_73, %c0_74] : memref<102x1xf32, #tpu.memory_space<vmem>>, vector<80x1xf32>
    %143 = vector.broadcast %0 : vector<1x128xf32> to vector<80x128xf32>
    %144 = arith.mulf %141, %143 : vector<80x128xf32>
    %145 = vector.broadcast %1 : vector<1x128xf32> to vector<80x128xf32>
    %146 = arith.addf %144, %145 : vector<80x128xf32>
    %cst_75 = arith.constant 0.000000e+00 : f32
    %147 = vector.broadcast %cst_75 : f32 to vector<80x128xf32>
    %148 = arith.maximumf %146, %147 : vector<80x128xf32>
    %149 = vector.broadcast %142 : vector<80x1xf32> to vector<80x128xf32>
    %150 = arith.mulf %148, %149 : vector<80x128xf32>
    %151 = arith.truncf %150 : vector<80x128xf32> to vector<80x128xbf16>
    %c8 = arith.constant 8 : index
    %c0_76 = arith.constant 0 : index
    %c0_77 = arith.constant 0 : index
    %152 = vector.load %arg5[%c8, %c0_76, %c0_77] : memref<9x128x128xbf16, #tpu.memory_space<vmem>>, vector<1x128x128xbf16>
    %153 = vector.shape_cast %152 : vector<1x128x128xbf16> to vector<128x128xbf16>
    %cst_78 = arith.constant dense<0.000000e+00> : vector<80x128xf32>
    %154 = tpu.matmul %151, %153, %cst_78 {dimension_numbers = #tpu.dot_dimension_numbers<[1], [0], [0], [1], [0, 0, 1, 1], [], []>} : vector<80x128xbf16>, vector<128x128xbf16>, vector<80x128xf32> -> vector<80x128xf32>
    %155 = arith.addf %138, %154 : vector<80x128xf32>
    %c0_79 = arith.constant 0 : index
    %c0_80 = arith.constant 0 : index
    %c0_81 = arith.constant 0 : index
    %156 = vector.load %arg6[%c0_79, %c0_80, %c0_81] : memref<1x80x128xbf16, #tpu.memory_space<vmem>>, vector<1x80x128xbf16>
    %157 = vector.shape_cast %156 : vector<1x80x128xbf16> to vector<80x128xbf16>
    %c0_82 = arith.constant 0 : index
    %c0_83 = arith.constant 0 : index
    %158 = vector.load %arg7[%c0_82, %c0_83] : memref<128x128xbf16, #tpu.memory_space<vmem>>, vector<128x128xbf16>
    %cst_84 = arith.constant dense<0.000000e+00> : vector<80x128xf32>
    %159 = tpu.matmul %157, %158, %cst_84 {dimension_numbers = #tpu.dot_dimension_numbers<[1], [0], [0], [1], [0, 0, 1, 1], [], []>} : vector<80x128xbf16>, vector<128x128xbf16>, vector<80x128xf32> -> vector<80x128xf32>
    %160 = arith.addf %155, %159 : vector<80x128xf32>
    %161 = vector.shape_cast %160 : vector<80x128xf32> to vector<1x80x128xf32>
    %c0_85 = arith.constant 0 : index
    %c0_86 = arith.constant 0 : index
    %c0_87 = arith.constant 0 : index
    %162 = vector.load %arg8[%c0_85, %c0_86, %c0_87] : memref<1x80x128xf32, #tpu.memory_space<vmem>>, vector<1x80x128xf32>
    tpu.vector_store %arg8[%c0_85, %c0_86, %c0_87], %161 {strides = array<i32>} : memref<1x80x128xf32, #tpu.memory_space<vmem>>, vector<1x80x128xf32>,
    return
  }
  func.func @transform_0(%arg0: i32) -> (i32, i32, i32) {
    %c0_i32 = arith.constant 0 : i32
    %c0_i32_0 = arith.constant 0 : i32
    %c0_i32_1 = arith.constant 0 : i32
    return %arg0, %c0_i32, %c0_i32_0 : i32, i32, i32
  }
  func.func @transform_1(%arg0: i32) -> (i32, i32) {
    %c0_i32 = arith.constant 0 : i32
    %c0_i32_0 = arith.constant 0 : i32
    %c0_i32_1 = arith.constant 0 : i32
    return %c0_i32, %c0_i32_0 : i32, i32
  }
  func.func @transform_2(%arg0: i32) -> (i32, i32) {
    %c0_i32 = arith.constant 0 : i32
    %c0_i32_0 = arith.constant 0 : i32
    %c0_i32_1 = arith.constant 0 : i32
    return %c0_i32, %c0_i32_0 : i32, i32
  }
  func.func @transform_3(%arg0: i32) -> (i32, i32) {
    %c0_i32 = arith.constant 0 : i32
    %c0_i32_0 = arith.constant 0 : i32
    %c0_i32_1 = arith.constant 0 : i32
    return %c0_i32, %c0_i32_0 : i32, i32
  }
  func.func @transform_4(%arg0: i32) -> (i32, i32, i32) {
    %c0_i32 = arith.constant 0 : i32
    %c0_i32_0 = arith.constant 0 : i32
    %c0_i32_1 = arith.constant 0 : i32
    %c0_i32_2 = arith.constant 0 : i32
    return %c0_i32, %c0_i32_0, %c0_i32_1 : i32, i32, i32
  }
  func.func @transform_5(%arg0: i32) -> (i32, i32, i32) {
    %c0_i32 = arith.constant 0 : i32
    %c0_i32_0 = arith.constant 0 : i32
    %c0_i32_1 = arith.constant 0 : i32
    return %arg0, %c0_i32, %c0_i32_0 : i32, i32, i32
  }
  func.func @transform_6(%arg0: i32) -> (i32, i32) {
    %c0_i32 = arith.constant 0 : i32
    %c0_i32_0 = arith.constant 0 : i32
    %c0_i32_1 = arith.constant 0 : i32
    return %c0_i32, %c0_i32_0 : i32, i32
  }
  func.func @transform_7(%arg0: i32) -> (i32, i32, i32) {
    %c0_i32 = arith.constant 0 : i32
    %c0_i32_0 = arith.constant 0 : i32
    %c0_i32_1 = arith.constant 0 : i32
    return %arg0, %c0_i32, %c0_i32_0 : i32, i32, i32
  }
}

</mosaic_0001>

<bundles_post_ra>
// kernel: resnet_block_bnreluconv.3
= control target key start
LH: loop header
LB: loop body
LE: loop exit
PB: predicated region body
PF: predicated region fallthrough
CT: control target
= control target key end

     0   :  { %s488_s0 = inlined_call_operand.vmem [shape: f32[512,128], index: 0, kind: input, shape index: {}]   ;;  %s489_s1 = inlined_call_operand.vmem [shape: f32[1,2,128], index: 1, kind: output, shape index: {}]  }
   0x1   :  { %v8_v0 = vld [vmem:[%s488_s0] sm:$0xff]  ;;  %v9_v1 = vld [vmem:[%s488_s0 + $0x8] sm:$0xff]  ;;  %v10_v2 = vld [vmem:[%s488_s0 + $0x10] sm:$0xff] }
   0x2   :  { %v11_v3 = vld [vmem:[%s488_s0 + $0x18] sm:$0xff]  ;;  %v72_v4 = vadd.f32 %v9_v1, %v8_v0  ;;  %v142_v5 = vmul.f32 %v8_v0, %v8_v0  ;;  %v143_v6 = vmul.f32 %v9_v1, %v9_v1  ;;  %v144_v7 = vmul.f32 %v10_v2, %v10_v2  ;;  %v12_v8 = vld [vmem:[%s488_s0 + $0x20] sm:$0xff]  ;;  %v13_v12 = vld [vmem:[%s488_s0 + $0x28] sm:$0xff] }
   0x3   :  { %v145_v10 = vmul.f32 %v11_v3, %v11_v3  ;;  %v146_v14 = vmul.f32 %v12_v8, %v12_v8  ;;  %v14_v16 = vld [vmem:[%s488_s0 + $0x30] sm:$0xff]  ;;  %v147_v18 = vmul.f32 %v13_v12, %v13_v12  ;;  %v15_v20 = vld [vmem:[%s488_s0 + $0x38] sm:$0xff]  ;;  %v16_v24 = vld [vmem:[%s488_s0 + $0x40] sm:$0xff] }
   0x4   :  { %v73_v9 = vadd.f32 %v72_v4, %v10_v2  ;;  %v206_v11 = vadd.f32 %v143_v6, %v142_v5  ;;  %v148_v22 = vmul.f32 %v14_v16, %v14_v16  ;;  %v149_v26 = vmul.f32 %v15_v20, %v15_v20  ;;  %v17_v28 = vld [vmem:[%s488_s0 + $0x48] sm:$0xff]  ;;  %v18_v32 = vld [vmem:[%s488_s0 + $0x50] sm:$0xff]  ;;  %v19_v36 = vld [vmem:[%s488_s0 + $0x58] sm:$0xff] }
   0x5   :  { %v150_v30 = vmul.f32 %v16_v24, %v16_v24  ;;  %v151_v34 = vmul.f32 %v17_v28, %v17_v28  ;;  %v152_v38 = vmul.f32 %v18_v32, %v18_v32  ;;  %v20_v40 = vld [vmem:[%s488_s0 + $0x60] sm:$0xff]  ;;  %v153_v42 = vmul.f32 %v19_v36, %v19_v36  ;;  %v21_v44 = vld [vmem:[%s488_s0 + $0x68] sm:$0xff]  ;;  %v22_v48 = vld [vmem:[%s488_s0 + $0x70] sm:$0xff] }
   0x6   :  { %v74_v13 = vadd.f32 %v73_v9, %v11_v3  ;;  %v207_v15 = vadd.f32 %v206_v11, %v144_v7  ;;  %v154_v46 = vmul.f32 %v20_v40, %v20_v40  ;;  %v155_v50 = vmul.f32 %v21_v44, %v21_v44  ;;  %v23_v52 = vld [vmem:[%s488_s0 + $0x78] sm:$0xff]  ;;  %v24_v56 = vld [vmem:[%s488_s0 + $0x80] sm:$0xff]  ;;  %v25_v60 = vld [vmem:[%s488_s0 + $0x88] sm:$0xff] }
   0x7   :  { %v156_v54 = vmul.f32 %v22_v48, %v22_v48  ;;  %v157_v58 = vmul.f32 %v23_v52, %v23_v52  ;;  %v158_v62 = vmul.f32 %v24_v56, %v24_v56  ;;  %v26_v0 = vld [vmem:[%s488_s0 + $0x90] sm:$0xff]  ;;  %v159_v2 = vmul.f32 %v25_v60, %v25_v60  ;;  %v27_v4 = vld [vmem:[%s488_s0 + $0x98] sm:$0xff] }
   0x8   :  { %v75_v17 = vadd.f32 %v74_v13, %v12_v8  ;;  %v208_v19 = vadd.f32 %v207_v15, %v145_v10  ;;  %v160_v6 = vmul.f32 %v26_v0, %v26_v0  ;;  %v28_v8 = vld [vmem:[%s488_s0 + $0xa0] sm:$0xff]  ;;  %v161_v10 = vmul.f32 %v27_v4, %v27_v4 }
   0xa   :  { %v76_v21 = vadd.f32 %v75_v17, %v13_v12  ;;  %v209_v23 = vadd.f32 %v208_v19, %v146_v14  ;;  %v29_v12 = vld [vmem:[%s488_s0 + $0xa8] sm:$0xff]  ;;  %v162_v14 = vmul.f32 %v28_v8, %v28_v8 }
   0xc   :  { %v77_v25 = vadd.f32 %v76_v21, %v14_v16  ;;  %v210_v27 = vadd.f32 %v209_v23, %v147_v18  ;;  %v30_v16 = vld [vmem:[%s488_s0 + $0xb0] sm:$0xff]  ;;  %v163_v18 = vmul.f32 %v29_v12, %v29_v12 }
   0xe   :  { %v78_v29 = vadd.f32 %v77_v25, %v15_v20  ;;  %v211_v31 = vadd.f32 %v210_v27, %v148_v22  ;;  %v31_v20 = vld [vmem:[%s488_s0 + $0xb8] sm:$0xff]  ;;  %v164_v22 = vmul.f32 %v30_v16, %v30_v16 }
  0x10   :  { %v79_v33 = vadd.f32 %v78_v29, %v16_v24  ;;  %v212_v35 = vadd.f32 %v211_v31, %v149_v26  ;;  %v32_v24 = vld [vmem:[%s488_s0 + $0xc0] sm:$0xff]  ;;  %v165_v26 = vmul.f32 %v31_v20, %v31_v20 }
  0x12   :  { %v80_v37 = vadd.f32 %v79_v33, %v17_v28  ;;  %v213_v39 = vadd.f32 %v212_v35, %v150_v30  ;;  %v33_v28 = vld [vmem:[%s488_s0 + $0xc8] sm:$0xff]  ;;  %v166_v30 = vmul.f32 %v32_v24, %v32_v24 }
  0x14   :  { %v81_v41 = vadd.f32 %v80_v37, %v18_v32  ;;  %v214_v43 = vadd.f32 %v213_v39, %v151_v34  ;;  %v34_v32 = vld [vmem:[%s488_s0 + $0xd0] sm:$0xff]  ;;  %v167_v34 = vmul.f32 %v33_v28, %v33_v28 }
  0x16   :  { %v82_v45 = vadd.f32 %v81_v41, %v19_v36  ;;  %v215_v47 = vadd.f32 %v214_v43, %v152_v38  ;;  %v35_v36 = vld [vmem:[%s488_s0 + $0xd8] sm:$0xff]  ;;  %v168_v38 = vmul.f32 %v34_v32, %v34_v32 }
  0x18   :  { %v83_v49 = vadd.f32 %v82_v45, %v20_v40  ;;  %v216_v51 = vadd.f32 %v215_v47, %v153_v42  ;;  %v36_v40 = vld [vmem:[%s488_s0 + $0xe0] sm:$0xff]  ;;  %v169_v42 = vmul.f32 %v35_v36, %v35_v36 }
  0x1a   :  { %v84_v53 = vadd.f32 %v83_v49, %v21_v44  ;;  %v217_v55 = vadd.f32 %v216_v51, %v154_v46  ;;  %v37_v44 = vld [vmem:[%s488_s0 + $0xe8] sm:$0xff]  ;;  %v170_v46 = vmul.f32 %v36_v40, %v36_v40 }
  0x1c   :  { %v85_v57 = vadd.f32 %v84_v53, %v22_v48  ;;  %v218_v59 = vadd.f32 %v217_v55, %v155_v50  ;;  %v38_v48 = vld [vmem:[%s488_s0 + $0xf0] sm:$0xff]  ;;  %v171_v50 = vmul.f32 %v37_v44, %v37_v44 }
  0x1e   :  { %v86_v61 = vadd.f32 %v85_v57, %v23_v52  ;;  %v219_v63 = vadd.f32 %v218_v59, %v156_v54  ;;  %v39_v52 = vld [vmem:[%s488_s0 + $0xf8] sm:$0xff]  ;;  %v172_v54 = vmul.f32 %v38_v48, %v38_v48 }
  0x20   :  { %v87_v1 = vadd.f32 %v86_v61, %v24_v56  ;;  %v220_v3 = vadd.f32 %v219_v63, %v157_v58  ;;  %v40_v56 = vld [vmem:[%s488_s0 + $0x100] sm:$0xff]  ;;  %v173_v58 = vmul.f32 %v39_v52, %v39_v52 }
  0x22   :  { %v88_v5 = vadd.f32 %v87_v1, %v25_v60  ;;  %v221_v7 = vadd.f32 %v220_v3, %v158_v62  ;;  %v41_v60 = vld [vmem:[%s488_s0 + $0x108] sm:$0xff]  ;;  %v174_v62 = vmul.f32 %v40_v56, %v40_v56 }
  0x24   :  { %v89_v9 = vadd.f32 %v88_v5, %v26_v0  ;;  %v222_v11 = vadd.f32 %v221_v7, %v159_v2  ;;  %v42_v0 = vld [vmem:[%s488_s0 + $0x110] sm:$0xff]  ;;  %v175_v2 = vmul.f32 %v41_v60, %v41_v60 }
  0x26   :  { %v90_v13 = vadd.f32 %v89_v9, %v27_v4  ;;  %v223_v15 = vadd.f32 %v222_v11, %v160_v6  ;;  %v43_v4 = vld [vmem:[%s488_s0 + $0x118] sm:$0xff]  ;;  %v176_v6 = vmul.f32 %v42_v0, %v42_v0 }
  0x28   :  { %v91_v17 = vadd.f32 %v90_v13, %v28_v8  ;;  %v224_v19 = vadd.f32 %v223_v15, %v161_v10  ;;  %v44_v8 = vld [vmem:[%s488_s0 + $0x120] sm:$0xff]  ;;  %v177_v10 = vmul.f32 %v43_v4, %v43_v4 }
  0x2a   :  { %v92_v21 = vadd.f32 %v91_v17, %v29_v12  ;;  %v225_v23 = vadd.f32 %v224_v19, %v162_v14  ;;  %v45_v12 = vld [vmem:[%s488_s0 + $0x128] sm:$0xff]  ;;  %v178_v14 = vmul.f32 %v44_v8, %v44_v8 }
  0x2c   :  { %v93_v25 = vadd.f32 %v92_v21, %v30_v16  ;;  %v226_v27 = vadd.f32 %v225_v23, %v163_v18  ;;  %v46_v16 = vld [vmem:[%s488_s0 + $0x130] sm:$0xff]  ;;  %v179_v18 = vmul.f32 %v45_v12, %v45_v12 }
  0x2e   :  { %v94_v29 = vadd.f32 %v93_v25, %v31_v20  ;;  %v227_v31 = vadd.f32 %v226_v27, %v164_v22  ;;  %v47_v20 = vld [vmem:[%s488_s0 + $0x138] sm:$0xff]  ;;  %v180_v22 = vmul.f32 %v46_v16, %v46_v16 }
  0x30   :  { %v95_v33 = vadd.f32 %v94_v29, %v32_v24  ;;  %v228_v35 = vadd.f32 %v227_v31, %v165_v26  ;;  %v48_v24 = vld [vmem:[%s488_s0 + $0x140] sm:$0xff]  ;;  %v181_v26 = vmul.f32 %v47_v20, %v47_v20 }
  0x32   :  { %v96_v37 = vadd.f32 %v95_v33, %v33_v28  ;;  %v229_v39 = vadd.f32 %v228_v35, %v166_v30  ;;  %v49_v28 = vld [vmem:[%s488_s0 + $0x148] sm:$0xff]  ;;  %v182_v30 = vmul.f32 %v48_v24, %v48_v24 }
  0x34   :  { %v97_v41 = vadd.f32 %v96_v37, %v34_v32  ;;  %v230_v43 = vadd.f32 %v229_v39, %v167_v34  ;;  %v50_v32 = vld [vmem:[%s488_s0 + $0x150] sm:$0xff]  ;;  %v183_v34 = vmul.f32 %v49_v28, %v49_v28 }
  0x36   :  { %v98_v45 = vadd.f32 %v97_v41, %v35_v36  ;;  %v231_v47 = vadd.f32 %v230_v43, %v168_v38  ;;  %v51_v36 = vld [vmem:[%s488_s0 + $0x158] sm:$0xff]  ;;  %v184_v38 = vmul.f32 %v50_v32, %v50_v32 }
  0x38   :  { %v99_v49 = vadd.f32 %v98_v45, %v36_v40  ;;  %v232_v51 = vadd.f32 %v231_v47, %v169_v42  ;;  %v52_v40 = vld [vmem:[%s488_s0 + $0x160] sm:$0xff]  ;;  %v185_v42 = vmul.f32 %v51_v36, %v51_v36 }
  0x3a   :  { %v100_v53 = vadd.f32 %v99_v49, %v37_v44  ;;  %v233_v55 = vadd.f32 %v232_v51, %v170_v46  ;;  %v53_v44 = vld [vmem:[%s488_s0 + $0x168] sm:$0xff]  ;;  %v186_v46 = vmul.f32 %v52_v40, %v52_v40 }
  0x3c   :  { %v101_v57 = vadd.f32 %v100_v53, %v38_v48  ;;  %v234_v59 = vadd.f32 %v233_v55, %v171_v50  ;;  %v54_v48 = vld [vmem:[%s488_s0 + $0x170] sm:$0xff]  ;;  %v187_v50 = vmul.f32 %v53_v44, %v53_v44 }
  0x3e   :  { %v102_v61 = vadd.f32 %v101_v57, %v39_v52  ;;  %v235_v63 = vadd.f32 %v234_v59, %v172_v54  ;;  %v55_v52 = vld [vmem:[%s488_s0 + $0x178] sm:$0xff]  ;;  %v188_v54 = vmul.f32 %v54_v48, %v54_v48 }
  0x40   :  { %v103_v1 = vadd.f32 %v102_v61, %v40_v56  ;;  %v236_v3 = vadd.f32 %v235_v63, %v173_v58  ;;  %v56_v56 = vld [vmem:[%s488_s0 + $0x180] sm:$0xff]  ;;  %v189_v58 = vmul.f32 %v55_v52, %v55_v52 }
  0x42   :  { %v104_v5 = vadd.f32 %v103_v1, %v41_v60  ;;  %v237_v7 = vadd.f32 %v236_v3, %v174_v62  ;;  %v57_v60 = vld [vmem:[%s488_s0 + $0x188] sm:$0xff]  ;;  %v190_v62 = vmul.f32 %v56_v56, %v56_v56 }
  0x44   :  { %v105_v9 = vadd.f32 %v104_v5, %v42_v0  ;;  %v238_v11 = vadd.f32 %v237_v7, %v175_v2  ;;  %v58_v0 = vld [vmem:[%s488_s0 + $0x190] sm:$0xff]  ;;  %v191_v2 = vmul.f32 %v57_v60, %v57_v60 }
  0x46   :  { %v106_v13 = vadd.f32 %v105_v9, %v43_v4  ;;  %v239_v15 = vadd.f32 %v238_v11, %v176_v6  ;;  %v59_v4 = vld [vmem:[%s488_s0 + $0x198] sm:$0xff]  ;;  %v192_v6 = vmul.f32 %v58_v0, %v58_v0 }
  0x48   :  { %v107_v17 = vadd.f32 %v106_v13, %v44_v8  ;;  %v240_v19 = vadd.f32 %v239_v15, %v177_v10  ;;  %v60_v8 = vld [vmem:[%s488_s0 + $0x1a0] sm:$0xff]  ;;  %v193_v10 = vmul.f32 %v59_v4, %v59_v4 }
  0x4a   :  { %v108_v21 = vadd.f32 %v107_v17, %v45_v12  ;;  %v241_v23 = vadd.f32 %v240_v19, %v178_v14  ;;  %v61_v12 = vld [vmem:[%s488_s0 + $0x1a8] sm:$0xff]  ;;  %v194_v14 = vmul.f32 %v60_v8, %v60_v8 }
  0x4c   :  { %v109_v25 = vadd.f32 %v108_v21, %v46_v16  ;;  %v242_v27 = vadd.f32 %v241_v23, %v179_v18  ;;  %v62_v16 = vld [vmem:[%s488_s0 + $0x1b0] sm:$0xff]  ;;  %v195_v18 = vmul.f32 %v61_v12, %v61_v12 }
  0x4e   :  { %v110_v29 = vadd.f32 %v109_v25, %v47_v20  ;;  %v243_v31 = vadd.f32 %v242_v27, %v180_v22  ;;  %v63_v20 = vld [vmem:[%s488_s0 + $0x1b8] sm:$0xff]  ;;  %v196_v22 = vmul.f32 %v62_v16, %v62_v16 }
  0x50   :  { %v111_v33 = vadd.f32 %v110_v29, %v48_v24  ;;  %v244_v35 = vadd.f32 %v243_v31, %v181_v26  ;;  %v64_v24 = vld [vmem:[%s488_s0 + $0x1c0] sm:$0xff]  ;;  %v197_v26 = vmul.f32 %v63_v20, %v63_v20 }
  0x52   :  { %v112_v37 = vadd.f32 %v111_v33, %v49_v28  ;;  %v245_v39 = vadd.f32 %v244_v35, %v182_v30  ;;  %v65_v28 = vld [vmem:[%s488_s0 + $0x1c8] sm:$0xff]  ;;  %v198_v30 = vmul.f32 %v64_v24, %v64_v24 }
  0x54   :  { %v113_v41 = vadd.f32 %v112_v37, %v50_v32  ;;  %v246_v43 = vadd.f32 %v245_v39, %v183_v34  ;;  %v66_v32 = vld [vmem:[%s488_s0 + $0x1d0] sm:$0xff]  ;;  %v199_v34 = vmul.f32 %v65_v28, %v65_v28 }
  0x56   :  { %v114_v45 = vadd.f32 %v113_v41, %v51_v36  ;;  %v247_v47 = vadd.f32 %v246_v43, %v184_v38  ;;  %v67_v36 = vld [vmem:[%s488_s0 + $0x1d8] sm:$0xff]  ;;  %v200_v38 = vmul.f32 %v66_v32, %v66_v32 }
  0x58   :  { %v115_v49 = vadd.f32 %v114_v45, %v52_v40  ;;  %v248_v51 = vadd.f32 %v247_v47, %v185_v42  ;;  %v68_v40 = vld [vmem:[%s488_s0 + $0x1e0] sm:$0xff]  ;;  %v201_v42 = vmul.f32 %v67_v36, %v67_v36 }
  0x5a   :  { %v116_v53 = vadd.f32 %v115_v49, %v53_v44  ;;  %v249_v55 = vadd.f32 %v248_v51, %v186_v46  ;;  %v69_v44 = vld [vmem:[%s488_s0 + $0x1e8] sm:$0xff]  ;;  %v202_v46 = vmul.f32 %v68_v40, %v68_v40 }
  0x5c   :  { %v117_v57 = vadd.f32 %v116_v53, %v54_v48  ;;  %v250_v59 = vadd.f32 %v249_v55, %v187_v50  ;;  %v70_v48 = vld [vmem:[%s488_s0 + $0x1f0] sm:$0xff]  ;;  %v203_v50 = vmul.f32 %v69_v44, %v69_v44 }
  0x5e   :  { %v118_v61 = vadd.f32 %v117_v57, %v55_v52  ;;  %v251_v63 = vadd.f32 %v250_v59, %v188_v54  ;;  %v71_v52 = vld [vmem:[%s488_s0 + $0x1f8] sm:$0xff]  ;;  %v204_v54 = vmul.f32 %v70_v48, %v70_v48 }
  0x5f   :  { %v205_v57 = vmul.f32 %v71_v52, %v71_v52 }
  0x60   :  { %v119_v1 = vadd.f32 %v118_v61, %v56_v56  ;;  %v252_v3 = vadd.f32 %v251_v63, %v189_v58 }
  0x62   :  { %v120_v5 = vadd.f32 %v119_v1, %v57_v60  ;;  %v253_v7 = vadd.f32 %v252_v3, %v190_v62 }
  0x64   :  { %v121_v9 = vadd.f32 %v120_v5, %v58_v0  ;;  %v254_v11 = vadd.f32 %v253_v7, %v191_v2 }
  0x66   :  { %v122_v13 = vadd.f32 %v121_v9, %v59_v4  ;;  %v255_v15 = vadd.f32 %v254_v11, %v192_v6 }
  0x68   :  { %v123_v17 = vadd.f32 %v122_v13, %v60_v8  ;;  %v256_v19 = vadd.f32 %v255_v15, %v193_v10 }
  0x6a   :  { %v124_v21 = vadd.f32 %v123_v17, %v61_v12  ;;  %v257_v23 = vadd.f32 %v256_v19, %v194_v14 }
  0x6c   :  { %v125_v25 = vadd.f32 %v124_v21, %v62_v16  ;;  %v258_v27 = vadd.f32 %v257_v23, %v195_v18 }
  0x6e   :  { %v126_v29 = vadd.f32 %v125_v25, %v63_v20  ;;  %v259_v31 = vadd.f32 %v258_v27, %v196_v22 }
  0x70   :  { %v127_v33 = vadd.f32 %v126_v29, %v64_v24  ;;  %v260_v35 = vadd.f32 %v259_v31, %v197_v26 }
  0x72   :  { %v128_v37 = vadd.f32 %v127_v33, %v65_v28  ;;  %v261_v39 = vadd.f32 %v260_v35, %v198_v30 }
  0x74   :  { %v129_v41 = vadd.f32 %v128_v37, %v66_v32  ;;  %v262_v43 = vadd.f32 %v261_v39, %v199_v34 }
  0x76   :  { %v130_v45 = vadd.f32 %v129_v41, %v67_v36  ;;  %v263_v47 = vadd.f32 %v262_v43, %v200_v38 }
  0x78   :  { %v131_v49 = vadd.f32 %v130_v45, %v68_v40  ;;  %v264_v51 = vadd.f32 %v263_v47, %v201_v42 }
  0x7a   :  { %v132_v53 = vadd.f32 %v131_v49, %v69_v44  ;;  %v265_v55 = vadd.f32 %v264_v51, %v202_v46 }
  0x7c   :  { %v133_v56 = vadd.f32 %v132_v53, %v70_v48  ;;  %v266_v58 = vadd.f32 %v265_v55, %v203_v50 }
  0x7e   :  { %v134_v59 = vadd.f32 %v133_v56, %v71_v52  ;;  %v267_v60 = vadd.f32 %v266_v58, %v204_v54 }
  0x80   :  { %v135_v61 = vrot.slane %v134_v59, 4  ;;  %v268_v62 = vadd.f32 %v267_v60, %v205_v57 }
  0x82   :  { %v136_v63 = vadd.f32 %v135_v61, %v134_v59  ;;  %v269_v0 = vrot.slane %v268_v62, 4 }
  0x84   :  { %v137_v1 = vrot.slane %v136_v63, 2  ;;  %v270_v2 = vadd.f32 %v269_v0, %v268_v62 }
  0x86   :  { %v138_v3 = vadd.f32 %v137_v1, %v136_v63  ;;  %v271_v4 = vrot.slane %v270_v2, 2 }
  0x88   :  { %v139_v5 = vrot.slane %v138_v3, 1  ;;  %v272_v6 = vadd.f32 %v271_v4, %v270_v2 }
  0x8a   :  { %v140_v7 = vadd.f32 %v139_v5, %v138_v3  ;;  %v273_v8 = vrot.slane %v272_v6, 1 }
  0x8c   :  { %141 = vst [vmem:[%s489_s1] sm:$0x1] %v140_v7  ;;  %v274_v9 = vadd.f32 %v273_v8, %v272_v6 }
  0x8e   :  { %275 = vst [vmem:[%s489_s1 + $0x1] sm:$0x1] %v274_v9 }

// kernel: resnet_block_bnreluconv.4
= control target key start
LH: loop header
LB: loop body
LE: loop exit
PB: predicated region body
PF: predicated region fallthrough
CT: control target
= control target key end

     0   :  { %s3177_s15 = smov 0   ;;  %s3806_s0 = inlined_call_operand.vmem [shape: bf16[2,332,128], index: 0, kind: input, shape index: {}]   ;;  %s3807_s1 = inlined_call_operand.vmem [shape: bf16[9,128,128], index: 1, kind: input, shape index: {}]   ;;  %s3808_s2 = inlined_call_operand.vmem [shape: f32[72,1], index: 2, kind: input, shape index: {}]   ;;  %s3809_s3 = inlined_call_operand.vmem [shape: bf16[2,72,128], index: 3, kind: output, shape index: {0}]   ;;  %s3810_s4 = inlined_call_operand.vmem [shape: f32[2,2,128], index: 4, kind: output, shape index: {1}]  }
   0x1 LB: > { %s2272_s16 = sadd.s32 4294967295, %s3147_s15   ;;  %p2276_p0 = scmp.ge.s32.totalorder %s3147_s15, 1  ;;  %s3147_s15 = sphi %s3177_s15, %s15_s15  }
   0x2   : > { %p165_p1 = scmp.lt.s32.totalorder %s3147_s15, 3 }
   0x4   : > { %p166_p2 = pnand %p2276_p0, %p165_p1 }
   0x5   : > { %p195_p3 = scmp.lt.s32.totalorder (!%p166_p2), %s2272_s16, 1 }
   0x6   : > { %169 = sbr.rel (%p166_p2) target bundleno = 444 (0x1bc), region = 32 }
   0xb   : > { %v3032_v0 = vld [vmem:[%s3807_s1 + $0x78] sm:$0xff]   ;;  %v3149_v1 = vmov 0.0   ;;  %v3034_v3 = vld [vmem:[%s3807_s1 + $0x70] sm:$0xff]   ;;  %vm3150_vm0 = vmmov 0   ;;  %v3036_v5 = vld [vmem:[%s3807_s1 + $0x68] sm:$0xff]   ;;  %s3812_s16 = smov (!%p195_p3, %s2272_s16), 1 }
   0xc   : > { %2677 = vmatprep.subr.bf16.mxu0 %v3149_v1  ;;  %2713 = vmatprep.subr.bf16.mxu1 %v3149_v1  ;;  %v3033_v2 = vld [vmem:[%s3807_s1 + $0x38] sm:$0xff]   ;;  %v3035_v4 = vld [vmem:[%s3807_s1 + $0x30] sm:$0xff]   ;;  %v3037_v6 = vld [vmem:[%s3807_s1 + $0x28] sm:$0xff]   ;;  %s3017_s5 = smul.u32 168, %s3812_s16  ;;  %vm287_vm1 = vsmask.f32 6400 }
   0xd   : > { %2678 = vmatpush3.bf16.msra.mxu0 %v3032_v0  ;;  %2693 = vmatprep.mubr.msk.bf16.mxu0 %vm3150_vm0, %v3149_v1  ;;  %v3038_v7 = vld [vmem:[%s3807_s1 + $0x60] sm:$0xff]   ;;  %v3040_v9 = vld [vmem:[%s3807_s1 + $0x58] sm:$0xff]   ;;  %v3042_v13 = vld [vmem:[%s3807_s1 + $0x50] sm:$0xff]   ;;  %vm657_vm2 = vsmask.f32 7424  ;;  %vm883_vm3 = vcmask 1044480  }
   0xe   : > { %2714 = vmatpush3.bf16.msra.mxu1 %v3033_v2  ;;  %2679 = vmatprep.subr.bf16.mxu0 %v3149_v1  ;;  %v3039_v8 = vld [vmem:[%s3807_s1 + $0x20] sm:$0xff]   ;;  %s3230_s12 = scalar_lea.vmem %s3806_s0, %s3017_s5  ;;  %v3041_v10 = vld [vmem:[%s3807_s1 + $0x18] sm:$0xff]   ;;  %v3043_v14 = vld [vmem:[%s3807_s1 + $0x10] sm:$0xff]   ;;  %vm1273_vm4 = vsmask.f32 4352  ;;  %vm1729_vm5 = vcmask 1045504  }
   0xf   : > { %2715 = vmatprep.subr.bf16.mxu1 %v3149_v1  ;;  %2729 = vmatprep.mubr.msk.bf16.mxu1 %vm3150_vm0, %v3149_v1  ;;  %v3048_v11 = vld [vmem:[%s3230_s12 + $0x28] sm:$0xfe]   ;;  %v3049_v12 = vld [vmem:[%s3230_s12 + $0x30] sm:$0xff]   ;;  %v3053_v25 = vld [vmem:[%s3230_s12 + $0x38] sm:$0xff]   ;;  %vm1894_vm6 = vcmask 1046528   ;;  %s2279_s24 = sshll.u32 %s3812_s16, 1 }
  0x10   : > { %v289_v15 = vshrl.u32 %v3048_v11, 16  ;;  %v292_v16 = vshll.u32 %v3048_v11, 16  ;;  %v297_v17 = vshrl.u32 %v3049_v12, 16  ;;  %v300_v18 = vshll.u32 %v3049_v12, 16  ;;  %v3044_v19 = vld [vmem:[%s3807_s1 + $0x48] sm:$0xff]   ;;  %v3046_v26 = vld [vmem:[%s3807_s1 + $0x40] sm:$0xff]   ;;  %s208_s27 = scalar_lea.vmem %s3810_s4, %s2279_s24 }
  0x11   : > { %2680 = vmatpush3.bf16.msra.mxu0 %v3034_v3  ;;  %v3045_v20 = vld [vmem:[%s3807_s1 + $0x8] sm:$0xff]   ;;  %v306_v27 = vshrl.u32 %v3053_v25, 16  ;;  %v309_v28 = vshll.u32 %v3053_v25, 16  ;;  %v3047_v31 = vld [vmem:[%s3807_s1] sm:$0xff]   ;;  %v3051_v33 = vld [vmem:[%s3807_s1 + $0xb8] sm:$0xff]  }
  0x12   : > { %2716 = vmatpush3.bf16.msra.mxu1 %v3035_v4  ;;  %2681 = vmatprep.subr.bf16.mxu0 %v3149_v1  ;;  %v291_v21 = vrot.slane %v289_v15, 1  ;;  %v294_v22 = vrot.slane %v292_v16, 2  ;;  %v299_v23 = vrot.slane %v297_v17, 1  ;;  %v302_v24 = vrot.slane %v300_v18, 2  ;;  %v3050_v32 = vld [vmem:[%s3230_s12] sm:$0xff]   ;;  %v3055_v38 = vld [vmem:[%s3807_s1 + $0xf8] sm:$0xff]  }
  0x13   : > { %2717 = vmatprep.subr.bf16.mxu1 %v3149_v1  ;;  %v308_v34 = vrot.slane %v306_v27, 1  ;;  %v311_v35 = vrot.slane %v309_v28, 2  ;;  %v3058_v36 = vld [vmem:[%s3230_s12 + $0x40] sm:$0xff]   ;;  %v3052_v39 = vld [vmem:[%s3807_s1 + $0xb0] sm:$0xff]   ;;  %v3054_v43 = vld [vmem:[%s3230_s12 + $0x8] sm:$0xff]  }
  0x14   : > { %v295_v29 = vor.u32 %v294_v22, %v291_v21  ;;  %v303_v30 = vor.u32 %v302_v24, %v299_v23  ;;  %v315_v41 = vshrl.u32 %v3058_v36, 16  ;;  %v318_v42 = vshll.u32 %v3058_v36, 16  ;;  %v3056_v44 = vld [vmem:[%s3807_s1 + $0xa8] sm:$0xff]   ;;  %v3057_v45 = vld [vmem:[%s3807_s1 + $0xf0] sm:$0xff]   ;;  %v3060_v51 = vld [vmem:[%s3807_s1 + $0xa0] sm:$0xff]  }
  0x15   : > { %2682 = vmatpush3.bf16.msra.mxu0 %v3036_v5  ;;  %v312_v40 = vor.u32 %v311_v35, %v308_v34  ;;  %v3064_v49 = vld [vmem:[%s3230_s12 + $0x48] sm:$0x3f]   ;;  %v3063_v55 = vld [vmem:[%s3807_s1 + $0xe0] sm:$0xff]   ;;  %v3059_v57 = vld [vmem:[%s3230_s12 + $0x10] sm:$0xff]  }
  0x16   : > { %2718 = vmatpush3.bf16.msra.mxu1 %v3037_v6  ;;  %2683 = vmatprep.subr.bf16.mxu0 %v3149_v1  ;;  %v304_v37 = vsel %vm287_vm1, %v295_v29, %v303_v30  ;;  %v317_v47 = vrot.slane %v315_v41, 1  ;;  %v320_v48 = vrot.slane %v318_v42, 2  ;;  %v3061_v50 = vld [vmem:[%s3807_s1 + $0xe8] sm:$0xff]   ;;  %v324_v53 = vshrl.u32 %v3064_v49, 16  ;;  %v3062_v58 = vld [vmem:[%s3807_s1 + $0x98] sm:$0xff]   ;;  %v3067_v63 = vld [vmem:[%s3807_s1 + $0x90] sm:$0xff]  }
  0x17   : > { %2719 = vmatprep.subr.bf16.mxu1 %v3149_v1  ;;  %v313_v46 = vsel %vm287_vm1, %v303_v30, %v312_v40  ;;  %v327_v54 = vshll.u32 %v3064_v49, 16  ;;  %v3066_v61 = vld [vmem:[%s3807_s1 + $0xd8] sm:$0xff]   ;;  %v3068_v0 = vld [vmem:[%s3807_s1 + $0xd0] sm:$0xff]   ;;  %v3074_v4 = vld [vmem:[%s3230_s12] sm:$0xff]  }
  0x18   : > { %v321_v52 = vor.u32 %v320_v48, %v317_v47  ;;  %v326_v59 = vrot.slane %v324_v53, 1  ;;  %v3065_v2 = vld [vmem:[%s3230_s12 + $0x18] sm:$0xff]   ;;  %v3069_v5 = vld [vmem:[%s3807_s1 + $0x88] sm:$0xff]   ;;  %v3070_v11 = vld [vmem:[%s3230_s12 + $0x20] ss:$0 sps:$4 sm:$0xff]  }
  0x19   : > { %2684 = vmatpush3.bf16.msra.mxu0 %v3038_v7  ;;  %v329_v60 = vrot.slane %v327_v54, 2  ;;  %v3071_v6 = vld [vmem:[%s3807_s1 + $0xc8] sm:$0xff]   ;;  %v3358_v15 = vld [vmem:[%s3230_s12 + $0x58] sm:$0xff]   ;;  %v3361_v16 = vld [vmem:[%s3230_s12 + $0x50] sm:$0xf8]  }
  0x1a   : > { %2720 = vmatpush3.bf16.msra.mxu1 %v3039_v8  ;;  %2685 = vmatprep.subr.bf16.mxu0 %v3149_v1  ;;  %v322_v56 = vsel %vm287_vm1, %v312_v40, %v321_v52  ;;  %v3075_v7 = vld [vmem:[%s3230_s12 + $0x8] sm:$0xff]   ;;  %v661_v8 = vshll.u32 %v3074_v4, 16  ;;  %v3080_v18 = vld [vmem:[%s3230_s12 + $0x10] sm:$0xff]   ;;  %v885_v21 = vrot.slane %v3358_v15, 3  ;;  %v3078_v22 = vld [vmem:[%s3807_s1 + $0x138] sm:$0xff]  }
  0x1b   : > { %2721 = vmatprep.subr.bf16.mxu1 %v3149_v1  ;;  %v330_v62 = vor.u32 %v329_v60, %v326_v59  ;;  %v666_v12 = vshll.u32 %v3075_v7, 16  ;;  %v670_v23 = vshrl.u32 %v3075_v7, 16  ;;  %v674_v24 = vshll.u32 %v3080_v18, 16  ;;  %v3378_v27 = vld [vmem:[%s3230_s12 + $0x60] sm:$0xff]   ;;  %v3082_v28 = vld [vmem:[%s3807_s1 + $0x178] sm:$0xff]   ;;  %v3079_v30 = vld [vmem:[%s3807_s1 + $0x130] sm:$0xff]  }
  0x1c   : > { %v3085_v29 = vld [vmem:[%s3230_s12 + $0x18] sm:$0xff]   ;;  %v3084_v34 = vld [vmem:[%s3807_s1 + $0x170] sm:$0xff]   ;;  %v3398_v36 = vld [vmem:[%s3230_s12 + $0x68] sm:$0xff]  }
  0x1d   : > { %2686 = vmatpush3.bf16.msra.mxu0 %v3040_v9  ;;  %v331_v3 = vsel %vm287_vm1, %v321_v52, %v330_v62  ;;  %v3072_v9 = vld [vmem:[%s3807_s1 + $0x80] sm:$0xff]   ;;  %v668_v17 = vrot.slane %v666_v12, 1  ;;  %v682_v35 = vshll.u32 %v3085_v29, 16  ;;  %v3088_v42 = vld [vmem:[%s3807_s1 + $0x168] sm:$0xff]   ;;  %v3423_v48 = vld [vmem:[%s3230_s12 + $0x70] sm:$0xf] }
  0x1e   : > { %2722 = vmatpush3.bf16.msra.mxu1 %v3041_v10  ;;  %2687 = vmatprep.subr.bf16.mxu0 %v3149_v1  ;;  %v3073_v10 = vld [vmem:[%s3807_s1 + $0xc0] sm:$0xff]   ;;  %v840_v49 = vld [vmem:[%s3230_s12 + $0x74] sm:$0x7]  ;;  %v686_v52 = vshrl.u32 %v3085_v29, 16  ;;  %v3103_v29 = vld [vmem:[%s3807_s1 + $0x1b8] sm:$0xff]  }
  0x1f   : > { %2723 = vmatprep.subr.bf16.mxu1 %v3149_v1  ;;  %v3087_v41 = vld [vmem:[%s3807_s1 + $0x120] sm:$0xff]   ;;  %v3095_v59 = vld [vmem:[%s3807_s1 + $0x110] sm:$0xff]  }
  0x20   : > { %v3091_v47 = vld [vmem:[%s3230_s12 + $0x20] sm:$0x1f]  }
  0x21   : > { %2688 = vmatpush3.bf16.msra.mxu0 %v3042_v13  ;;  %v659_v13 = vshrl.u32 %v3074_v4, 16  ;;  %v690_v53 = vshll.u32 %v3091_v47, 16  ;;  %v694_v4 = vshrl.u32 %v3091_v47, 16  ;;  %v3102_v7 = vld [vmem:[%s3230_s12 + $0x84] sm:$0xff]  }
  0x22   : > { %2724 = vmatpush3.bf16.msra.mxu1 %v3043_v14  ;;  %2689 = vmatprep.subr.bf16.mxu0 %v3149_v1  ;;  %v663_v14 = vrot.slane %v661_v8, 1  ;;  %v3100_v12 = vld [vmem:[%s3807_s1 + $0x140] sm:$0xff]   ;;  %v3107_v47 = vld [vmem:[%s3807_s1 + $0x1a8] sm:$0xff]  }
  0x23   : > { %2725 = vmatprep.subr.bf16.mxu1 %v3149_v1 }
  0x25   : > { %2690 = vmatpush3.bf16.msra.mxu0 %v3044_v19  ;;  %v664_v19 = vor.u32 %v663_v14, %v659_v13 }
  0x26   : > { %2726 = vmatpush3.bf16.msra.mxu1 %v3045_v20  ;;  %2691 = vmatprep.subr.bf16.mxu0 %v3149_v1  ;;  %v884_v20 = vrot.slane %v3361_v16, 3 }
  0x27   : > { %2727 = vmatprep.subr.bf16.mxu1 %v3149_v1  ;;  %v669_v25 = vsel %vm657_vm2, %v664_v19, %v668_v17 }
  0x29   : > { %2692 = vmatpush3.bf16.msra.mxu0 %v3046_v26  ;;  %v886_v26 = vsel %vm883_vm3, %v884_v20, %v885_v21 }
  0x2a   : > { %2728 = vmatpush3.bf16.msra.mxu1 %v3047_v31  ;;  %2749 = vmatprep.subr.bf16.mxu0 %v3149_v1  ;;  %v672_v31 = vor.u32 %v670_v23, %v668_v17  ;;  %v1087_v17 = vshll.u32 %v3102_v7, 16  ;;  %v3105_v23 = vld [vmem:[%s3230_s12 + $0x8c] sm:$0xff]  }
  0x2b   : > { %2785 = vmatprep.subr.bf16.mxu1 %v3149_v1 }
  0x2c   : > { %2694 = vmatmul.mubr.bf16.vlgmr.msra.gmra.mxu0 %v304_v37 }
  0x2d   : > { %2730 = vmatmul.mubr.bf16.vlgmr.msra.gmra.mxu1 %v3050_v32  ;;  %2750 = vmatpush3.bf16.msra.mxu0 %v3051_v33  ;;  %v676_v32 = vrot.slane %v674_v24, 1  ;;  %v887_v33 = vrot.slane %v3378_v27, 3 }
  0x2e   : > { %2751 = vmatprep.subr.bf16.mxu0 %v3149_v1  ;;  %2697 = vmatprep.mubr.msk.bf16.mxu0 %vm3150_vm0, %v3149_v1 }
  0x2f   : > { %2733 = vmatprep.mubr.msk.bf16.mxu1 %vm3150_vm0, %v3149_v1  ;;  %2786 = vmatpush3.bf16.msra.mxu1 %v3055_v38  ;;  %v677_v37 = vsel %vm657_vm2, %v672_v31, %v676_v32  ;;  %v3083_v38 = vld [vmem:[%s3807_s1 + $0x128] sm:$0xff]   ;;  %v888_v40 = vsel %vm883_vm3, %v885_v21, %v887_v33  ;;  %v1091_v31 = vshrl.u32 %v3102_v7, 16 }
  0x30   : > { %2787 = vmatprep.subr.bf16.mxu1 %v3149_v1 }
  0x31   : > { %2752 = vmatpush3.bf16.msra.mxu0 %v3052_v39  ;;  %v678_v39 = vshrl.u32 %v3080_v18, 16 }
  0x32   : > { %2753 = vmatprep.subr.bf16.mxu0 %v3149_v1 }
  0x33   : > { %2788 = vmatpush3.bf16.msra.mxu1 %v3057_v45  ;;  %v680_v45 = vor.u32 %v678_v39, %v676_v32  ;;  %v1095_v32 = vshll.u32 %v3105_v23, 16 }
  0x34   : > { %2698 = vmatmul.mubr.bf16.gmra.mxu0 %v313_v46  ;;  %2789 = vmatprep.subr.bf16.mxu1 %v3149_v1  ;;  %v3090_v46 = vld [vmem:[%s3807_s1 + $0x160] sm:$0xff]  }
  0x35   : > { %2734 = vmatmul.mubr.bf16.gmra.mxu1 %v3054_v43  ;;  %2754 = vmatpush3.bf16.msra.mxu0 %v3056_v44  ;;  %v684_v43 = vrot.slane %v682_v35, 1  ;;  %v889_v44 = vrot.slane %v3398_v36, 3  ;;  %v1097_v39 = vrot.slane %v1095_v32, 1 }
  0x36   : > { %2701 = vmatprep.mubr.msk.bf16.mxu0 %vm3150_vm0, %v3149_v1  ;;  %2737 = vmatprep.mubr.msk.bf16.mxu1 %vm3150_vm0, %v3149_v1 }
  0x37   : > { %2755 = vmatprep.subr.bf16.mxu0 %v3149_v1  ;;  %2790 = vmatpush3.bf16.msra.mxu1 %v3061_v50  ;;  %v3089_v50 = vld [vmem:[%s3807_s1 + $0x118] sm:$0xff]   ;;  %v890_v54 = vsel %vm883_vm3, %v887_v33, %v889_v44 }
  0x38   : > { %2791 = vmatprep.subr.bf16.mxu1 %v3149_v1 }
  0x39   : > { %2756 = vmatpush3.bf16.msra.mxu0 %v3060_v51  ;;  %v685_v51 = vsel %vm657_vm2, %v680_v45, %v684_v43  ;;  %v3108_v45 = vld [vmem:[%s3807_s1 + $0x1f0] sm:$0xff]  }
  0x3a   : > { %2757 = vmatprep.subr.bf16.mxu0 %v3149_v1 }
  0x3b   : > { %2792 = vmatpush3.bf16.msra.mxu1 %v3063_v55  ;;  %v2371_v55 = vcombine.low %v3423_v48, %v840_v49  ;;  %v1099_v49 = vshrl.u32 %v3105_v23, 16 }
  0x3c   : > { %2702 = vmatmul.mubr.bf16.gmra.mxu0 %v322_v56  ;;  %2793 = vmatprep.subr.bf16.mxu1 %v3149_v1  ;;  %v3094_v56 = vld [vmem:[%s3807_s1 + $0x158] sm:$0xff]  }
  0x3d   : > { %2738 = vmatmul.mubr.bf16.gmra.mxu1 %v3059_v57  ;;  %2758 = vmatpush3.bf16.msra.mxu0 %v3062_v58  ;;  %v688_v57 = vor.u32 %v686_v52, %v684_v43  ;;  %v692_v58 = vrot.slane %v690_v53, 1  ;;  %v891_v60 = vrot.slane %v2371_v55, 3  ;;  %v1304_v43 = vshll.u32 %v3398_v36, 16 }
  0x3e   : > { %2705 = vmatprep.mubr.msk.bf16.mxu0 %vm3150_vm0, %v3149_v1  ;;  %2741 = vmatprep.mubr.msk.bf16.mxu1 %vm3150_vm0, %v3149_v1  ;;  %v1101_v55 = vor.u32 %v1099_v49, %v1097_v39 }
  0x3f   : > { %2759 = vmatprep.subr.bf16.mxu0 %v3149_v1  ;;  %2794 = vmatpush3.bf16.msra.mxu1 %v3066_v61  ;;  %v3096_v61 = vld [vmem:[%s3807_s1 + $0x150] sm:$0xff]   ;;  %v696_v13 = vor.u32 %v694_v4, %v692_v58  ;;  %v1306_v53 = vrot.slane %v1304_v43, 4 }
  0x40   : > { %2795 = vmatprep.subr.bf16.mxu1 %v3149_v1 }
  0x41   : > { %2760 = vmatpush3.bf16.msra.mxu0 %v3067_v63  ;;  %v693_v63 = vsel %vm657_vm2, %v688_v57, %v692_v58  ;;  %v3527_v57 = vld [vmem:[%s3230_s12 + $0x9c] sm:$0x1f]  }
  0x42   : > { %2761 = vmatprep.subr.bf16.mxu0 %v3149_v1  ;;  %v1111_v4 = vshll.u32 %v3527_v57, 16  ;;  %v1115_v23 = vshrl.u32 %v3527_v57, 16  ;;  %v3130_v57 = vld [vmem:[%s3807_s1 + $0x228] sm:$0xff]  }
  0x43   : > { %2796 = vmatpush3.bf16.msra.mxu1 %v3068_v0  ;;  %v3101_v0 = vld [vmem:[%s3230_s12 + $0x7c] sm:$0xff]  }
  0x44   : > { %2706 = vmatmul.mubr.bf16.gmra.mxu0 %v331_v3  ;;  %2797 = vmatprep.subr.bf16.mxu1 %v3149_v1  ;;  %v3098_v3 = vld [vmem:[%s3807_s1 + $0x148] sm:$0xff]   ;;  %v1082_v8 = vshll.u32 %v3101_v0, 16  ;;  %v1080_v14 = vshrl.u32 %v3101_v0, 16 }
  0x45   : > { %2742 = vmatmul.mubr.bf16.gmra.mxu1 %v3065_v2  ;;  %2709 = vmatprep.mubr.msk.bf16.mxu0 %vm3150_vm0, %v3149_v1  ;;  %v892_v2 = vsel %vm883_vm3, %v889_v44, %v891_v60  ;;  %v1252_v44 = vld [vmem:[%s3230_s12 + $0x74] sm:$0xf] }
  0x46   : > { %2745 = vmatprep.mubr.msk.bf16.mxu1 %vm3150_vm0, %v3149_v1  ;;  %2762 = vmatpush3.bf16.msra.mxu0 %v3069_v5  ;;  %v1275_v5 = vshrl.u32 %v3361_v16, 16 }
  0x47   : > { %2798 = vmatpush3.bf16.msra.mxu1 %v3071_v6  ;;  %2763 = vmatprep.subr.bf16.mxu0 %v3149_v1  ;;  %v3099_v6 = vld [vmem:[%s3807_s1 + $0x100] sm:$0xff]  }
  0x48   : > { %2799 = vmatprep.subr.bf16.mxu1 %v3149_v1  ;;  %v1277_v18 = vrot.slane %v1275_v5, 3 }
  0x4a   : > { %2764 = vmatpush3.bf16.msra.mxu0 %v3072_v9  ;;  %v1278_v9 = vshll.u32 %v3361_v16, 16  ;;  %v1084_v16 = vrot.slane %v1082_v8, 1  ;;  %v3115_v8 = vld [vmem:[%s3807_s1 + $0x1d8] sm:$0xff]  }
  0x4b   : > { %2800 = vmatpush3.bf16.msra.mxu1 %v3073_v10  ;;  %2821 = vmatprep.subr.bf16.mxu0 %v3149_v1  ;;  %v1283_v10 = vshrl.u32 %v3358_v15, 16 }
  0x4c   : > { %2710 = vmatmul.mubr.bf16.gmra.mxu0 %v330_v62  ;;  %2857 = vmatprep.subr.bf16.mxu1 %v3149_v1  ;;  %v3097_v62 = vld [vmem:[%s3807_s1 + $0x108] sm:$0xff]   ;;  %v1280_v19 = vrot.slane %v1278_v9, 4 }
  0x4d   : > { %2746 = vmatmul.mubr.bf16.gmra.mxu1 %v3070_v11  ;;  %2765 = vmatprep.mubr.msk.bf16.mxu0 %vm3150_vm0, %v3149_v1  ;;  %v1286_v11 = vshll.u32 %v3358_v15, 16  ;;  %v1285_v20 = vrot.slane %v1283_v10, 3  ;;  %v1085_v15 = vor.u32 %v1084_v16, %v1080_v14  ;;  %v1113_v10 = vrot.slane %v1111_v4, 1  ;;  %v1452_v14 = vld [vmem:[%s3230_s12 + $0x4] sm:$0xf] }
  0x4e   : > { %2801 = vmatprep.mubr.msk.bf16.mxu1 %vm3150_vm0, %v3149_v1  ;;  %v1281_v24 = vor.u32 %v1280_v19, %v1277_v18  ;;  %v3564_v16 = vld [vmem:[%s3230_s12 + $0x8] sm:$0xf]  ;;  %v3117_v18 = vld [vmem:[%s3807_s1 + $0x1d0] sm:$0xff]  }
  0x4f   : > { %v1288_v21 = vrot.slane %v1286_v11, 4  ;;  %v3116_v11 = vld [vmem:[%s3807_s1 + $0x190] sm:$0xff]  }
  0x54   : > { %2766 = vmatmul.mubr.bf16.vlgmr.msra.gmra.mxu0 %v669_v25  ;;  %v1289_v25 = vor.u32 %v1288_v21, %v1285_v20  ;;  %v2450_v20 = vcombine.low %v1452_v14, %v3564_v16 }
  0x55   : > { %2802 = vmatmul.mubr.bf16.vlgmr.msra.gmra.mxu1 %v886_v26  ;;  %2822 = vmatpush3.bf16.msra.mxu0 %v3078_v22  ;;  %v1089_v22 = vrot.slane %v1087_v17, 1  ;;  %v1292_v26 = vshrl.u32 %v3378_v27, 16  ;;  %v2039_v17 = vld [vmem:[%s3808_s2 + $0x8] sm:$0xff] }
  0x56   : > { %2823 = vmatprep.subr.bf16.mxu0 %v3149_v1  ;;  %2769 = vmatprep.mubr.msk.bf16.mxu0 %vm3150_vm0, %v3149_v1  ;;  %v1290_v33 = vsel %vm1273_vm4, %v1281_v24, %v1289_v25  ;;  %v3589_v24 = vld [vmem:[%s3230_s12 + $0xc] sm:$0xff]   ;;  %v1505_v32 = vshrl.u32 %v2450_v20, 16 }
  0x57   : > { %2805 = vmatprep.mubr.msk.bf16.mxu1 %vm3150_vm0, %v3149_v1  ;;  %2858 = vmatpush3.bf16.msra.mxu1 %v3082_v28  ;;  %v1295_v28 = vshll.u32 %v3378_v27, 16  ;;  %v3104_v27 = vld [vmem:[%s3807_s1 + $0x1b0] sm:$0xff]   ;;  %v1516_v49 = vshrl.u32 %v3589_v24, 16 }
  0x58   : > { %2859 = vmatprep.subr.bf16.mxu1 %v3149_v1 }
  0x59   : > { %2824 = vmatpush3.bf16.msra.mxu0 %v3079_v30  ;;  %v1090_v30 = vsel %vm657_vm2, %v1085_v15, %v1089_v22  ;;  %v1297_v35 = vrot.slane %v1295_v28, 4  ;;  %v3118_v15 = vld [vmem:[%s3807_s1 + $0x188] sm:$0xff]   ;;  %v3120_v28 = vld [vmem:[%s3807_s1 + $0x180] sm:$0xff]  }
  0x5a   : > { %2825 = vmatprep.subr.bf16.mxu0 %v3149_v1 }
  0x5b   : > { %2860 = vmatpush3.bf16.msra.mxu1 %v3084_v34  ;;  %v1294_v34 = vrot.slane %v1292_v26, 3  ;;  %v2041_v26 = vld [vmem:[%s3808_s2 + $0x18] sm:$0xff] }
  0x5c   : > { %2770 = vmatmul.mubr.bf16.gmra.mxu0 %v677_v37  ;;  %2861 = vmatprep.subr.bf16.mxu1 %v3149_v1  ;;  %v3106_v37 = vld [vmem:[%s3807_s1 + $0x1f8] sm:$0xff]  }
  0x5d   : > { %2806 = vmatmul.mubr.bf16.gmra.mxu1 %v888_v40  ;;  %2826 = vmatpush3.bf16.msra.mxu0 %v3083_v38  ;;  %v1093_v38 = vor.u32 %v1091_v31, %v1089_v22  ;;  %v3109_v40 = vld [vmem:[%s3230_s12 + $0x94] sm:$0xff]   ;;  %v3119_v22 = vld [vmem:[%s3807_s1 + $0x1c8] sm:$0xff]   ;;  %v1117_v31 = vor.u32 %v1115_v23, %v1113_v10 }
  0x5e   : > { %2773 = vmatprep.mubr.msk.bf16.mxu0 %vm3150_vm0, %v3149_v1  ;;  %2809 = vmatprep.mubr.msk.bf16.mxu1 %vm3150_vm0, %v3149_v1 }
  0x5f   : > { %2827 = vmatprep.subr.bf16.mxu0 %v3149_v1  ;;  %2862 = vmatpush3.bf16.msra.mxu1 %v3088_v42  ;;  %v1301_v42 = vshrl.u32 %v3398_v36, 16  ;;  %v1103_v36 = vshll.u32 %v3109_v40, 16 }
  0x60   : > { %2863 = vmatprep.subr.bf16.mxu1 %v3149_v1 }
  0x61   : > { %2828 = vmatpush3.bf16.msra.mxu0 %v3087_v41  ;;  %v1298_v41 = vor.u32 %v1297_v35, %v1294_v34  ;;  %v1303_v52 = vrot.slane %v1301_v42, 3  ;;  %v1512_v34 = vshll.u32 %v3589_v24, 16  ;;  %v3124_v35 = vld [vmem:[%s3230_s12 + $0x2c] sm:$0xfc]  }
  0x62   : > { %2829 = vmatprep.subr.bf16.mxu0 %v3149_v1  ;;  %v1730_v42 = vrot.slane %v3124_v35, 2 }
  0x63   : > { %2864 = vmatpush3.bf16.msra.mxu1 %v3090_v46  ;;  %v1098_v46 = vsel %vm657_vm2, %v1093_v38, %v1097_v39  ;;  %v1307_v58 = vor.u32 %v1306_v53, %v1303_v52  ;;  %v2044_v38 = vld [vmem:[%s3808_s2 + $0x30] sm:$0xff] }
  0x64   : > { %2774 = vmatmul.mubr.bf16.gmra.mxu0 %v685_v51  ;;  %2865 = vmatprep.subr.bf16.mxu1 %v3149_v1  ;;  %v1299_v51 = vsel %vm1273_vm4, %v1289_v25, %v1298_v41  ;;  %v1507_v25 = vshll.u32 %v2450_v20, 16  ;;  %v3127_v52 = vld [vmem:[%s3807_s1 + $0x230] sm:$0xff]   ;;  %v3139_v20 = vld [vmem:[%s3807_s1 + $0x200] sm:$0xff]  }
  0x65   : > { %2810 = vmatmul.mubr.bf16.gmra.mxu1 %v890_v54  ;;  %2830 = vmatpush3.bf16.msra.mxu0 %v3089_v50  ;;  %v2425_v50 = vcombine.low %v3423_v48, %v1252_v44  ;;  %v3111_v54 = vld [vmem:[%s3807_s1 + $0x1e8] sm:$0xff]   ;;  %v3110_v48 = vld [vmem:[%s3807_s1 + $0x1a0] sm:$0xff]   ;;  %v1308_v5 = vsel %vm1273_vm4, %v1298_v41, %v1307_v58  ;;  %v3621_v41 = vld [vmem:[%s3230_s12 + $0x14] sm:$0xff]  }
  0x66   : > { %2777 = vmatprep.mubr.msk.bf16.mxu0 %vm3150_vm0, %v3149_v1  ;;  %2813 = vmatprep.mubr.msk.bf16.mxu1 %vm3150_vm0, %v3149_v1  ;;  %v2045_v44 = vld [vmem:[%s3808_s2 + $0x38] sm:$0xff] }
  0x67   : > { %2831 = vmatprep.subr.bf16.mxu0 %v3149_v1  ;;  %2866 = vmatpush3.bf16.msra.mxu1 %v3094_v56  ;;  %v1105_v56 = vrot.slane %v1103_v36, 1  ;;  %v1520_v36 = vshll.u32 %v3621_v41, 16 }
  0x68   : > { %2867 = vmatprep.subr.bf16.mxu1 %v3149_v1 }
  0x69   : > { %2832 = vmatpush3.bf16.msra.mxu0 %v3095_v59  ;;  %v1310_v59 = vshrl.u32 %v2425_v50, 16  ;;  %v1106_v0 = vsel %vm657_vm2, %v1101_v55, %v1105_v56  ;;  %v3643_v55 = vld [vmem:[%s3230_s12 + $0x1c] sm:$0xff]  }
  0x6a   : > { %2833 = vmatprep.subr.bf16.mxu0 %v3149_v1 }
  0x6b   : > { %2868 = vmatpush3.bf16.msra.mxu1 %v3096_v61  ;;  %v3113_v61 = vld [vmem:[%s3807_s1 + $0x1e0] sm:$0xff]  }
  0x6c   : > { %2778 = vmatmul.mubr.bf16.gmra.mxu0 %v693_v63  ;;  %2869 = vmatprep.subr.bf16.mxu1 %v3149_v1  ;;  %v3151_v63 = vmov 0  }
  0x6d   : > { %2814 = vmatmul.mubr.bf16.gmra.mxu1 %v892_v2  ;;  %2781 = vmatprep.mubr.msk.bf16.mxu0 %vm3150_vm0, %v3149_v1  ;;  %v3112_v2 = vld [vmem:[%s3807_s1 + $0x198] sm:$0xff]  }
  0x6e   : > { %2817 = vmatprep.mubr.msk.bf16.mxu1 %vm3150_vm0, %v3149_v1  ;;  %2834 = vmatpush3.bf16.msra.mxu0 %v3097_v62  ;;  %v2038_v62 = vld [vmem:[%s3808_s2] sm:$0xff] }
  0x6f   : > { %2870 = vmatpush3.bf16.msra.mxu1 %v3098_v3  ;;  %2835 = vmatprep.subr.bf16.mxu0 %v3149_v1  ;;  %v1107_v3 = vshrl.u32 %v3109_v40, 16  ;;  %v1514_v40 = vrot.slane %v1512_v34, 1 }
  0x70   : > { %2871 = vmatprep.subr.bf16.mxu1 %v3149_v1  ;;  %3030 = vset.pattern.permute.xlu0 %v3151_v63 }
  0x71   : > { %2049 = vperm.xlu0 %3030, %v2038_v62   ;;  %3031 = vset.pattern.permute.xlu1 %v3151_v63  ;;  %v1109_v9 = vor.u32 %v1107_v3, %v1105_v56  ;;  %v1518_v53 = vor.u32 %v1516_v49, %v1514_v40 }
  0x72   : > { %2836 = vmatpush3.bf16.msra.mxu0 %v3099_v6  ;;  %v1312_v6 = vrot.slane %v1310_v59, 3  ;;  %v1528_v59 = vshll.u32 %v3643_v55, 16 }
  0x73   : > { %2872 = vmatpush3.bf16.msra.mxu1 %v3100_v12  ;;  %2893 = vmatprep.subr.bf16.mxu0 %v3149_v1  ;;  %v2040_v12 = vld [vmem:[%s3808_s2 + $0x10] sm:$0xff]  ;;  %v1114_v19 = vsel %vm657_vm2, %v1109_v9, %v1113_v10 }
  0x74   : > { %2782 = vmatmul.mubr.bf16.gmra.mxu0 %v696_v13  ;;  %2929 = vmatprep.subr.bf16.mxu1 %v3149_v1  ;;  %v1530_v63 = vrot.slane %v1528_v59, 1  ;;  %v3136_v9 = vld [vmem:[%s3230_s12 + $0x4c] sm:$0x3f]  }
  0x75   : > { %2818 = vmatmul.mubr.bf16.gmra.mxu1 %v891_v60  ;;  %2837 = vmatprep.mubr.msk.bf16.mxu0 %vm3150_vm0, %v3149_v1  ;;  %v1313_v60 = vshll.u32 %v2425_v50, 16 }
  0x76   : > { %2873 = vmatprep.mubr.msk.bf16.mxu1 %vm3150_vm0, %v3149_v1  ;;  %2059 = vperm.xlu1 %3031, %v2040_v12   ;;  %v3137_v12 = vld [vmem:[%s3807_s1 + $0x210] sm:$0xff]  }
  0x77   : > { %v1315_v7 = vrot.slane %v1313_v60, 4  ;;  %2054 = vperm.xlu0 %3030, %v2039_v17  }
  0x79   : > { %v1316_v13 = vor.u32 %v1315_v7, %v1312_v6  ;;  %v1532_v6 = vshrl.u32 %v3643_v55, 16 }
  0x7a   : > { %2064 = vperm.xlu1 %3031, %v2041_v26   ;;  %v1900_v26 = vrot.slane %v3643_v55, 1 }
  0x7b   : > { %v1317_v21 = vsel %vm1273_vm4, %v1307_v58, %v1316_v13  ;;  %v1524_v58 = vshrl.u32 %v3621_v41, 16  ;;  %v1534_v10 = vor.u32 %v1532_v6, %v1530_v63 }
  0x7c   : > { %2838 = vmatmul.mubr.bf16.vlgmr.msra.gmra.mxu0 %v1090_v30  ;;  %v3121_v30 = vld [vmem:[%s3807_s1 + $0x1c0] sm:$0xff]  }
  0x7d   : > { %2874 = vmatmul.mubr.bf16.vlgmr.msra.gmra.mxu1 %v1290_v33  ;;  %2894 = vmatpush3.bf16.msra.mxu0 %v3103_v29  ;;  %v2042_v29 = vld [vmem:[%s3808_s2 + $0x20] sm:$0xff]  ;;  %v1509_v33 = vrot.slane %v1507_v25, 1  ;;  %v1896_v25 = vrot.slane %v3589_v24, 1 }
  0x7e   : > { %2895 = vmatprep.subr.bf16.mxu0 %v3149_v1  ;;  %2841 = vmatprep.mubr.msk.bf16.mxu0 %vm3150_vm0, %v3149_v1 }
  0x7f   : > { %2877 = vmatprep.mubr.msk.bf16.mxu1 %vm3150_vm0, %v3149_v1  ;;  %2930 = vmatpush3.bf16.msra.mxu1 %v3106_v37  ;;  %v3125_v37 = vld [vmem:[%s3230_s12 + $0x34] sm:$0xff]   ;;  %v1510_v39 = vor.u32 %v1509_v33, %v1505_v32 }
  0x80   : > { %2931 = vmatprep.subr.bf16.mxu1 %v3149_v1  ;;  %2069 = vperm.xlu0 %3030, %v2042_v29   ;;  %v1731_v43 = vrot.slane %v3125_v37, 2 }
  0x81   : > { %2896 = vmatpush3.bf16.msra.mxu0 %v3104_v27  ;;  %v2043_v27 = vld [vmem:[%s3808_s2 + $0x28] sm:$0xff] }
  0x82   : > { %2897 = vmatprep.subr.bf16.mxu0 %v3149_v1  ;;  %2074 = vperm.xlu1 %3031, %v2043_v27   ;;  %v1732_v50 = vsel %vm1729_vm5, %v1730_v42, %v1731_v43 }
  0x83   : > { %2932 = vmatpush3.bf16.msra.mxu1 %v3108_v45  ;;  %v2046_v45 = vld [vmem:[%s3808_s2 + $0x40] sm:$0xff] }
  0x84   : > { %2842 = vmatmul.mubr.bf16.gmra.mxu0 %v1098_v46  ;;  %2933 = vmatprep.subr.bf16.mxu1 %v3149_v1  ;;  %v1515_v46 = vsel %vm657_vm2, %v1510_v39, %v1514_v40 }
  0x85   : > { %2878 = vmatmul.mubr.bf16.gmra.mxu1 %v1299_v51  ;;  %2898 = vmatpush3.bf16.msra.mxu0 %v3107_v47  ;;  %v3126_v47 = vld [vmem:[%s3807_s1 + $0x238] sm:$0xff]  }
  0x86   : > { %2845 = vmatprep.mubr.msk.bf16.mxu0 %vm3150_vm0, %v3149_v1  ;;  %2881 = vmatprep.mubr.msk.bf16.mxu1 %vm3150_vm0, %v3149_v1  ;;  %v3129_v51 = vld [vmem:[%s3230_s12 + $0x3c] sm:$0xff]  }
  0x87   : > { %2899 = vmatprep.subr.bf16.mxu0 %v3149_v1  ;;  %2934 = vmatpush3.bf16.msra.mxu1 %v3111_v54  ;;  %v1522_v54 = vrot.slane %v1520_v36, 1  ;;  %v1733_v56 = vrot.slane %v3129_v51, 2 }
  0x88   : > { %2935 = vmatprep.subr.bf16.mxu1 %v3149_v1  ;;  %2079 = vperm.xlu0 %3030, %v2044_v38  }
  0x89   : > { %2900 = vmatpush3.bf16.msra.mxu0 %v3110_v48  ;;  %2084 = vperm.xlu1 %3031, %v2045_v44   ;;  %v1523_v48 = vsel %vm657_vm2, %v1518_v53, %v1522_v54  ;;  %v1734_v60 = vsel %vm1729_vm5, %v1731_v43, %v1733_v56  ;;  %v1526_v62 = vor.u32 %v1524_v58, %v1522_v54 }
  0x8a   : > { %2901 = vmatprep.subr.bf16.mxu0 %v3149_v1 }
  0x8b   : > { %2936 = vmatpush3.bf16.msra.mxu1 %v3113_v61  ;;  %v3132_v61 = vld [vmem:[%s3230_s12 + $0x44] sm:$0xff]   ;;  %v1531_v4 = vsel %vm657_vm2, %v1526_v62, %v1530_v63 }
  0x8c   : > { %2846 = vmatmul.mubr.bf16.gmra.mxu0 %v1106_v0  ;;  %2937 = vmatprep.subr.bf16.mxu1 %v3149_v1  ;;  %v3133_v0 = vld [vmem:[%s3807_s1 + $0x220] sm:$0xff]   ;;  %v1735_v3 = vrot.slane %v3132_v61, 2 }
  0x8d   : > { %2882 = vmatmul.mubr.bf16.gmra.mxu1 %v1308_v5  ;;  %2902 = vmatpush3.bf16.msra.mxu0 %v3112_v2  ;;  %v3665_v2 = vld [vmem:[%s3230_s12 + $0x24] sm:$0x1f]   ;;  %v3134_v5 = vld [vmem:[%s3807_s1 + $0x218] sm:$0xff]  }
  0x8e   : > { %2849 = vmatprep.mubr.msk.bf16.mxu0 %vm3150_vm0, %v3149_v1  ;;  %2885 = vmatprep.mubr.msk.bf16.mxu1 %vm3150_vm0, %v3149_v1  ;;  %v1536_v7 = vshll.u32 %v3665_v2, 16 }
  0x8f   : > { %2903 = vmatprep.subr.bf16.mxu0 %v3149_v1  ;;  %2938 = vmatpush3.bf16.msra.mxu1 %v3115_v8  ;;  %v1736_v8 = vsel %vm1729_vm5, %v1733_v56, %v1735_v3 }
  0x90   : > { %2939 = vmatprep.subr.bf16.mxu1 %v3149_v1  ;;  %2089 = vperm.xlu0 %3030, %v2046_v45  }
  0x91   : > { %2904 = vmatpush3.bf16.msra.mxu0 %v3116_v11  ;;  %v1538_v11 = vrot.slane %v1536_v7, 1 }
  0x92   : > { %2905 = vmatprep.subr.bf16.mxu0 %v3149_v1 }
  0x93   : > { %2940 = vmatpush3.bf16.msra.mxu1 %v3117_v18  ;;  %v1539_v14 = vsel %vm657_vm2, %v1534_v10, %v1538_v11  ;;  %v3138_v18 = vld [vmem:[%s3807_s1 + $0x208] sm:$0xff]  }
  0x94   : > { %2850 = vmatmul.mubr.bf16.gmra.mxu0 %v1114_v19  ;;  %2941 = vmatprep.subr.bf16.mxu1 %v3149_v1  ;;  %v1540_v19 = vshrl.u32 %v3665_v2, 16 }
  0x95   : > { %2886 = vmatmul.mubr.bf16.gmra.mxu1 %v1317_v21  ;;  %2853 = vmatprep.mubr.msk.bf16.mxu0 %vm3150_vm0, %v3149_v1  ;;  %v1873_v21 = vld [vmem:[%s3230_s12 + $0x4] sm:$0xe]  ;;  %s3018_s12 = smul.u32 36, %s3812_s16 }
  0x96   : > { %2889 = vmatprep.mubr.msk.bf16.mxu1 %vm3150_vm0, %v3149_v1  ;;  %2906 = vmatpush3.bf16.msra.mxu0 %v3118_v15  ;;  %v1542_v15 = vor.u32 %v1540_v19, %v1538_v11 }
  0x97   : > { %2942 = vmatpush3.bf16.msra.mxu1 %v3119_v22  ;;  %2907 = vmatprep.subr.bf16.mxu0 %v3149_v1  ;;  %v2508_v22 = vcombine.low %v1873_v21, %v3564_v16  ;;  %s3781_s23 = scalar_lea.vmem %s3809_s3, %s3018_s12 }
  0x98   : > { %2943 = vmatprep.subr.bf16.mxu1 %v3149_v1 }
  0x99   : > { %v1895_v23 = vrot.slane %v2508_v22, 1 }
  0x9a   : > { %2908 = vmatpush3.bf16.msra.mxu0 %v3120_v28  ;;  %v1902_v28 = vrot.slane %v3665_v2, 1 }
  0x9b   : > { %2944 = vmatpush3.bf16.msra.mxu1 %v3121_v30  ;;  %2965 = vmatprep.subr.bf16.mxu0 %v3149_v1  ;;  %v1897_v29 = vsel %vm1894_vm6, %v1895_v23, %v1896_v25  ;;  %v1898_v30 = vrot.slane %v3621_v41, 1 }
  0x9c   : > { %2854 = vmatmul.mubr.bf16.gmra.mxu0 %v1117_v31  ;;  %3001 = vmatprep.subr.bf16.mxu1 %v3149_v1  ;;  %v1903_v16 = vsel %vm1894_vm6, %v1900_v26, %v1902_v28 }
  0x9d   : > { %2890 = vmatmul.mubr.bf16.gmra.mxu1 %v1316_v13  ;;  %2909 = vmatprep.mubr.msk.bf16.mxu0 %vm3150_vm0, %v3149_v1  ;;  %v1737_v13 = vrot.slane %v3136_v9, 2  ;;  %v1899_v24 = vsel %vm1894_vm6, %v1896_v25, %v1898_v30  ;;  %v1901_v31 = vsel %vm1894_vm6, %v1898_v30, %v1900_v26 }
  0x9e   : > { %2945 = vmatprep.mubr.msk.bf16.mxu1 %vm3150_vm0, %v3149_v1 }
  0x9f   : > { %v1738_v17 = vsel %vm1729_vm5, %v1735_v3, %v1737_v13 }
  0xa4   : > { %2910 = vmatmul.mubr.bf16.vlgmr.msra.gmra.mxu0 %v1515_v46 }
  0xa5   : > { %2946 = vmatmul.mubr.bf16.vlgmr.msra.gmra.mxu1 %v1732_v50  ;;  %2966 = vmatpush3.bf16.msra.mxu0 %v3126_v47 }
  0xa6   : > { %2967 = vmatprep.subr.bf16.mxu0 %v3149_v1  ;;  %2913 = vmatprep.mubr.msk.bf16.mxu0 %vm3150_vm0, %v3149_v1 }
  0xa7   : > { %2949 = vmatprep.mubr.msk.bf16.mxu1 %vm3150_vm0, %v3149_v1  ;;  %3009 = vmatpush3.bf16.msra.mxu1 %v3126_v47 }
  0xa8   : > { %3002 = vmatprep.subr.bf16.mxu1 %v3149_v1 }
  0xa9   : > { %2968 = vmatpush3.bf16.msra.mxu0 %v3127_v52 }
  0xaa   : > { %2969 = vmatprep.subr.bf16.mxu0 %v3149_v1 }
  0xab   : > { %3010 = vmatpush3.bf16.msra.mxu1 %v3127_v52 }
  0xac   : > { %2914 = vmatmul.mubr.bf16.gmra.mxu0 %v1523_v48  ;;  %3003 = vmatprep.subr.bf16.mxu1 %v3149_v1 }
  0xad   : > { %2950 = vmatmul.mubr.bf16.gmra.mxu1 %v1734_v60  ;;  %2970 = vmatpush3.bf16.msra.mxu0 %v3130_v57 }
  0xae   : > { %2917 = vmatprep.mubr.msk.bf16.mxu0 %vm3150_vm0, %v3149_v1  ;;  %2953 = vmatprep.mubr.msk.bf16.mxu1 %vm3150_vm0, %v3149_v1 }
  0xaf   : > { %2971 = vmatprep.subr.bf16.mxu0 %v3149_v1  ;;  %3011 = vmatpush3.bf16.msra.mxu1 %v3130_v57 }
  0xb0   : > { %3004 = vmatprep.subr.bf16.mxu1 %v3149_v1 }
  0xb1   : > { %2972 = vmatpush3.bf16.msra.mxu0 %v3133_v0 }
  0xb2   : > { %2973 = vmatprep.subr.bf16.mxu0 %v3149_v1 }
  0xb3   : > { %3012 = vmatpush3.bf16.msra.mxu1 %v3133_v0 }
  0xb4   : > { %2918 = vmatmul.mubr.bf16.gmra.mxu0 %v1531_v4  ;;  %3005 = vmatprep.subr.bf16.mxu1 %v3149_v1 }
  0xb5   : > { %2954 = vmatmul.mubr.bf16.gmra.mxu1 %v1736_v8  ;;  %2974 = vmatpush3.bf16.msra.mxu0 %v3134_v5 }
  0xb6   : > { %2921 = vmatprep.mubr.msk.bf16.mxu0 %vm3150_vm0, %v3149_v1  ;;  %2957 = vmatprep.mubr.msk.bf16.mxu1 %vm3150_vm0, %v3149_v1 }
  0xb7   : > { %3013 = vmatpush3.bf16.msra.mxu1 %v3134_v5  ;;  %2975 = vmatprep.subr.bf16.mxu0 %v3149_v1 }
  0xb8   : > { %3006 = vmatprep.subr.bf16.mxu1 %v3149_v1 }
  0xb9   : > { %2976 = vmatpush3.bf16.msra.mxu0 %v3137_v12 }
  0xba   : > { %2977 = vmatprep.subr.bf16.mxu0 %v3149_v1 }
  0xbb   : > { %3014 = vmatpush3.bf16.msra.mxu1 %v3137_v12 }
  0xbc   : > { %2922 = vmatmul.mubr.bf16.gmra.mxu0 %v1539_v14  ;;  %3007 = vmatprep.subr.bf16.mxu1 %v3149_v1 }
  0xbd   : > { %2958 = vmatmul.mubr.bf16.gmra.mxu1 %v1738_v17  ;;  %2925 = vmatprep.mubr.msk.bf16.mxu0 %vm3150_vm0, %v3149_v1 }
  0xbe   : > { %2961 = vmatprep.mubr.msk.bf16.mxu1 %vm3150_vm0, %v3149_v1  ;;  %2978 = vmatpush3.bf16.msra.mxu0 %v3138_v18 }
  0xbf   : > { %3015 = vmatpush3.bf16.msra.mxu1 %v3138_v18  ;;  %2979 = vmatprep.subr.bf16.mxu0 %v3149_v1 }
  0xc0   : > { %3008 = vmatprep.subr.bf16.mxu1 %v3149_v1 }
  0xc2   : > { %2980 = vmatpush3.bf16.msra.mxu0 %v3139_v20 }
  0xc3   : > { %3016 = vmatpush3.bf16.msra.mxu1 %v3139_v20 }
  0xc4   : > { %2926 = vmatmul.mubr.bf16.gmra.mxu0 %v1542_v15 }
  0xc5   : > { %2962 = vmatmul.mubr.bf16.gmra.mxu1 %v1737_v13  ;;  %2981 = vmatprep.mubr.msk.bf16.mxu0 %vm3150_vm0, %v3149_v1 }
  0xc6   : > { %2993 = vmatprep.mubr.msk.bf16.mxu1 %vm3150_vm0, %v3149_v1 }
  0xcc   : > { %2982 = vmatmul.mubr.bf16.vlgmr.msra.gmra.mxu0 %v1897_v29 }
  0xcd   : > { %2994 = vmatmul.mubr.bf16.vlgmr.msra.gmra.mxu1 %v1903_v16  ;;  %2985 = vmatprep.mubr.msk.bf16.mxu0 %vm3150_vm0, %v3149_v1 }
  0xce   : > { %2997 = vmatprep.mubr.msk.bf16.mxu1 %vm3150_vm0, %v3149_v1 }
  0xd4   : > { %2986 = vmatmul.mubr.bf16.gmra.mxu0 %v1899_v24 }
  0xd5   : > { %2998 = vmatmul.mubr.bf16.gmra.mxu1 %v1902_v28  ;;  %2989 = vmatprep.mubr.msk.bf16.mxu0 %vm3150_vm0, %v3149_v1 }
  0xdc   : > { %2990 = vmatmul.mubr.bf16.gmra.mxu0 %v1901_v31 }
  0xec   : > { %v419_v32 = vpop.f32.mrf.mxu0 }
  0xed   : > { %v567_v33 = vpop.f32.mrf.mxu1 }
  0xee   : > { %v568_v34 = vadd.f32 %v567_v33, %v419_v32  ;;  %v2695_v35 = vpop.f32.mrf.mxu0 }
  0xef   : > { %v2731_v37 = vpop.f32.mrf.mxu1 }
  0xf0   : > { %v422_v27 = vpop.f32.mrf.mxu0 }
  0xf1   : > { %v570_v38 = vpop.f32.mrf.mxu1 }
  0xf2   : > { %v571_v39 = vadd.f32 %v570_v38, %v422_v27  ;;  %v2696_v40 = vpop.f32.mrf.mxu0 }
  0xf3   : > { %v2732_v41 = vpop.f32.mrf.mxu1 }
  0xf4   : > { %v427_v42 = vpop.f32.mrf.mxu0 }
  0xf5   : > { %v575_v43 = vpop.f32.mrf.mxu1 }
  0xf6   : > { %v576_v44 = vadd.f32 %v575_v43, %v427_v42  ;;  %v2699_v45 = vpop.f32.mrf.mxu0 }
  0xf7   : > { %v2735_v46 = vpop.f32.mrf.mxu1 }
  0xf8   : > { %v430_v47 = vpop.f32.mrf.mxu0 }
  0xf9   : > { %v578_v49 = vpop.f32.mrf.mxu1 }
  0xfa   : > { %v579_v1 = vadd.f32 %v578_v49, %v430_v47  ;;  %v2700_v36 = vpop.f32.mrf.mxu0 }
  0xfb   : > { %v2736_v50 = vpop.f32.mrf.mxu1 }
  0xfc   : > { %v435_v51 = vpop.f32.mrf.mxu0 }
  0xfd   : > { %v583_v52 = vpop.f32.mrf.mxu1 }
  0xfe   : > { %v584_v53 = vadd.f32 %v583_v52, %v435_v51  ;;  %v2703_v54 = vpop.f32.mrf.mxu0 }
  0xff   : > { %v2739_v55 = vpop.f32.mrf.mxu1 }
 0x100   : > { %v438_v56 = vpop.f32.mrf.mxu0 }
 0x101   : > { %v586_v48 = vpop.f32.mrf.mxu1 }
 0x102   : > { %v587_v57 = vadd.f32 %v586_v48, %v438_v56  ;;  %v2704_v58 = vpop.f32.mrf.mxu0 }
 0x103   : > { %v2740_v59 = vpop.f32.mrf.mxu1 }
 0x104   : > { %v443_v60 = vpop.f32.mrf.mxu0 }
 0x105   : > { %v591_v61 = vpop.f32.mrf.mxu1 }
 0x106   : > { %v592_v62 = vadd.f32 %v591_v61, %v443_v60  ;;  %v2707_v63 = vpop.f32.mrf.mxu0 }
 0x107   : > { %v2743_v0 = vpop.f32.mrf.mxu1 }
 0x108   : > { %v446_v2 = vpop.f32.mrf.mxu0 }
 0x109   : > { %v594_v3 = vpop.f32.mrf.mxu1 }
 0x10a   : > { %v595_v4 = vadd.f32 %v594_v3, %v446_v2  ;;  %v2708_v5 = vpop.f32.mrf.mxu0 }
 0x10b   : > { %v2744_v6 = vpop.f32.mrf.mxu1 }
 0x10c   : > { %v451_v7 = vpop.f32.mrf.mxu0 }
 0x10d   : > { %v599_v8 = vpop.f32.mrf.mxu1 }
 0x10e   : > { %v600_v9 = vadd.f32 %v599_v8, %v451_v7  ;;  %v2711_v10 = vpop.f32.mrf.mxu0 }
 0x10f   : > { %v2747_v11 = vpop.f32.mrf.mxu1 }
 0x110   : > { %v454_v12 = vpop.f32.mrf.mxu0 }
 0x111   : > { %v602_v13 = vpop.f32.mrf.mxu1 }
 0x112   : > { %v2712_v14 = vpop.f32.mrf.mxu0 }
 0x113   : > { %v2748_v17 = vpop.f32.mrf.mxu1 }
 0x114   : > { %v784_v18 = vpop.f32.mrf.mxu0 }
 0x115   : > { %v822_v19 = vadd.f32 %v784_v18, %v568_v34  ;;  %v980_v20 = vpop.f32.mrf.mxu1 }
 0x116   : > { %v2767_v21 = vpop.f32.mrf.mxu0 }
 0x117   : > { %v1018_v15 = vadd.f32 %v980_v20, %v822_v19  ;;  %v2803_v22 = vpop.f32.mrf.mxu1 }
 0x118   : > { %v787_v23 = vpop.f32.mrf.mxu0 }
 0x119   : > { %v823_v25 = vadd.f32 %v787_v23, %v571_v39  ;;  %v983_v26 = vpop.f32.mrf.mxu1 }
 0x11a   : > { %v2768_v28 = vpop.f32.mrf.mxu0 }
 0x11b   : > { %v1019_v29 = vadd.f32 %v983_v26, %v823_v25  ;;  %v2804_v16 = vpop.f32.mrf.mxu1 }
 0x11c   : > { %v792_v30 = vpop.f32.mrf.mxu0 }
 0x11d   : > { %v824_v24 = vadd.f32 %v792_v30, %v576_v44  ;;  %v988_v31 = vpop.f32.mrf.mxu1 }
 0x11e   : > { %v2771_v32 = vpop.f32.mrf.mxu0 }
 0x11f   : > { %v1020_v33 = vadd.f32 %v988_v31, %v824_v24  ;;  %v2807_v35 = vpop.f32.mrf.mxu1 }
 0x120   : > { %v795_v37 = vpop.f32.mrf.mxu0 }
 0x121   : > { %v825_v27 = vadd.f32 %v795_v37, %v579_v1  ;;  %v991_v38 = vpop.f32.mrf.mxu1 }
 0x122   : > { %v2772_v34 = vpop.f32.mrf.mxu0 }
 0x123   : > { %v1021_v40 = vadd.f32 %v991_v38, %v825_v27  ;;  %v2808_v41 = vpop.f32.mrf.mxu1 }
 0x124   : > { %v800_v42 = vpop.f32.mrf.mxu0 }
 0x125   : > { %v826_v43 = vadd.f32 %v800_v42, %v584_v53  ;;  %v996_v45 = vpop.f32.mrf.mxu1 }
 0x126   : > { %v2775_v39 = vpop.f32.mrf.mxu0 }
 0x127   : > { %v1022_v46 = vadd.f32 %v996_v45, %v826_v43  ;;  %v2811_v47 = vpop.f32.mrf.mxu1 }
 0x128   : > { %v803_v49 = vpop.f32.mrf.mxu0 }
 0x129   : > { %v827_v36 = vadd.f32 %v803_v49, %v587_v57  ;;  %v999_v50 = vpop.f32.mrf.mxu1 }
 0x12a   : > { %v2776_v44 = vpop.f32.mrf.mxu0 }
 0x12b   : > { %v1023_v51 = vadd.f32 %v999_v50, %v827_v36  ;;  %v2812_v52 = vpop.f32.mrf.mxu1 }
 0x12c   : > { %v808_v54 = vpop.f32.mrf.mxu0 }
 0x12d   : > { %v828_v55 = vadd.f32 %v808_v54, %v592_v62  ;;  %v1004_v56 = vpop.f32.mrf.mxu1 }
 0x12e   : > { %v2779_v1 = vpop.f32.mrf.mxu0 }
 0x12f   : > { %v3725_v48 = vadd.f32 %v1004_v56, %v828_v55  ;;  %v2815_v58 = vpop.f32.mrf.mxu1 }
 0x130   : > { %v811_v59 = vpop.f32.mrf.mxu0 }
 0x131   : > { %v829_v60 = vadd.f32 %v811_v59, %v595_v4  ;;  %v1007_v53 = vpop.f32.mrf.mxu1 }
 0x132   : > { %v2780_v61 = vpop.f32.mrf.mxu0 }
 0x133   : > { %v3727_v63 = vadd.f32 %v1007_v53, %v829_v60  ;;  %v2816_v0 = vpop.f32.mrf.mxu1 }
 0x134   : > { %v816_v2 = vpop.f32.mrf.mxu0 }
 0x135   : > { %v830_v57 = vadd.f32 %v816_v2, %v600_v9  ;;  %v1012_v3 = vpop.f32.mrf.mxu1 }
 0x136   : > { %v2783_v5 = vpop.f32.mrf.mxu0 }
 0x137   : > { %v3729_v6 = vadd.f32 %v1012_v3, %v830_v57  ;;  %v2819_v7 = vpop.f32.mrf.mxu1 }
 0x138   : > { %v819_v62 = vpop.f32.mrf.mxu0 }
 0x139   : > { %v1015_v8 = vpop.f32.mrf.mxu1 }
 0x13a   : > { %v2784_v10 = vpop.f32.mrf.mxu0 }
 0x13b   : > { %v2820_v11 = vpop.f32.mrf.mxu1 }
 0x13c   : > { %v1205_v12 = vpop.f32.mrf.mxu0 }
 0x13d   : > { %v1243_v13 = vadd.f32 %v1205_v12, %v1018_v15  ;;  %v1405_v14 = vpop.f32.mrf.mxu1 }
 0x13e   : > { %v2839_v4 = vpop.f32.mrf.mxu0 }
 0x13f   : > { %v3731_v17 = vadd.f32 %v1405_v14, %v1243_v13  ;;  %v2875_v18 = vpop.f32.mrf.mxu1 }
 0x140   : > { %v1208_v19 = vpop.f32.mrf.mxu0 }
 0x141   : > { %v1244_v20 = vadd.f32 %v1208_v19, %v1019_v29  ;;  %v1408_v21 = vpop.f32.mrf.mxu1 }
 0x142   : > { %v2840_v9 = vpop.f32.mrf.mxu0 }
 0x143   : > { %v3733_v22 = vadd.f32 %v1408_v21, %v1244_v20  ;;  %v2876_v23 = vpop.f32.mrf.mxu1 }
 0x144   : > { %v1213_v25 = vpop.f32.mrf.mxu0 }
 0x145   : > { %v1245_v26 = vadd.f32 %v1213_v25, %v1020_v33  ;;  %v1413_v28 = vpop.f32.mrf.mxu1 }
 0x146   : > { %v2843_v16 = vpop.f32.mrf.mxu0 }
 0x147   : > { %v3735_v30 = vadd.f32 %v1413_v28, %v1245_v26  ;;  %v2879_v24 = vpop.f32.mrf.mxu1 }
 0x148   : > { %v1216_v15 = vpop.f32.mrf.mxu0 }
 0x149   : > { %v1246_v31 = vadd.f32 %v1216_v15, %v1021_v40  ;;  %v1416_v32 = vpop.f32.mrf.mxu1 }
 0x14a   : > { %v2844_v35 = vpop.f32.mrf.mxu0 }
 0x14b   : > { %v3737_v37 = vadd.f32 %v1416_v32, %v1246_v31  ;;  %v2880_v27 = vpop.f32.mrf.mxu1  ;;  %v2050_v35 = vpop.permute.xlu0 %2049 }
 0x14c   : > { %v1221_v29 = vpop.f32.mrf.mxu0 }
 0x14d   : > { %v1247_v38 = vadd.f32 %v1221_v29, %v1022_v46  ;;  %v1421_v34 = vpop.f32.mrf.mxu1  ;;  %v3759_v29 = vpop.permute.xlu1 %2059 }
 0x14e   : > { %v2847_v41 = vpop.f32.mrf.mxu0 }
 0x14f   : > { %v3739_v42 = vadd.f32 %v1421_v34, %v1247_v38  ;;  %v2883_v43 = vpop.f32.mrf.mxu1 }
 0x150   : > { %v1224_v33 = vpop.f32.mrf.mxu0 }
 0x151   : > { %v1248_v45 = vadd.f32 %v1224_v33, %v1023_v51  ;;  %v1424_v39 = vpop.f32.mrf.mxu1 }
 0x152   : > { %v2848_v47 = vpop.f32.mrf.mxu0 }
 0x153   : > { %v3741_v49 = vadd.f32 %v1424_v39, %v1248_v45  ;;  %v2884_v36 = vpop.f32.mrf.mxu1  ;;  %v2055_v39 = vpop.permute.xlu0 %2054 }
 0x154   : > { %v1229_v40 = vpop.f32.mrf.mxu0  ;;  %v3762_v36 = vpop.permute.xlu1 %2064 }
 0x155   : > { %v1429_v50 = vpop.f32.mrf.mxu1  ;;  %v1249_v33 = vadd.f32 %v1229_v40, %v3725_v48 }
 0x156   : > { %v2851_v44 = vpop.f32.mrf.mxu0 }
 0x157   : > { %v2887_v52 = vpop.f32.mrf.mxu1 }
 0x158   : > { %v1232_v54 = vpop.f32.mrf.mxu0 }
 0x159   : > { %v1432_v55 = vpop.f32.mrf.mxu1  ;;  %v1250_v44 = vadd.f32 %v1232_v54, %v3727_v63 }
 0x15a   : > { %v2852_v56 = vpop.f32.mrf.mxu0 }
 0x15b   : > { %v2888_v46 = vpop.f32.mrf.mxu1 }
 0x15c   : > { %v1237_v1 = vpop.f32.mrf.mxu0 }
 0x15d   : > { %v3743_v58 = vpop.f32.mrf.mxu1 }
 0x15e   : > { %v2855_v59 = vpop.f32.mrf.mxu0 }
 0x15f   : > { %v2891_v60 = vpop.f32.mrf.mxu1  ;;  %v1449_v59 = vadd.f32 %v1429_v50, %v1249_v33 }
 0x160   : > { %v1240_v53 = vpop.f32.mrf.mxu0 }
 0x161   : > { %v1440_v51 = vpop.f32.mrf.mxu1 }
 0x162   : > { %v2856_v61 = vpop.f32.mrf.mxu0  ;;  %v1450_v51 = vadd.f32 %v1432_v55, %v1250_v44 }
 0x163   : > { %v2892_v0 = vpop.f32.mrf.mxu1  ;;  %v1251_v61 = vadd.f32 %v1237_v1, %v3729_v6 }
 0x164   : > { %v1630_v2 = vpop.f32.mrf.mxu0 }
 0x165   : > { %v1826_v57 = vpop.f32.mrf.mxu1  ;;  %v1668_v56 = vadd.f32 %v1630_v2, %v3731_v17  ;;  %v1451_v2 = vadd.f32 %v3743_v58, %v1251_v61 }
 0x166   : > { %v2911_v3 = vpop.f32.mrf.mxu0 }
 0x167   : > { %v2947_v5 = vpop.f32.mrf.mxu1  ;;  %v3767_v3 = vpop.permute.xlu0 %2069  ;;  %v1864_v40 = vadd.f32 %v1826_v57, %v1668_v56 }
 0x168   : > { %v1633_v7 = vpop.f32.mrf.mxu0 }
 0x169   : > { %v1829_v62 = vpop.f32.mrf.mxu1  ;;  %v1669_v5 = vadd.f32 %v1633_v7, %v3733_v22 }
 0x16a   : > { %v2912_v8 = vpop.f32.mrf.mxu0 }
 0x16b   : > { %v2948_v10 = vpop.f32.mrf.mxu1  ;;  %v1865_v6 = vadd.f32 %v1829_v62, %v1669_v5  ;;  %v2080_v7 = vpop.permute.xlu0 %2079 }
 0x16c   : > { %v1638_v11 = vpop.f32.mrf.mxu0  ;;  %v3770_v10 = vpop.permute.xlu1 %2074 }
 0x16d   : > { %v3745_v12 = vpop.f32.mrf.mxu1  ;;  %v1670_v1 = vadd.f32 %v1638_v11, %v3735_v30 }
 0x16e   : > { %v2915_v13 = vpop.f32.mrf.mxu0 }
 0x16f   : > { %v2951_v14 = vpop.f32.mrf.mxu1  ;;  %v1866_v58 = vadd.f32 %v3745_v12, %v1670_v1 }
 0x170   : > { %v3747_v4 = vpop.f32.mrf.mxu0 }
 0x171   : > { %v3749_v18 = vpop.f32.mrf.mxu1  ;;  %v1671_v62 = vadd.f32 %v3747_v4, %v3737_v37  ;;  %v2090_v37 = vpop.permute.xlu0 %2089 }
 0x172   : > { %v2916_v19 = vpop.f32.mrf.mxu0 }
 0x173   : > { %v2952_v20 = vpop.f32.mrf.mxu1  ;;  %v1867_v44 = vadd.f32 %v3749_v18, %v1671_v62 }
 0x174   : > { %v3751_v21 = vpop.f32.mrf.mxu0 }
 0x175   : > { %v3753_v9 = vpop.f32.mrf.mxu1 }
 0x176   : > { %v2919_v23 = vpop.f32.mrf.mxu0 }
 0x177   : > { %v2955_v25 = vpop.f32.mrf.mxu1 }
 0x178   : > { %v3755_v26 = vpop.f32.mrf.mxu0 }
 0x179   : > { %v3757_v28 = vpop.f32.mrf.mxu1 }
 0x17a   : > { %v2920_v16 = vpop.f32.mrf.mxu0 }
 0x17b   : > { %v2956_v24 = vpop.f32.mrf.mxu1 }
 0x17c   : > { %v1654_v15 = vpop.f32.mrf.mxu0  ;;  %v2085_v24 = vpop.permute.xlu1 %2084 }
 0x17d   : > { %v1850_v31 = vpop.f32.mrf.mxu1  ;;  %v1674_v0 = vadd.f32 %v1654_v15, %v1449_v59 }
 0x17e   : > { %v2923_v32 = vpop.f32.mrf.mxu0 }
 0x17f   : > { %v2959_v27 = vpop.f32.mrf.mxu1  ;;  %v1870_v55 = vadd.f32 %v1850_v31, %v1674_v0 }
 0x180   : > { %v1657_v38 = vpop.f32.mrf.mxu0 }
 0x181   : > { %v1853_v34 = vpop.f32.mrf.mxu1  ;;  %v1675_v63 = vadd.f32 %v1657_v38, %v1450_v51 }
 0x182   : > { %v2924_v41 = vpop.f32.mrf.mxu0 }
 0x183   : > { %v2960_v43 = vpop.f32.mrf.mxu1  ;;  %v1871_v19 = vadd.f32 %v1853_v34, %v1675_v63 }
 0x184   : > { %v1662_v45 = vpop.f32.mrf.mxu0 }
 0x185   : > { %v1858_v47 = vpop.f32.mrf.mxu1  ;;  %v1676_v57 = vadd.f32 %v1662_v45, %v1451_v2 }
 0x186   : > { %v2927_v52 = vpop.f32.mrf.mxu0 }
 0x187   : > { %v2963_v46 = vpop.f32.mrf.mxu1  ;;  %v1872_v11 = vadd.f32 %v1858_v47, %v1676_v57  ;;  %v1672_v52 = vadd.f32 %v3751_v21, %v3739_v42  ;;  %v1673_v42 = vadd.f32 %v3755_v26, %v3741_v49 }
 0x188   : > { %v1665_v60 = vpop.f32.mrf.mxu0 }
 0x189   : > { %v1861_v53 = vpop.f32.mrf.mxu1  ;;  %v1868_v18 = vadd.f32 %v3753_v9, %v1672_v52 }
 0x18a   : > { %v2928_v48 = vpop.f32.mrf.mxu0 }
 0x18b   : > { %v2964_v8 = vpop.f32.mrf.mxu1 }
 0x18c   : > { %v1991_v17 = vpop.f32.mrf.mxu0 }
 0x18d   : > { %v2029_v54 = vadd.f32 %v1991_v17, %v1864_v40  ;;  %v2015_v50 = vpop.f32.mrf.mxu1 }
 0x18e   : > { %v2983_v13 = vpop.f32.mrf.mxu0  ;;  %v2035_v22 = vadd.f32 %v2015_v50, %v1870_v55 }
 0x18f   : > { %v2995_v14 = vpop.f32.mrf.mxu1  ;;  %v2092_v20 = vmul.f32 %v2050_v35, %v2029_v54  ;;  %v1869_v13 = vadd.f32 %v3757_v28, %v1673_v42 }
 0x190   : > { %v1994_v23 = vpop.f32.mrf.mxu0  ;;  %v2098_v38 = vmul.f32 %v2080_v7, %v2035_v22 }
 0x191   : > { %v2030_v25 = vadd.f32 %v1994_v23, %v1865_v6  ;;  %v2018_v16 = vpop.f32.mrf.mxu1  ;;  %v2162_v27 = vmul.f32 %v2092_v20, %v2092_v20 }
 0x192   : > { %v2036_v15 = vadd.f32 %v2018_v16, %v1871_v19  ;;  %v2984_v32 = vpop.f32.mrf.mxu0  ;;  %v2168_v23 = vmul.f32 %v2098_v38, %v2098_v38 }
 0x193   : > { %v2093_v31 = vmul.f32 %v2055_v39, %v2030_v25  ;;  %v2996_v30 = vpop.f32.mrf.mxu1 }
 0x194   : > { %v2099_v35 = vmul.f32 %v2085_v24, %v2036_v15  ;;  %v1999_v34 = vpop.f32.mrf.mxu0 }
 0x195   : > { %v2540_v41 = vpack.c.bf16 %v2093_v31, %v2092_v20  ;;  %v2147_v43 = vadd.f32 %v2093_v31, %v2092_v20  ;;  %v2163_v12 = vmul.f32 %v2093_v31, %v2093_v31  ;;  %v2031_v33 = vadd.f32 %v1999_v34, %v1866_v58  ;;  %v2023_v45 = vpop.f32.mrf.mxu1 }
 0x196   : > { %v2555_v4 = vpack.c.bf16 %v2099_v35, %v2098_v38  ;;  %v2037_v39 = vadd.f32 %v2023_v45, %v1872_v11  ;;  %v2987_v47 = vpop.f32.mrf.mxu0  ;;  %v2169_v16 = vmul.f32 %v2099_v35, %v2099_v35 }
 0x197   : > { %2541 = vst [vmem:[%s3781_s23] sm:$0xff] %v2540_v41   ;;  %v2171_v56 = vadd.f32 %v2163_v12, %v2162_v27  ;;  %v2094_v46 = vmul.f32 %v3759_v29, %v2031_v33  ;;  %v2999_v59 = vpop.f32.mrf.mxu1 }
 0x198   : > { %2559 = vst [vmem:[%s3781_s23 + $0x18] sm:$0xff] %v2555_v4   ;;  %v2100_v60 = vmul.f32 %v2090_v37, %v2037_v39  ;;  %v2002_v53 = vpop.f32.mrf.mxu0 }
 0x199   : > { %v2148_v51 = vadd.f32 %v2147_v43, %v2094_v46  ;;  %v2164_v61 = vmul.f32 %v2094_v46, %v2094_v46  ;;  %v2032_v0 = vadd.f32 %v2002_v53, %v1867_v44  ;;  %v2026_v48 = vpop.f32.mrf.mxu1 }
 0x19a   : > { %v2536_v40 = vpack.c.bf16 %v2100_v60, %v2100_v60  ;;  %v2988_v5 = vpop.f32.mrf.mxu0 }
 0x19b   : > { %v2172_v21 = vadd.f32 %v2171_v56, %v2164_v61  ;;  %v2095_v29 = vmul.f32 %v3762_v36, %v2032_v0  ;;  %v3000_v8 = vpop.f32.mrf.mxu1 }
 0x19c   : > { %2146 = vst [vmem:[%s3781_s23 + $0x20] sm:$0xf] %v2536_v40  ;;  %v2007_v63 = vpop.f32.mrf.mxu0 }
 0x19d   : > { %v2545_v17 = vpack.c.bf16 %v2095_v29, %v2094_v46  ;;  %v2149_v54 = vadd.f32 %v2148_v51, %v2095_v29  ;;  %v2165_v50 = vmul.f32 %v2095_v29, %v2095_v29  ;;  %v2033_v2 = vadd.f32 %v2007_v63, %v1868_v18 }
 0x19e   : > { %v2991_v55 = vpop.f32.mrf.mxu0 }
 0x19f   : > { %2557 = vst [vmem:[%s3781_s23 + $0x8] sm:$0xff] %v2545_v17   ;;  %v2173_v6 = vadd.f32 %v2172_v21, %v2165_v50  ;;  %v2096_v9 = vmul.f32 %v3767_v3, %v2033_v2  ;;  %v2170_v3 = vmul.f32 %v2100_v60, %v2100_v60 }
 0x1a0   : > { %v2010_v1 = vpop.f32.mrf.mxu0 }
 0x1a1   : > { %v2150_v49 = vadd.f32 %v2149_v54, %v2096_v9  ;;  %v2166_v26 = vmul.f32 %v2096_v9, %v2096_v9  ;;  %v2034_v14 = vadd.f32 %v2010_v1, %v1869_v13 }
 0x1a2   : > { %v2992_v36 = vpop.f32.mrf.mxu0 }
 0x1a3   : > { %v2174_v19 = vadd.f32 %v2173_v6, %v2166_v26  ;;  %v2097_v57 = vmul.f32 %v3770_v10, %v2034_v14 }
 0x1a5   : > { %v2550_v20 = vpack.c.bf16 %v2097_v57, %v2096_v9  ;;  %v2151_v22 = vadd.f32 %v2150_v49, %v2097_v57  ;;  %v2167_v7 = vmul.f32 %v2097_v57, %v2097_v57 }
 0x1a7   : > { %2558 = vst [vmem:[%s3781_s23 + $0x10] sm:$0xff] %v2550_v20   ;;  %v2152_v25 = vadd.f32 %v2151_v22, %v2098_v38  ;;  %v2175_v28 = vadd.f32 %v2174_v19, %v2167_v7 }
 0x1a9   : > { %v2153_v24 = vadd.f32 %v2152_v25, %v2099_v35  ;;  %v2176_v15 = vadd.f32 %v2175_v28, %v2168_v23 }
 0x1ab   : > { %v2154_v32 = vadd.f32 %v2153_v24, %v2100_v60  ;;  %v2177_v58 = vadd.f32 %v2176_v15, %v2169_v16 }
 0x1ad   : > { %v2155_v62 = vrot.slane %v2154_v32, 4  ;;  %v2178_v31 = vadd.f32 %v2177_v58, %v2170_v3 }
 0x1af   : > { %v2156_v30 = vadd.f32 %v2155_v62, %v2154_v32  ;;  %v2179_v11 = vrot.slane %v2178_v31, 4 }
 0x1b1   : > { %v2157_v27 = vrot.slane %v2156_v30, 2  ;;  %v2180_v10 = vadd.f32 %v2179_v11, %v2178_v31 }
 0x1b3   : > { %v2158_v34 = vadd.f32 %v2157_v27, %v2156_v30  ;;  %v2181_v41 = vrot.slane %v2180_v10, 2 }
 0x1b5   : > { %v2159_v43 = vrot.slane %v2158_v34, 1  ;;  %v2182_v12 = vadd.f32 %v2181_v41, %v2180_v10 }
 0x1b7   : > { %v2160_v38 = vadd.f32 %v2159_v43, %v2158_v34  ;;  %v2183_v35 = vrot.slane %v2182_v12, 1 }
 0x1b9   : > { %2161 = vst [vmem:[%s208_s27] sm:$0x1] %v2160_v38  ;;  %v2184_v33 = vadd.f32 %v2183_v35, %v2182_v12 }
 0x1bb   : > { %2185 = vst [vmem:[%s208_s27 + $0x1] sm:$0x1] %v2184_v33 }
 0x1bc PF: > { %s15_s15 = sadd.s32 1, %s3147_s15  }
 0x1bd   : > { %p12_p4 = scmp.ge.s32.totalorder %s15_s15, 4  }
 0x1bf   :  { %14 = sbr.rel (!%p12_p4) target bundleno = 1 (0x1), region = 82 }

// kernel: resnet_block_bnreluconv.5
= control target key start
LH: loop header
LB: loop body
LE: loop exit
PB: predicated region body
PF: predicated region fallthrough
CT: control target
= control target key end

     0   :  { %s4224_s24 = smov 0   ;;  %s5490_s0 = inlined_call_operand.vmem [shape: bf16[2,102,128], index: 0, kind: input, shape index: {}]   ;;  %s5491_s1 = inlined_call_operand.vmem [shape: f32[102,1], index: 1, kind: input, shape index: {}]   ;;  %s5492_s2 = inlined_call_operand.vmem [shape: f32[1,128], index: 2, kind: input, shape index: {}]   ;;  %s5493_s3 = inlined_call_operand.vmem [shape: f32[1,128], index: 3, kind: input, shape index: {}]   ;;  %s5494_s4 = inlined_call_operand.vmem [shape: bf16[9,128,128], index: 4, kind: input, shape index: {}]   ;;  %s5495_s5 = inlined_call_operand.vmem [shape: bf16[2,80,128], index: 5, kind: input, shape index: {}]   ;;  %s5496_s6 = inlined_call_operand.vmem [shape: bf16[128,128], index: 6, kind: input, shape index: {}]   ;;  %s5497_s7 = inlined_call_operand.vmem [shape: f32[2,80,128], index: 7, kind: output, shape index: {}]  }
   0x1 LB: > { %s3267_s25 = sadd.s32 4294967295, %s4179_s24   ;;  %p3271_p0 = scmp.ge.s32.totalorder %s4179_s24, 1  ;;  %s4179_s24 = sphi %s4224_s24, %s17_s24  }
   0x2   : > { %p247_p1 = scmp.lt.s32.totalorder %s4179_s24, 3 }
   0x4   : > { %p248_p2 = pnand %p3271_p0, %p247_p1 }
   0x5   : > { %p284_p3 = scmp.lt.s32.totalorder (!%p248_p2), %s3267_s25, 1 }
   0x6   : > { %251 = sbr.rel (%p248_p2) target bundleno = 553 (0x229), region = 48 }
   0xb   : > { %v479_v0 = vld [vmem:[%s5491_s1 + $0x11] sm:$0xff]  ;;  %v477_v1 = vld [vmem:[%s5491_s1 + $0x1] sm:$0xff]  ;;  %v4181_v2 = vmov 0   ;;  %v480_v3 = vld [vmem:[%s5491_s1 + $0x19] sm:$0xff]  ;;  %v4182_v5 = vmov 0.0   ;;  %vm4183_vm0 = vmmov 0  }
   0xc   : > { %4085 = vset.pattern.permute.xlu1 %v4181_v2  ;;  %4084 = vset.pattern.permute.xlu0 %v4181_v2  ;;  %v478_v4 = vld [vmem:[%s5491_s1 + $0x9] sm:$0xff]  ;;  %v481_v7 = vld [vmem:[%s5491_s1 + $0x21] sm:$0xff]  ;;  %v484_v10 = vld [vmem:[%s5491_s1 + $0x39] sm:$0xff]  ;;  %s5499_s25 = smov (!%p284_p3, %s3267_s25), 1  ;;  %vm560_vm1 = vcmask 1040384   ;;  %vm972_vm3 = vcmask 1041408  }
   0xd   : > { %530 = vperm.xlu1 %4085, %v479_v0   ;;  %522 = vperm.xlu0 %4084, %v477_v1   ;;  %v482_v6 = vld [vmem:[%s5491_s1 + $0x29] sm:$0xff]  ;;  %v322_v9 = vld [vmem:[%s5491_s1] sm:$0xff]  ;;  %v483_v11 = vld [vmem:[%s5491_s1 + $0x31] sm:$0xff]  ;;  %s4070_s20 = smul.u32 52, %s5499_s25  ;;  %vm625_vm2 = vsmask.f32 7424 }
   0xe   : > { %3746 = vmatprep.subr.bf16.mxu1 %v4182_v5  ;;  %3710 = vmatprep.subr.bf16.mxu0 %v4182_v5  ;;  %v323_v8 = vld [vmem:[%s5491_s1 + $0x8] sm:$0xff]  ;;  %v4086_v12 = vld [vmem:[%s5494_s4 + $0x38] sm:$0xff]   ;;  %v324_v15 = vld [vmem:[%s5491_s1 + $0x10] sm:$0xff]  ;;  %s4071_s13 = smul.u32 40, %s5499_s25  ;;  %vm1043_vm4 = vcmask 1046528   ;;  %vm1568_vm5 = vcmask 1042432  }
   0xf   : > { %3762 = vmatprep.mubr.msk.bf16.mxu1 %vm4183_vm0, %v4182_v5  ;;  %3726 = vmatprep.mubr.msk.bf16.mxu0 %vm4183_vm0, %v4182_v5  ;;  %v325_v13 = vld [vmem:[%s5491_s1 + $0x18] sm:$0xff]  ;;  %v4088_v16 = vld [vmem:[%s5494_s4 + $0x30] sm:$0xff]   ;;  %v485_v19 = vld [vmem:[%s5491_s1 + $0x41] sm:$0xff]  ;;  %s4474_s29 = scalar_lea.vmem %s5490_s0, %s4070_s20  ;;  %vm1878_vm6 = vcmask 1043456   ;;  %vm1633_vm7 = vsmask.f32 6400 }
  0x10   : > { %v4087_v14 = vld [vmem:[%s5494_s4 + $0x78] sm:$0xff]   ;;  %3747 = vmatpush3.bf16.msra.mxu1 %v4086_v12  ;;  %v4089_v17 = vld [vmem:[%s5494_s4 + $0x70] sm:$0xff]   ;;  %v4090_v20 = vld [vmem:[%s5494_s4 + $0x28] sm:$0xff]   ;;  %s4791_s16 = scalar_lea.vmem %s5495_s5, %s4071_s13  ;;  %vm1949_vm8 = vcmask 1045504   ;;  %vm2474_vm9 = vcmask 1044480  }
  0x11   : > { %534 = vperm.xlu1 %4085, %v480_v3   ;;  %526 = vperm.xlu0 %4084, %v478_v4   ;;  %v486_v18 = vld [vmem:[%s5491_s1 + $0x49] sm:$0xff]  ;;  %v326_v23 = vld [vmem:[%s5491_s1 + $0x20] sm:$0xff]  ;;  %v329_v26 = vld [vmem:[%s5491_s1 + $0x38] sm:$0xff]  ;;  %vm2539_vm10 = vsmask.f32 5376 }
  0x12   : > { %3711 = vmatpush3.bf16.msra.mxu0 %v4087_v14  ;;  %3748 = vmatprep.subr.bf16.mxu1 %v4182_v5  ;;  %v4091_v21 = vld [vmem:[%s5494_s4 + $0x68] sm:$0xff]   ;;  %v4092_v24 = vld [vmem:[%s5494_s4 + $0x20] sm:$0xff]   ;;  %v328_v27 = vld [vmem:[%s5491_s1 + $0x30] sm:$0xff] }
  0x13   : > { %3712 = vmatprep.subr.bf16.mxu0 %v4182_v5  ;;  %v327_v22 = vld [vmem:[%s5491_s1 + $0x28] sm:$0xff]  ;;  %v4093_v25 = vld [vmem:[%s5494_s4 + $0x60] sm:$0xff]   ;;  %v4094_v28 = vld [vmem:[%s5494_s4 + $0x18] sm:$0xff]  }
  0x14   : > { %3749 = vmatpush3.bf16.msra.mxu1 %v4088_v16  ;;  %v4095_v29 = vld [vmem:[%s5494_s4 + $0x58] sm:$0xff]   ;;  %v331_v30 = vld [vmem:[%s5491_s1 + $0x48] sm:$0xff]  ;;  %v330_v31 = vld [vmem:[%s5491_s1 + $0x40] sm:$0xff] }
  0x15   : > { %542 = vperm.xlu1 %4085, %v482_v6   ;;  %538 = vperm.xlu0 %4084, %v481_v7   ;;  %v4096_v32 = vld [vmem:[%s5494_s4 + $0x10] sm:$0xff]   ;;  %v919_v35 = vld [vmem:[%s5491_s1 + $0x2] sm:$0xff]  ;;  %v922_v38 = vld [vmem:[%s5491_s1 + $0x1a] sm:$0xff] }
  0x16   : > { %3713 = vmatpush3.bf16.msra.mxu0 %v4089_v17  ;;  %3750 = vmatprep.subr.bf16.mxu1 %v4182_v5  ;;  %v4097_v33 = vld [vmem:[%s5494_s4 + $0x50] sm:$0xff]   ;;  %v4098_v36 = vld [vmem:[%s5494_s4 + $0x8] sm:$0xff]   ;;  %v4100_v40 = vld [vmem:[%s5494_s4] sm:$0xff]  }
  0x17   : > { %3714 = vmatprep.subr.bf16.mxu0 %v4182_v5  ;;  %v920_v34 = vld [vmem:[%s5491_s1 + $0xa] sm:$0xff]  ;;  %v921_v39 = vld [vmem:[%s5491_s1 + $0x12] sm:$0xff]  ;;  %v4101_v41 = vld [vmem:[%s5494_s4 + $0x40] sm:$0xff]  }
  0x18   : > { %3751 = vmatpush3.bf16.msra.mxu1 %v4090_v20  ;;  %v4099_v37 = vld [vmem:[%s5494_s4 + $0x48] sm:$0xff]   ;;  %v1218_v44 = vld [vmem:[%s5491_s1 + $0x32] sm:$0xff]  ;;  %v926_v45 = vld [vmem:[%s5491_s1 + $0x3a] sm:$0xff] }
  0x19   : > { %381 = vperm.xlu1 %4085, %v323_v8   ;;  %376 = vperm.xlu0 %4084, %v322_v9   ;;  %v1216_v42 = vld [vmem:[%s5491_s1 + $0x22] sm:$0xff]  ;;  %v924_v43 = vld [vmem:[%s5491_s1 + $0x2a] sm:$0xff]  ;;  %v1222_v48 = vld [vmem:[%s5491_s1 + $0x52] sm:$0xff] }
  0x1a   : > { %3715 = vmatpush3.bf16.msra.mxu0 %v4091_v21  ;;  %3752 = vmatprep.subr.bf16.mxu1 %v4182_v5  ;;  %v1220_v46 = vld [vmem:[%s5491_s1 + $0x42] sm:$0xff]  ;;  %v928_v47 = vld [vmem:[%s5491_s1 + $0x4a] sm:$0xff]  ;;  %v1516_v49 = vld [vmem:[%s5491_s1 + $0x13] sm:$0xff] }
  0x1b   : > { %3716 = vmatprep.subr.bf16.mxu0 %v4182_v5  ;;  %v1515_v50 = vld [vmem:[%s5491_s1 + $0xb] sm:$0xff]  ;;  %v1518_v51 = vld [vmem:[%s5491_s1 + $0x23] sm:$0xff]  ;;  %v1517_v52 = vld [vmem:[%s5491_s1 + $0x1b] sm:$0xff] }
  0x1c   : > { %3753 = vmatpush3.bf16.msra.mxu1 %v4092_v24  ;;  %v4410_v53 = vld [vmem:[%s5491_s1 + $0x14] sm:$0xff]  ;;  %v1825_v54 = vld [vmem:[%s5491_s1 + $0xc] sm:$0xff]  ;;  %v4418_v55 = vld [vmem:[%s5491_s1 + $0x24] sm:$0xff] }
  0x1d   : > { %550 = vperm.xlu1 %4085, %v484_v10   ;;  %546 = vperm.xlu0 %4084, %v483_v11   ;;  %v4423_v56 = vld [vmem:[%s5491_s1 + $0x1c] sm:$0xff]  ;;  %v1520_v57 = vld [vmem:[%s5491_s1 + $0x33] sm:$0xff]  ;;  %v1519_v58 = vld [vmem:[%s5491_s1 + $0x2b] sm:$0xff] }
  0x1e   : > { %3717 = vmatpush3.bf16.msra.mxu0 %v4093_v25  ;;  %3754 = vmatprep.subr.bf16.mxu1 %v4182_v5  ;;  %v4437_v59 = vld [vmem:[%s5491_s1 + $0x34] sm:$0xff]  ;;  %v4442_v60 = vld [vmem:[%s5491_s1 + $0x2c] sm:$0xff]  ;;  %v1522_v61 = vld [vmem:[%s5491_s1 + $0x43] sm:$0xff] }
  0x1f   : > { %3718 = vmatprep.subr.bf16.mxu0 %v4182_v5  ;;  %v1521_v62 = vld [vmem:[%s5491_s1 + $0x3b] sm:$0xff]  ;;  %v4462_v63 = vld [vmem:[%s5491_s1 + $0x44] sm:$0xff]  ;;  %v1524_v1 = vld [vmem:[%s5491_s1 + $0x53] sm:$0xff] }
  0x20   : > { %3755 = vmatpush3.bf16.msra.mxu1 %v4094_v28  ;;  %v4467_v0 = vld [vmem:[%s5491_s1 + $0x3c] sm:$0xff]  ;;  %v1523_v2 = vld [vmem:[%s5491_s1 + $0x4b] sm:$0xff]  ;;  %v4487_v6 = vld [vmem:[%s5491_s1 + $0x54] sm:$0xff] }
  0x21   : > { %391 = vperm.xlu1 %4085, %v325_v13   ;;  %386 = vperm.xlu0 %4084, %v324_v15   ;;  %v3513_v3 = vld [vmem:[%s4474_s29] sm:$0xff]   ;;  %v3568_v4 = vld [vmem:[%s4474_s29 + $0x8] sm:$0xff]   ;;  %v3569_v9 = vld [vmem:[%s4474_s29 + $0x10] sm:$0xff]  }
  0x22   : > { %3719 = vmatpush3.bf16.msra.mxu0 %v4095_v29  ;;  %3756 = vmatprep.subr.bf16.mxu1 %v4182_v5  ;;  %v4492_v7 = vld [vmem:[%s5491_s1 + $0x4c] sm:$0xff]  ;;  %v3514_v8 = vunpack.c.l.bf16 %v3513_v3  ;;  %v4498_v10 = vld [vmem:[%s5492_s2] ss:$0 sm:$0xff]  ;;  %v3515_v11 = vunpack.c.h.bf16 %v3513_v3  ;;  %v3519_v12 = vunpack.c.h.bf16 %v3568_v4  ;;  %v3518_v13 = vunpack.c.l.bf16 %v3568_v4  ;;  %v2421_v15 = vld [vmem:[%s5491_s1 + $0x15] sm:$0xff] }
  0x23   : > { %3720 = vmatprep.subr.bf16.mxu0 %v4182_v5  ;;  %v2422_v14 = vld [vmem:[%s5491_s1 + $0x1d] sm:$0xff]  ;;  %v3522_v16 = vunpack.c.l.bf16 %v3569_v9  ;;  %v3523_v17 = vunpack.c.h.bf16 %v3569_v9  ;;  %v2423_v24 = vld [vmem:[%s5491_s1 + $0x25] sm:$0xff] }
  0x24   : > { %3757 = vmatpush3.bf16.msra.mxu1 %v4096_v32  ;;  %v490_v20 = vmul.f32 %v3519_v12, %v4498_v10  ;;  %v488_v21 = vmul.f32 %v3515_v11, %v4498_v10  ;;  %v3570_v28 = vld [vmem:[%s4474_s29 + $0x18] sm:$0xff]  }
  0x25   : > { %558 = vperm.xlu1 %4085, %v486_v18   ;;  %554 = vperm.xlu0 %4084, %v485_v19   ;;  %v487_v18 = vmul.f32 %v3514_v8, %v4498_v10  ;;  %v4512_v19 = vld [vmem:[%s5493_s3] ss:$0 sm:$0xff]  ;;  %v491_v25 = vmul.f32 %v3522_v16, %v4498_v10  ;;  %v2425_v12 = vld [vmem:[%s5491_s1 + $0x35] sm:$0xff] }
  0x26   : > { %3721 = vmatpush3.bf16.msra.mxu0 %v4097_v33  ;;  %3758 = vmatprep.subr.bf16.mxu1 %v4182_v5  ;;  %v499_v32 = vadd.f32 %v4512_v19, %v488_v21  ;;  %v2426_v11 = vld [vmem:[%s5491_s1 + $0x3d] sm:$0xff] }
  0x27   : > { %3722 = vmatprep.subr.bf16.mxu0 %v4182_v5 }
  0x28   : > { %3759 = vmatpush3.bf16.msra.mxu1 %v4098_v36  ;;  %v3526_v36 = vunpack.c.l.bf16 %v3570_v28 }
  0x29   : > { %401 = vperm.xlu1 %4085, %v327_v22   ;;  %396 = vperm.xlu0 %4084, %v326_v23   ;;  %v489_v22 = vmul.f32 %v3518_v13, %v4498_v10  ;;  %v2424_v23 = vld [vmem:[%s5491_s1 + $0x2d] sm:$0xff] }
  0x2a   : > { %3723 = vmatpush3.bf16.msra.mxu0 %v4099_v37  ;;  %3760 = vmatprep.subr.bf16.mxu1 %v4182_v5 }
  0x2b   : > { %3724 = vmatprep.subr.bf16.mxu0 %v4182_v5  ;;  %v500_v33 = vadd.f32 %v4512_v19, %v489_v22 }
  0x2c   : > { %3761 = vmatpush3.bf16.msra.mxu1 %v4100_v40 }
  0x2d   : > { %411 = vperm.xlu1 %4085, %v329_v26   ;;  %406 = vperm.xlu0 %4084, %v328_v27   ;;  %v492_v26 = vmul.f32 %v3523_v17, %v4498_v10  ;;  %v498_v27 = vadd.f32 %v4512_v19, %v487_v18 }
  0x2e   : > { %3725 = vmatpush3.bf16.msra.mxu0 %v4101_v41  ;;  %3818 = vmatprep.subr.bf16.mxu1 %v4182_v5 }
  0x2f   : > { %3782 = vmatprep.subr.bf16.mxu0 %v4182_v5  ;;  %v509_v37 = vmax.f32 %v498_v27, 0.0 }
  0x31   : > { %421 = vperm.xlu1 %4085, %v331_v30   ;;  %416 = vperm.xlu0 %4084, %v330_v31   ;;  %v501_v31 = vadd.f32 %v4512_v19, %v490_v20 }
  0x33   : > { %v4532_v41 = vmax.f32 %v501_v31, 0.0 }
  0x35   : > { %938 = vperm.xlu1 %4085, %v920_v34   ;;  %934 = vperm.xlu0 %4084, %v919_v35   ;;  %v503_v35 = vadd.f32 %v4512_v19, %v492_v26 }
  0x39   : > { %946 = vperm.xlu1 %4085, %v922_v38   ;;  %942 = vperm.xlu0 %4084, %v921_v39  }
  0x3d   : > { %1262 = vperm.xlu1 %4085, %v921_v39   ;;  %1258 = vperm.xlu0 %4084, %v920_v34   ;;  %v502_v34 = vadd.f32 %v4512_v19, %v491_v25 }
  0x41   : > { %1270 = vperm.xlu1 %4085, %v1216_v42   ;;  %1266 = vperm.xlu0 %4084, %v922_v38   ;;  %v3527_v38 = vunpack.c.h.bf16 %v3570_v28 }
  0x45   : > { %954 = vperm.xlu1 %4085, %v924_v43   ;;  %950 = vperm.xlu0 %4084, %v1216_v42  }
  0x49   : > { %1278 = vperm.xlu1 %4085, %v1218_v44   ;;  %1274 = vperm.xlu0 %4084, %v924_v43   ;;  %v4534_v43 = vmax.f32 %v499_v32, 0.0 }
  0x4d   : > { %962 = vperm.xlu1 %4085, %v926_v45   ;;  %958 = vperm.xlu0 %4084, %v1218_v44   ;;  %v4536_v44 = vmax.f32 %v500_v33, 0.0 }
  0x51   : > { %1286 = vperm.xlu1 %4085, %v1220_v46   ;;  %1282 = vperm.xlu0 %4084, %v926_v45  }
  0x55   : > { %970 = vperm.xlu1 %4085, %v928_v47   ;;  %966 = vperm.xlu0 %4084, %v1220_v46  }
  0x59   : > { %1294 = vperm.xlu1 %4085, %v1222_v48   ;;  %1290 = vperm.xlu0 %4084, %v928_v47   ;;  %v4540_v48 = vmax.f32 %v502_v34, 0.0 }
  0x5d   : > { %1534 = vperm.xlu1 %4085, %v1516_v49   ;;  %1530 = vperm.xlu0 %4084, %v1515_v50   ;;  %v4542_v49 = vmax.f32 %v503_v35, 0.0  ;;  %v493_v50 = vmul.f32 %v3526_v36, %v4498_v10 }
  0x61   : > { %1542 = vperm.xlu1 %4085, %v1518_v51   ;;  %1538 = vperm.xlu0 %4084, %v1517_v52  }
  0x65   : > { %1844 = vperm.xlu1 %4085, %v4410_v53   ;;  %1840 = vperm.xlu0 %4084, %v1825_v54  }
  0x69   : > { %1852 = vperm.xlu1 %4085, %v4418_v55   ;;  %1848 = vperm.xlu0 %4084, %v4423_v56  }
  0x6d   : > { %1550 = vperm.xlu1 %4085, %v1520_v57   ;;  %1546 = vperm.xlu0 %4084, %v1519_v58   ;;  %v494_v57 = vmul.f32 %v3527_v38, %v4498_v10  ;;  %v3571_v58 = vld [vmem:[%s4474_s29 + $0x20] sm:$0xff]  }
  0x6e   : > { %v3530_v13 = vunpack.c.l.bf16 %v3571_v58  ;;  %v3531_v16 = vunpack.c.h.bf16 %v3571_v58 }
  0x6f   : > { %v505_v21 = vadd.f32 %v4512_v19, %v494_v57 }
  0x70   : > { %v495_v31 = vmul.f32 %v3530_v13, %v4498_v10  ;;  %v496_v32 = vmul.f32 %v3531_v16, %v4498_v10 }
  0x71   : > { %1860 = vperm.xlu1 %4085, %v4437_v59   ;;  %1856 = vperm.xlu0 %4084, %v4442_v60   ;;  %v4582_v36 = vmax.f32 %v505_v21, 0.0  ;;  %v2430_v21 = vld [vmem:[%s5491_s1 + $0x5d] sm:$0xff] }
  0x75   : > { %1558 = vperm.xlu1 %4085, %v1522_v61   ;;  %1554 = vperm.xlu0 %4084, %v1521_v62  }
  0x79   : > { %1868 = vperm.xlu1 %4085, %v4462_v63   ;;  %1864 = vperm.xlu0 %4084, %v4467_v0  }
  0x7d   : > { %1566 = vperm.xlu1 %4085, %v1524_v1   ;;  %1562 = vperm.xlu0 %4084, %v1523_v2  }
  0x81   : > { %1876 = vperm.xlu1 %4085, %v4487_v6   ;;  %1872 = vperm.xlu0 %4084, %v4492_v7  }
  0x85   : > { %2440 = vperm.xlu1 %4085, %v2422_v14   ;;  %2436 = vperm.xlu0 %4084, %v2421_v15  }
  0x88   : > { %v531_v29 = vpop.permute.xlu1 %530  ;;  %v523_v30 = vpop.permute.xlu0 %522 }
  0x89   : > { %2448 = vperm.xlu1 %4085, %v2424_v23   ;;  %2444 = vperm.xlu0 %4084, %v2423_v24   ;;  %v561_v39 = vrot.slane %v523_v30, 7  ;;  %v564_v45 = vrot.slane %v531_v29, 7  ;;  %v4102_v30 = vld [vmem:[%s5494_s4 + $0xb8] sm:$0xff]  }
  0x8b   : > { %v591_v61 = vmul.f32 %v561_v39, %v509_v37 }
  0x8c   : > { %v535_v40 = vpop.permute.xlu1 %534  ;;  %v527_v42 = vpop.permute.xlu0 %526 }
  0x8d   : > { %v566_v46 = vrot.slane %v535_v40, 7  ;;  %v562_v47 = vrot.slane %v527_v42, 7  ;;  %2168 = vperm.xlu1 %4085, %v4423_v56   ;;  %2164 = vperm.xlu0 %4084, %v4410_v53   ;;  %v4103_v40 = vld [vmem:[%s5494_s4 + $0xf8] sm:$0xff]  }
  0x8f   : > { %v567_v51 = vsel %vm560_vm1, %v564_v45, %v566_v46  ;;  %v563_v52 = vsel %vm560_vm1, %v561_v39, %v562_v47  ;;  %v565_v54 = vsel %vm560_vm1, %v562_v47, %v564_v45  ;;  %v465_v39 = vld [vmem:[%s4474_s29 + $0x28] sm:$0x1]  ;;  %v2428_v47 = vld [vmem:[%s5491_s1 + $0x4d] sm:$0xff] }
  0x90   : > { %v594_v56 = vmul.f32 %v567_v51, %v4532_v41  ;;  %v592_v53 = vmul.f32 %v563_v52, %v4534_v43  ;;  %v593_v62 = vmul.f32 %v565_v54, %v4536_v44  ;;  %v543_v1 = vpop.permute.xlu1 %542  ;;  %v539_v2 = vpop.permute.xlu0 %538 }
  0x91   : > { %v570_v3 = vrot.slane %v543_v1, 7  ;;  %v568_v4 = vrot.slane %v539_v2, 7  ;;  %2176 = vperm.xlu1 %4085, %v4442_v60   ;;  %2172 = vperm.xlu0 %4084, %v4418_v55   ;;  %v504_v60 = vadd.f32 %v4512_v19, %v493_v50  ;;  %v2427_v50 = vld [vmem:[%s5491_s1 + $0x45] sm:$0xff]  ;;  %v4105_v1 = vld [vmem:[%s5494_s4 + $0xf0] sm:$0xff]  }
  0x92   : > { %v602_v8 = vpack.c.bf16 %v592_v53, %v591_v61  ;;  %v4555_v9 = vpack.c.bf16 %v594_v56, %v593_v62  ;;  %v507_v53 = vadd.f32 %v4512_v19, %v496_v32  ;;  %v4104_v62 = vld [vmem:[%s5494_s4 + $0xb0] sm:$0xff]  }
  0x93   : > { %v569_v14 = vsel %vm560_vm1, %v566_v46, %v568_v4  ;;  %v571_v15 = vsel %vm560_vm1, %v568_v4, %v570_v3  ;;  %v4580_v35 = vmax.f32 %v504_v60, 0.0 }
  0x94   : > { %v595_v55 = vmul.f32 %v569_v14, %v4540_v48  ;;  %v596_v17 = vmul.f32 %v571_v15, %v4542_v49  ;;  %v382_v18 = vpop.permute.xlu1 %381  ;;  %v377_v20 = vpop.permute.xlu0 %376  ;;  %v629_v22 = vshll.u32 %v602_v8, 16  ;;  %v634_v25 = vshll.u32 %v4555_v9, 16 }
  0x95   : > { %v425_v23 = vmul.f32 %v4534_v43, %v382_v18  ;;  %v424_v24 = vmul.f32 %v509_v37, %v377_v20  ;;  %2456 = vperm.xlu1 %4085, %v2426_v11   ;;  %2452 = vperm.xlu0 %4084, %v2425_v12   ;;  %v627_v27 = vshrl.u32 %v602_v8, 16  ;;  %v638_v8 = vshrl.u32 %v4555_v9, 16  ;;  %v4106_v9 = vld [vmem:[%s5494_s4 + $0xa8] sm:$0xff]  }
  0x96   : > { %v4571_v26 = vpack.c.bf16 %v596_v17, %v595_v55  ;;  %v631_v28 = vrot.slane %v629_v22, 1  ;;  %v636_v38 = vrot.slane %v634_v25, 1  ;;  %v4627_v16 = vmax.f32 %v507_v53, 0.0  ;;  %v2429_v22 = vld [vmem:[%s5491_s1 + $0x55] sm:$0xff]  ;;  %v4107_v25 = vld [vmem:[%s5494_s4 + $0xe8] sm:$0xff]  }
  0x97   : > { %v434_v29 = vpack.c.bf16 %v425_v23, %v424_v24 }
  0x98   : > { %v4578_v33 = vpop.permute.xlu1 %550  ;;  %v547_v34 = vpop.permute.xlu0 %546  ;;  %v632_v37 = vor.u32 %v631_v28, %v627_v27  ;;  %v642_v51 = vshll.u32 %v4571_v26, 16  ;;  %v640_v55 = vor.u32 %v638_v8, %v636_v38  ;;  %v2734_v8 = vld [vmem:[%s5491_s1 + $0x2e] sm:$0xff] }
  0x99   : > { %v574_v42 = vrot.slane %v4578_v33, 7  ;;  %v572_v45 = vrot.slane %v547_v34, 7  ;;  %2184 = vperm.xlu1 %4085, %v4467_v0   ;;  %2180 = vperm.xlu0 %4084, %v4437_v59   ;;  %v476_v0 = vunpack.c.l.bf16 %v465_v39  ;;  %v506_v59 = vadd.f32 %v4512_v19, %v495_v31  ;;  %v4108_v31 = vld [vmem:[%s5494_s4 + $0xa0] sm:$0xff]  }
  0x9a   : > { %3763 = vmatmul.mubr.bf16.vlgmr.msra.gmra.mxu1 %v434_v29  ;;  %v637_v46 = vsel %vm625_vm2, %v632_v37, %v636_v38  ;;  %v644_v11 = vrot.slane %v642_v51, 1  ;;  %v917_v34 = vld [vmem:[%s4474_s29] sm:$0xe]  ;;  %v646_v39 = vshrl.u32 %v4571_v26, 16 }
  0x9b   : > { %v573_v52 = vsel %vm560_vm1, %v570_v3, %v572_v45  ;;  %v575_v54 = vsel %vm560_vm1, %v572_v45, %v574_v42  ;;  %3727 = vmatmul.mubr.bf16.vlgmr.msra.gmra.mxu0 %v637_v46  ;;  %3766 = vmatprep.mubr.msk.bf16.mxu1 %vm4183_vm0, %v4182_v5  ;;  %v497_v13 = vmul.f32 %v4498_v10, %v476_v0  ;;  %v4625_v60 = vmax.f32 %v506_v59, 0.0  ;;  %v2128_v38 = vld [vmem:[%s5491_s1 + $0x5c] sm:$0xff]  ;;  %v1191_v46 = vld [vmem:[%s4474_s29 + $0x4] sm:$0xe] }
  0x9c   : > { %v597_v57 = vmul.f32 %v573_v52, %v4580_v35  ;;  %v598_v58 = vmul.f32 %v575_v54, %v4582_v36  ;;  %v392_v61 = vpop.permute.xlu1 %391  ;;  %v387_v56 = vpop.permute.xlu0 %386  ;;  %3783 = vmatpush3.bf16.msra.mxu0 %v4102_v30  ;;  %3819 = vmatpush3.bf16.msra.mxu1 %v4103_v40  ;;  %v645_v20 = vsel %vm625_vm2, %v640_v55, %v644_v11  ;;  %v918_v52 = vunpack.c.l.bf16 %v917_v34  ;;  %v4109_v54 = vld [vmem:[%s5494_s4 + $0xe0] sm:$0xff]   ;;  %v2731_v59 = vld [vmem:[%s5491_s1 + $0x16] sm:$0xff] }
  0x9d   : > { %v427_v2 = vmul.f32 %v4532_v41, %v392_v61  ;;  %v426_v3 = vmul.f32 %v4536_v44, %v387_v56  ;;  %2464 = vperm.xlu1 %4085, %v2428_v47   ;;  %2460 = vperm.xlu0 %4084, %v2427_v50   ;;  %v4645_v24 = vadd.f32 %v4512_v19, %v497_v13  ;;  %v2732_v0 = vld [vmem:[%s5491_s1 + $0x1e] sm:$0xff] }
  0x9e   : > { %v4615_v4 = vpack.c.bf16 %v598_v58, %v597_v57  ;;  %3730 = vmatprep.mubr.msk.bf16.mxu0 %vm4183_vm0, %v4182_v5  ;;  %3784 = vmatprep.subr.bf16.mxu0 %v4182_v5  ;;  %v648_v51 = vor.u32 %v646_v39, %v644_v11  ;;  %v4110_v58 = vld [vmem:[%s5494_s4 + $0x98] sm:$0xff]   ;;  %v2733_v11 = vld [vmem:[%s5491_s1 + $0x26] sm:$0xff] }
  0x9f   : > { %v435_v12 = vpack.c.bf16 %v427_v2, %v426_v3  ;;  %3820 = vmatprep.subr.bf16.mxu1 %v4182_v5  ;;  %v929_v2 = vmul.f32 %v4498_v10, %v918_v52  ;;  %v4111_v3 = vld [vmem:[%s5494_s4 + $0xd8] sm:$0xff]  }
  0xa0   : > { %v4623_v14 = vpop.permute.xlu1 %558  ;;  %v555_v15 = vpop.permute.xlu0 %554  ;;  %3785 = vmatpush3.bf16.msra.mxu0 %v4104_v62  ;;  %3821 = vmatpush3.bf16.msra.mxu1 %v4105_v1  ;;  %v650_v23 = vshll.u32 %v4615_v4, 16 }
  0xa1   : > { %v578_v17 = vrot.slane %v4623_v14, 7  ;;  %v576_v18 = vrot.slane %v555_v15, 7  ;;  %2192 = vperm.xlu1 %4085, %v4492_v7   ;;  %2188 = vperm.xlu0 %4084, %v4462_v63   ;;  %v4112_v15 = vld [vmem:[%s5494_s4 + $0x90] sm:$0xff]  }
  0xa2   : > { %3767 = vmatmul.mubr.bf16.gmra.mxu1 %v435_v12  ;;  %3786 = vmatprep.subr.bf16.mxu0 %v4182_v5  ;;  %v652_v40 = vrot.slane %v650_v23, 1  ;;  %v654_v12 = vshrl.u32 %v4615_v4, 16 }
  0xa3   : > { %v577_v63 = vsel %vm560_vm1, %v574_v42, %v576_v18  ;;  %v579_v7 = vsel %vm560_vm1, %v576_v18, %v578_v17  ;;  %3731 = vmatmul.mubr.bf16.gmra.mxu0 %v645_v20  ;;  %3770 = vmatprep.mubr.msk.bf16.mxu1 %vm4183_vm0, %v4182_v5  ;;  %v519_v42 = vmax.f32 %v4645_v24, 0.0  ;;  %v930_v20 = vadd.f32 %v4512_v19, %v929_v2 }
  0xa4   : > { %v599_v27 = vmul.f32 %v577_v63, %v4625_v60  ;;  %v600_v28 = vmul.f32 %v579_v7, %v4627_v16  ;;  %v402_v29 = vpop.permute.xlu1 %401  ;;  %v397_v30 = vpop.permute.xlu0 %396  ;;  %3787 = vmatpush3.bf16.msra.mxu0 %v4106_v9  ;;  %3734 = vmatprep.mubr.msk.bf16.mxu0 %vm4183_vm0, %v4182_v5  ;;  %v653_v26 = vsel %vm625_vm2, %v648_v51, %v652_v40  ;;  %v2736_v63 = vld [vmem:[%s5491_s1 + $0x3e] sm:$0xff]  ;;  %v2735_v7 = vld [vmem:[%s5491_s1 + $0x36] sm:$0xff] }
  0xa5   : > { %v429_v32 = vmul.f32 %v4542_v49, %v402_v29  ;;  %v428_v33 = vmul.f32 %v4540_v48, %v397_v30  ;;  %2472 = vperm.xlu1 %4085, %v2430_v21   ;;  %2468 = vperm.xlu0 %4084, %v2429_v22   ;;  %v601_v61 = vmul.f32 %v578_v17, %v519_v42 }
  0xa6   : > { %v4664_v37 = vpack.c.bf16 %v600_v28, %v599_v27  ;;  %3822 = vmatprep.subr.bf16.mxu1 %v4182_v5  ;;  %3788 = vmatprep.subr.bf16.mxu0 %v4182_v5  ;;  %v656_v21 = vor.u32 %v654_v12, %v652_v40  ;;  %v4113_v27 = vld [vmem:[%s5494_s4 + $0xd0] sm:$0xff]   ;;  %v4117_v12 = vld [vmem:[%s5494_s4 + $0xc0] sm:$0xff]  }
  0xa7   : > { %v436_v45 = vpack.c.bf16 %v429_v32, %v428_v33  ;;  %3823 = vmatpush3.bf16.msra.mxu1 %v4107_v25  ;;  %v607_v55 = vpack.c.bf16 %v601_v61, %v601_v61  ;;  %v931_v32 = vmax.f32 %v930_v20, 0.0 }
  0xa8   : > { %v412_v47 = vpop.permute.xlu1 %411  ;;  %v407_v50 = vpop.permute.xlu0 %406  ;;  %3789 = vmatpush3.bf16.msra.mxu0 %v4108_v31  ;;  %3824 = vmatprep.subr.bf16.mxu1 %v4182_v5  ;;  %v658_v57 = vshll.u32 %v4664_v37, 16  ;;  %v4114_v31 = vld [vmem:[%s5494_s4 + $0x88] sm:$0xff]  }
  0xa9   : > { %2200 = vperm.xlu1 %4085, %v2128_v38   ;;  %2196 = vperm.xlu0 %4084, %v4487_v6   ;;  %v1202_v6 = vunpack.c.l.bf16 %v1191_v46  ;;  %v431_v56 = vmul.f32 %v4582_v36, %v412_v47  ;;  %v430_v53 = vmul.f32 %v4580_v35, %v407_v50  ;;  %v666_v28 = vshll.u32 %v607_v55, 16  ;;  %v2738_v47 = vld [vmem:[%s5491_s1 + $0x4e] sm:$0xff]  ;;  %v2737_v50 = vld [vmem:[%s5491_s1 + $0x46] sm:$0xff] }
  0xaa   : > { %3771 = vmatmul.mubr.bf16.gmra.mxu1 %v436_v45  ;;  %3790 = vmatprep.subr.bf16.mxu0 %v4182_v5  ;;  %v660_v13 = vrot.slane %v658_v57, 1  ;;  %v662_v38 = vshrl.u32 %v4664_v37, 16 }
  0xab   : > { %3735 = vmatmul.mubr.bf16.gmra.mxu0 %v653_v26  ;;  %3774 = vmatprep.mubr.msk.bf16.mxu1 %vm4183_vm0, %v4182_v5  ;;  %v1223_v14 = vmul.f32 %v4498_v10, %v1202_v6  ;;  %v437_v9 = vpack.c.bf16 %v431_v56, %v430_v53  ;;  %v668_v37 = vrot.slane %v666_v28, 1  ;;  %v4116_v53 = vld [vmem:[%s5494_s4 + $0x80] sm:$0xff]  }
  0xac   : > { %v422_v62 = vpop.permute.xlu1 %421  ;;  %v417_v1 = vpop.permute.xlu0 %416  ;;  %3825 = vmatpush3.bf16.msra.mxu1 %v4109_v54  ;;  %3738 = vmatprep.mubr.msk.bf16.mxu0 %vm4183_vm0, %v4182_v5  ;;  %v661_v23 = vsel %vm625_vm2, %v656_v21, %v660_v13  ;;  %v664_v51 = vor.u32 %v662_v38, %v660_v13 }
  0xad   : > { %2750 = vperm.xlu1 %4085, %v2732_v0   ;;  %2746 = vperm.xlu0 %4084, %v2731_v59   ;;  %v4725_v25 = vadd.f32 %v4512_v19, %v1223_v14  ;;  %v433_v29 = vmul.f32 %v4627_v16, %v422_v62  ;;  %v432_v30 = vmul.f32 %v4625_v60, %v417_v1  ;;  %v4115_v0 = vld [vmem:[%s5494_s4 + $0xc8] sm:$0xff]  }
  0xae   : > { %3791 = vmatpush3.bf16.msra.mxu0 %v4110_v58  ;;  %3826 = vmatprep.subr.bf16.mxu1 %v4182_v5 }
  0xaf   : > { %3792 = vmatprep.subr.bf16.mxu0 %v4182_v5  ;;  %v1245_v46 = vmax.f32 %v4725_v25, 0.0  ;;  %v438_v52 = vpack.c.bf16 %v433_v29, %v432_v30  ;;  %v4118_v29 = vld [vmem:[%s5494_s4 + $0x138] sm:$0xff]  }
  0xb0   : > { %v939_v17 = vpop.permute.xlu1 %938  ;;  %v935_v18 = vpop.permute.xlu0 %934  ;;  %3827 = vmatpush3.bf16.msra.mxu1 %v4111_v3  ;;  %v2740_v3 = vld [vmem:[%s5491_s1 + $0x5e] sm:$0xff] }
  0xb1   : > { %v974_v4 = vrot.slane %v939_v17, 6  ;;  %v973_v22 = vrot.slane %v935_v18, 6  ;;  %2758 = vperm.xlu1 %4085, %v2734_v8   ;;  %2754 = vperm.xlu0 %4084, %v2733_v11   ;;  %v2739_v8 = vld [vmem:[%s5491_s1 + $0x56] sm:$0xff] }
  0xb2   : > { %3775 = vmatmul.mubr.bf16.gmra.mxu1 %v437_v9  ;;  %3793 = vmatpush3.bf16.msra.mxu0 %v4112_v15 }
  0xb3   : > { %3739 = vmatmul.mubr.bf16.gmra.mxu0 %v661_v23  ;;  %3778 = vmatprep.mubr.msk.bf16.mxu1 %vm4183_vm0, %v4182_v5  ;;  %v975_v39 = vsel %vm972_vm3, %v973_v22, %v974_v4  ;;  %v1003_v59 = vmul.f32 %v973_v22, %v931_v32 }
  0xb4   : > { %v4737_v33 = vpop.permute.xlu1 %946  ;;  %v943_v34 = vpop.permute.xlu0 %942  ;;  %3828 = vmatprep.subr.bf16.mxu1 %v4182_v5  ;;  %3742 = vmatprep.mubr.msk.bf16.mxu0 %vm4183_vm0, %v4182_v5  ;;  %v1004_v57 = vmul.f32 %v975_v39, %v4534_v43  ;;  %v669_v43 = vsel %vm625_vm2, %v664_v51, %v668_v37 }
  0xb5   : > { %v978_v40 = vrot.slane %v4737_v33, 6  ;;  %v976_v45 = vrot.slane %v943_v34, 6  ;;  %2766 = vperm.xlu1 %4085, %v2736_v63   ;;  %2762 = vperm.xlu0 %4084, %v2735_v7   ;;  %v4119_v33 = vld [vmem:[%s5494_s4 + $0x178] sm:$0xff]  }
  0xb6   : > { %3829 = vmatpush3.bf16.msra.mxu1 %v4113_v27  ;;  %3794 = vmatprep.subr.bf16.mxu0 %v4182_v5  ;;  %v1014_v13 = vpack.c.bf16 %v1004_v57, %v1003_v59 }
  0xb7   : > { %v977_v54 = vsel %vm972_vm3, %v974_v4, %v976_v45  ;;  %v979_v26 = vsel %vm972_vm3, %v976_v45, %v978_v40  ;;  %3795 = vmatpush3.bf16.msra.mxu0 %v4114_v31  ;;  %3830 = vmatprep.subr.bf16.mxu1 %v4182_v5 }
  0xb8   : > { %v1005_v58 = vmul.f32 %v977_v54, %v4536_v44  ;;  %v1006_v6 = vmul.f32 %v979_v26, %v4532_v41  ;;  %v1263_v61 = vpop.permute.xlu1 %1262  ;;  %v1259_v56 = vpop.permute.xlu0 %1258  ;;  %3796 = vmatprep.subr.bf16.mxu0 %v4182_v5  ;;  %v1044_v22 = vrot.slane %v1014_v13, 1 }
  0xb9   : > { %v1297_v62 = vrot.slane %v1263_v61, 6  ;;  %v1296_v1 = vrot.slane %v1259_v56, 6  ;;  %2774 = vperm.xlu1 %4085, %v2738_v47   ;;  %2770 = vperm.xlu0 %4084, %v2737_v50   ;;  %v1201_v61 = vld [vmem:[%s4474_s29 + $0x2c] sm:$0x1] }
  0xba   : > { %v1015_v2 = vpack.c.bf16 %v1006_v6, %v1005_v58  ;;  %3779 = vmatmul.mubr.bf16.gmra.mxu1 %v438_v52 }
  0xbb   : > { %v1298_v11 = vsel %vm972_vm3, %v1296_v1, %v1297_v62  ;;  %3743 = vmatmul.mubr.bf16.gmra.mxu0 %v669_v43  ;;  %3831 = vmatpush3.bf16.msra.mxu1 %v4115_v0  ;;  %v1326_v14 = vmul.f32 %v1296_v1, %v1245_v46  ;;  %v1200_v0 = vld [vmem:[%s4474_s29 + $0x28] sm:$0xf]  ;;  %v4121_v43 = vld [vmem:[%s5494_s4 + $0x170] sm:$0xff]  }
  0xbc   : > { %v1327_v15 = vmul.f32 %v1298_v11, %v4536_v44  ;;  %v1271_v55 = vpop.permute.xlu1 %1270  ;;  %v1267_v9 = vpop.permute.xlu0 %1266  ;;  %3797 = vmatpush3.bf16.msra.mxu0 %v4116_v53  ;;  %3798 = vmatprep.mubr.msk.bf16.mxu0 %vm4183_vm0, %v4182_v5  ;;  %v1045_v20 = vrot.slane %v1015_v2, 1 }
  0xbd   : > { %v1301_v17 = vrot.slane %v1271_v55, 6  ;;  %v1299_v18 = vrot.slane %v1267_v9, 6  ;;  %2782 = vperm.xlu1 %4085, %v2740_v3   ;;  %2778 = vperm.xlu0 %4084, %v2739_v8   ;;  %v4122_v3 = vld [vmem:[%s5494_s4 + $0x128] sm:$0xff]   ;;  %v1211_v8 = vunpack.c.l.bf16 %v1200_v0 }
  0xbe   : > { %3832 = vmatprep.subr.bf16.mxu1 %v4182_v5  ;;  %3834 = vmatprep.mubr.msk.bf16.mxu1 %vm4183_vm0, %v4182_v5  ;;  %v1337_v23 = vpack.c.bf16 %v1327_v15, %v1326_v14  ;;  %v1046_v34 = vsel %vm1043_vm4, %v1044_v22, %v1045_v20  ;;  %v1212_v15 = vunpack.c.l.bf16 %v1201_v61 }
  0xbf   : > { %v1300_v21 = vsel %vm972_vm3, %v1297_v62, %v1299_v18  ;;  %v1302_v4 = vsel %vm972_vm3, %v1299_v18, %v1301_v17  ;;  %3833 = vmatpush3.bf16.msra.mxu1 %v4117_v12  ;;  %3854 = vmatprep.subr.bf16.mxu0 %v4182_v5 }
  0xc0   : > { %v1328_v63 = vmul.f32 %v1300_v21, %v4532_v41  ;;  %v1329_v7 = vmul.f32 %v1302_v4, %v4540_v48  ;;  %v955_v27 = vpop.permute.xlu1 %954  ;;  %v951_v28 = vpop.permute.xlu0 %950  ;;  %3890 = vmatprep.subr.bf16.mxu1 %v4182_v5  ;;  %v1366_v45 = vrot.slane %v1337_v23, 1  ;;  %v1232_v23 = vmul.f32 %v4498_v10, %v1211_v8  ;;  %v4128_v8 = vld [vmem:[%s5494_s4 + $0x110] sm:$0xff]  }
  0xc1   : > { %v982_v30 = vrot.slane %v955_v27, 6  ;;  %v980_v31 = vrot.slane %v951_v28, 6  ;;  %v4124_v27 = vld [vmem:[%s5494_s4 + $0x120] sm:$0xff]  }
  0xc2   : > { %v1338_v32 = vpack.c.bf16 %v1329_v7, %v1328_v63 }
  0xc3   : > { %v981_v38 = vsel %vm972_vm3, %v978_v40, %v980_v31  ;;  %v983_v39 = vsel %vm972_vm3, %v980_v31, %v982_v30  ;;  %3799 = vmatmul.mubr.bf16.vlgmr.msra.gmra.mxu0 %v1046_v34  ;;  %v4120_v40 = vld [vmem:[%s5494_s4 + $0x130] sm:$0xff]  }
  0xc4   : > { %v1367_v47 = vrot.slane %v1338_v32, 1  ;;  %v1007_v50 = vmul.f32 %v981_v38, %v4540_v48  ;;  %v1008_v51 = vmul.f32 %v983_v39, %v4542_v49  ;;  %v1279_v37 = vpop.permute.xlu1 %1278  ;;  %v1275_v52 = vpop.permute.xlu0 %1274  ;;  %3855 = vmatpush3.bf16.msra.mxu0 %v4118_v29  ;;  %3802 = vmatprep.mubr.msk.bf16.mxu0 %vm4183_vm0, %v4182_v5 }
  0xc5   : > { %v1305_v54 = vrot.slane %v1279_v37, 6  ;;  %v1303_v26 = vrot.slane %v1275_v52, 6  ;;  %3856 = vmatprep.subr.bf16.mxu0 %v4182_v5  ;;  %v1823_v37 = vld [vmem:[%s4474_s29 + $0x4] sm:$0xc] }
  0xc6   : > { %v1368_v59 = vsel %vm1043_vm4, %v1366_v45, %v1367_v47  ;;  %v1016_v57 = vpack.c.bf16 %v1008_v51, %v1007_v50  ;;  %v4125_v51 = vld [vmem:[%s5494_s4 + $0x160] sm:$0xff]  }
  0xc7   : > { %v1304_v58 = vsel %vm972_vm3, %v1301_v17, %v1303_v26  ;;  %v1306_v6 = vsel %vm972_vm3, %v1303_v26, %v1305_v54  ;;  %3835 = vmatmul.mubr.bf16.vlgmr.msra.gmra.mxu1 %v1368_v59 }
  0xc8   : > { %v1330_v56 = vmul.f32 %v1304_v58, %v4542_v49  ;;  %v1331_v53 = vmul.f32 %v1306_v6, %v4580_v35  ;;  %v963_v62 = vpop.permute.xlu1 %962  ;;  %v959_v1 = vpop.permute.xlu0 %958  ;;  %3891 = vmatpush3.bf16.msra.mxu1 %v4119_v33  ;;  %v1047_v2 = vrot.slane %v1016_v57, 1  ;;  %3857 = vmatpush3.bf16.msra.mxu0 %v4120_v40  ;;  %v4126_v40 = vld [vmem:[%s5494_s4 + $0x118] sm:$0xff]   ;;  %v1824_v58 = vunpack.c.l.bf16 %v1823_v37 }
  0xc9   : > { %v986_v11 = vrot.slane %v963_v62, 6  ;;  %v984_v12 = vrot.slane %v959_v1, 6  ;;  %3892 = vmatprep.subr.bf16.mxu1 %v4182_v5  ;;  %3838 = vmatprep.mubr.msk.bf16.mxu1 %vm4183_vm0, %v4182_v5 }
  0xca   : > { %v1048_v13 = vsel %vm1043_vm4, %v1045_v20, %v1047_v2  ;;  %v1339_v14 = vpack.c.bf16 %v1331_v53, %v1330_v56  ;;  %3858 = vmatprep.subr.bf16.mxu0 %v4182_v5  ;;  %v4123_v20 = vld [vmem:[%s5494_s4 + $0x168] sm:$0xff]  }
  0xcb   : > { %v985_v55 = vsel %vm972_vm3, %v982_v30, %v984_v12  ;;  %v987_v9 = vsel %vm972_vm3, %v984_v12, %v986_v11  ;;  %3803 = vmatmul.mubr.bf16.gmra.mxu0 %v1048_v13  ;;  %v1233_v30 = vmul.f32 %v4498_v10, %v1212_v15 }
  0xcc   : > { %v1009_v17 = vmul.f32 %v985_v55, %v4580_v35  ;;  %v1010_v18 = vmul.f32 %v987_v9, %v4582_v36  ;;  %v4840_v21 = vpop.permute.xlu1 %1286  ;;  %v1283_v4 = vpop.permute.xlu0 %1282  ;;  %3893 = vmatpush3.bf16.msra.mxu1 %v4121_v43  ;;  %v1369_v22 = vrot.slane %v1339_v14, 1  ;;  %3859 = vmatpush3.bf16.msra.mxu0 %v4122_v3  ;;  %v1835_v9 = vmul.f32 %v4498_v10, %v1824_v58  ;;  %v4130_v10 = vld [vmem:[%s5494_s4 + $0x108] sm:$0xff]   ;;  %v4133_v58 = vld [vmem:[%s5494_s4 + $0x140] sm:$0xff]  }
  0xcd   : > { %v1309_v63 = vrot.slane %v4840_v21, 6  ;;  %v1307_v7 = vrot.slane %v1283_v4, 6  ;;  %3806 = vmatprep.mubr.msk.bf16.mxu0 %vm4183_vm0, %v4182_v5  ;;  %3894 = vmatprep.subr.bf16.mxu1 %v4182_v5  ;;  %v1244_v26 = vadd.f32 %v4512_v19, %v1233_v30  ;;  %v4129_v4 = vld [vmem:[%s5494_s4 + $0x150] sm:$0xff]  }
  0xce   : > { %v1370_v28 = vsel %vm1043_vm4, %v1367_v47, %v1369_v22  ;;  %v1017_v29 = vpack.c.bf16 %v1010_v18, %v1009_v17  ;;  %3860 = vmatprep.subr.bf16.mxu0 %v4182_v5  ;;  %v1243_v47 = vadd.f32 %v4512_v19, %v1232_v23  ;;  %v1836_v30 = vadd.f32 %v4512_v19, %v1835_v9  ;;  %v4132_v19 = vld [vmem:[%s5494_s4 + $0x100] sm:$0xff]  }
  0xcf   : > { %v1308_v31 = vsel %vm972_vm3, %v1305_v54, %v1307_v7  ;;  %v1310_v32 = vsel %vm972_vm3, %v1307_v7, %v1309_v63  ;;  %3839 = vmatmul.mubr.bf16.gmra.mxu1 %v1370_v28  ;;  %v1255_v12 = vmax.f32 %v1244_v26, 0.0 }
  0xd0   : > { %v1332_v34 = vmul.f32 %v1308_v31, %v4582_v36  ;;  %v1333_v38 = vmul.f32 %v1310_v32, %v4625_v60  ;;  %v971_v39 = vpop.permute.xlu1 %970  ;;  %v967_v45 = vpop.permute.xlu0 %966  ;;  %v1049_v50 = vrot.slane %v1017_v29, 1  ;;  %3895 = vmatpush3.bf16.msra.mxu1 %v4123_v20  ;;  %3842 = vmatprep.mubr.msk.bf16.mxu1 %vm4183_vm0, %v4182_v5  ;;  %v4878_v62 = vmax.f32 %v1243_v47, 0.0 }
  0xd1   : > { %v990_v52 = vrot.slane %v971_v39, 6  ;;  %v988_v33 = vrot.slane %v967_v45, 6  ;;  %3861 = vmatpush3.bf16.msra.mxu0 %v4124_v27  ;;  %3896 = vmatprep.subr.bf16.mxu1 %v4182_v5  ;;  %v4131_v39 = vld [vmem:[%s5494_s4 + $0x148] sm:$0xff]  }
  0xd2   : > { %v1050_v54 = vsel %vm1043_vm4, %v1047_v2, %v1049_v50  ;;  %v1340_v0 = vpack.c.bf16 %v1333_v38, %v1332_v34  ;;  %3862 = vmatprep.subr.bf16.mxu0 %v4182_v5  ;;  %v4127_v2 = vld [vmem:[%s5494_s4 + $0x158] sm:$0xff]  }
  0xd3   : > { %v989_v59 = vsel %vm972_vm3, %v986_v11, %v988_v33  ;;  %v991_v57 = vsel %vm972_vm3, %v988_v33, %v990_v52  ;;  %3807 = vmatmul.mubr.bf16.gmra.mxu0 %v1050_v54  ;;  %v1013_v11 = vmul.f32 %v990_v52, %v519_v42  ;;  %v1837_v33 = vmax.f32 %v1836_v30, 0.0 }
  0xd4   : > { %v1011_v6 = vmul.f32 %v989_v59, %v4625_v60  ;;  %v1012_v61 = vmul.f32 %v991_v57, %v4627_v16  ;;  %v1295_v56 = vpop.permute.xlu1 %1294  ;;  %v1291_v53 = vpop.permute.xlu0 %1290  ;;  %v1371_v1 = vrot.slane %v1340_v0, 1  ;;  %3897 = vmatpush3.bf16.msra.mxu1 %v4125_v51  ;;  %3810 = vmatprep.mubr.msk.bf16.mxu0 %vm4183_vm0, %v4182_v5 }
  0xd5   : > { %v1313_v43 = vrot.slane %v1295_v56, 6  ;;  %v1311_v3 = vrot.slane %v1291_v53, 6  ;;  %3863 = vmatpush3.bf16.msra.mxu0 %v4126_v40  ;;  %3898 = vmatprep.subr.bf16.mxu1 %v4182_v5  ;;  %v1019_v23 = vpack.c.bf16 %v1013_v11, %v1013_v11 }
  0xd6   : > { %v1372_v13 = vsel %vm1043_vm4, %v1369_v22, %v1371_v1  ;;  %v1018_v14 = vpack.c.bf16 %v1012_v61, %v1011_v6  ;;  %3864 = vmatprep.subr.bf16.mxu0 %v4182_v5 }
  0xd7   : > { %v1312_v15 = vsel %vm972_vm3, %v1309_v63, %v1311_v3  ;;  %v1314_v55 = vsel %vm972_vm3, %v1311_v3, %v1313_v43  ;;  %3843 = vmatmul.mubr.bf16.gmra.mxu1 %v1372_v13  ;;  %v1336_v63 = vmul.f32 %v1313_v43, %v1255_v12  ;;  %v1053_v45 = vrot.slane %v1019_v23, 1 }
  0xd8   : > { %v1334_v17 = vmul.f32 %v1312_v15, %v4627_v16  ;;  %v1335_v18 = vmul.f32 %v1314_v55, %v4878_v62  ;;  %v1535_v21 = vpop.permute.xlu1 %1534  ;;  %v1531_v24 = vpop.permute.xlu0 %1530  ;;  %v1051_v42 = vrot.slane %v1018_v14, 1  ;;  %3899 = vmatpush3.bf16.msra.mxu1 %v4127_v2  ;;  %3846 = vmatprep.mubr.msk.bf16.mxu1 %vm4183_vm0, %v4182_v5 }
  0xd9   : > { %v1570_v22 = vrot.slane %v1535_v21, 5  ;;  %v1569_v20 = vrot.slane %v1531_v24, 5  ;;  %3865 = vmatpush3.bf16.msra.mxu0 %v4128_v8  ;;  %3900 = vmatprep.subr.bf16.mxu1 %v4182_v5 }
  0xda   : > { %v1052_v7 = vsel %vm1043_vm4, %v1049_v50, %v1051_v42  ;;  %v1341_v27 = vpack.c.bf16 %v1335_v18, %v1334_v17  ;;  %3866 = vmatprep.subr.bf16.mxu0 %v4182_v5  ;;  %v1342_v50 = vpack.c.bf16 %v1336_v63, %v1336_v63 }
  0xdb   : > { %v1571_v28 = vsel %vm1568_vm5, %v1569_v20, %v1570_v22  ;;  %v1599_v29 = vmul.f32 %v1569_v20, %v1245_v46  ;;  %3811 = vmatmul.mubr.bf16.gmra.mxu0 %v1052_v7  ;;  %v4134_v7 = vld [vmem:[%s5494_s4 + $0x1b8] sm:$0xff]  }
  0xdc   : > { %v1600_v31 = vmul.f32 %v1571_v28, %v4536_v44  ;;  %v4914_v32 = vpop.permute.xlu1 %1542  ;;  %v1539_v34 = vpop.permute.xlu0 %1538  ;;  %v1373_v38 = vrot.slane %v1341_v27, 1  ;;  %3814 = vmatprep.mubr.msk.bf16.mxu0 %vm4183_vm0, %v4182_v5  ;;  %3901 = vmatpush3.bf16.msra.mxu1 %v4129_v4  ;;  %v1375_v56 = vrot.slane %v1342_v50, 1  ;;  %v1513_v27 = vld [vmem:[%s4474_s29 + $0x2c] sm:$0x3] }
  0xdd   : > { %v1574_v25 = vrot.slane %v4914_v32, 5  ;;  %v1572_v46 = vrot.slane %v1539_v34, 5  ;;  %3867 = vmatpush3.bf16.msra.mxu0 %v4130_v10  ;;  %3902 = vmatprep.subr.bf16.mxu1 %v4182_v5  ;;  %v4135_v32 = vld [vmem:[%s5494_s4 + $0x1f8] sm:$0xff]  }
  0xde   : > { %v1610_v47 = vpack.c.bf16 %v1600_v31, %v1599_v29  ;;  %v1374_v51 = vsel %vm1043_vm4, %v1371_v1, %v1373_v38  ;;  %3868 = vmatprep.subr.bf16.mxu0 %v4182_v5  ;;  %v1054_v1 = vsel %vm1043_vm4, %v1051_v42, %v1053_v45  ;;  %v1376_v21 = vsel %vm1043_vm4, %v1373_v38, %v1375_v56  ;;  %v2097_v31 = vld [vmem:[%s4474_s29 + $0x8] sm:$0xc] }
  0xdf   : > { %v1573_v37 = vsel %vm1568_vm5, %v1570_v22, %v1572_v46  ;;  %v1575_v52 = vsel %vm1568_vm5, %v1572_v46, %v1574_v25  ;;  %3847 = vmatmul.mubr.bf16.gmra.mxu1 %v1374_v51  ;;  %v1514_v38 = vunpack.c.l.bf16 %v1513_v27  ;;  %v2098_v51 = vld [vmem:[%s4474_s29 + $0xc] sm:$0xf]  ;;  %v4140_v27 = vld [vmem:[%s5494_s4 + $0x1a0] sm:$0xff]  }
  0xe0   : > { %v1635_v40 = vshrl.u32 %v1610_v47, 16  ;;  %v1638_v54 = vshll.u32 %v1610_v47, 16  ;;  %v1601_v26 = vmul.f32 %v1573_v37, %v4532_v41  ;;  %v1602_v0 = vmul.f32 %v1575_v52, %v4540_v48  ;;  %v1845_v59 = vpop.permute.xlu1 %1844  ;;  %v1841_v57 = vpop.permute.xlu0 %1840  ;;  %3850 = vmatprep.mubr.msk.bf16.mxu1 %vm4183_vm0, %v4182_v5  ;;  %3903 = vmatpush3.bf16.msra.mxu1 %v4131_v39 }
  0xe1   : > { %v1880_v6 = vrot.slane %v1845_v59, 4  ;;  %v1879_v61 = vrot.slane %v1841_v57, 4  ;;  %3869 = vmatpush3.bf16.msra.mxu0 %v4132_v19  ;;  %3904 = vmatprep.subr.bf16.mxu1 %v4182_v5  ;;  %v4991_v59 = vld [vmem:[%s5492_s2] ss:$0 sm:$0xff] }
  0xe2   : > { %v1611_v53 = vpack.c.bf16 %v1602_v0, %v1601_v26  ;;  %3926 = vmatprep.subr.bf16.mxu0 %v4182_v5  ;;  %v1637_v2 = vrot.slane %v1635_v40, 1  ;;  %v1640_v43 = vrot.slane %v1638_v54, 2  ;;  %v1525_v57 = vmul.f32 %v4991_v59, %v1514_v38 }
  0xe3   : > { %v1881_v3 = vsel %vm1878_vm6, %v1879_v61, %v1880_v6  ;;  %3815 = vmatmul.mubr.bf16.gmra.mxu0 %v1054_v1  ;;  %v1909_v12 = vmul.f32 %v1879_v61, %v1837_v33  ;;  %v2108_v33 = vunpack.c.l.bf16 %v2097_v31 }
  0xe4   : > { %v1643_v8 = vshrl.u32 %v1611_v53, 16  ;;  %v1646_v11 = vshll.u32 %v1611_v53, 16  ;;  %v1910_v13 = vmul.f32 %v1881_v3, %v4536_v44  ;;  %v1853_v14 = vpop.permute.xlu1 %1852  ;;  %v1849_v15 = vpop.permute.xlu0 %1848  ;;  %3870 = vmatprep.mubr.msk.bf16.mxu0 %vm4183_vm0, %v4182_v5  ;;  %3905 = vmatpush3.bf16.msra.mxu1 %v4133_v58  ;;  %v1641_v24 = vor.u32 %v1640_v43, %v1637_v2  ;;  %v4137_v2 = vld [vmem:[%s5494_s4 + $0x1f0] sm:$0xff]  }
  0xe5   : > { %v1884_v55 = vrot.slane %v1853_v14, 4  ;;  %v1882_v9 = vrot.slane %v1849_v15, 4  ;;  %3962 = vmatprep.subr.bf16.mxu1 %v4182_v5  ;;  %v2109_v58 = vunpack.c.l.bf16 %v2098_v51  ;;  %v5069_v51 = vld [vmem:[%s4474_s29 + $0x18] sm:$0xff]  }
  0xe6   : > { %v1645_v17 = vrot.slane %v1643_v8, 1  ;;  %v1648_v18 = vrot.slane %v1646_v11, 2  ;;  %v1920_v4 = vpack.c.bf16 %v1910_v13, %v1909_v12  ;;  %v4138_v8 = vld [vmem:[%s5494_s4 + $0x1a8] sm:$0xff]  }
  0xe7   : > { %v1883_v42 = vsel %vm1878_vm6, %v1880_v6, %v1882_v9  ;;  %v1885_v44 = vsel %vm1878_vm6, %v1882_v9, %v1884_v55  ;;  %3851 = vmatmul.mubr.bf16.gmra.mxu1 %v1376_v21  ;;  %v4995_v6 = vld [vmem:[%s4474_s29 + $0x10] sm:$0xff]   ;;  %v2130_v21 = vmul.f32 %v4991_v59, %v2109_v58 }
  0xe8   : > { %v1911_v22 = vmul.f32 %v1883_v42, %v4532_v41  ;;  %v1912_v20 = vmul.f32 %v1885_v44, %v4540_v48  ;;  %v1551_v10 = vpop.permute.xlu1 %1550  ;;  %v1547_v23 = vpop.permute.xlu0 %1546  ;;  %v4952_v63 = vor.u32 %v1648_v18, %v1645_v17  ;;  %3906 = vmatprep.mubr.msk.bf16.mxu1 %vm4183_vm0, %v4182_v5  ;;  %v1950_v39 = vrot.slane %v1920_v4, 2  ;;  %v5021_v17 = vld [vmem:[%s5493_s3] ss:$0 sm:$0xff] }
  0xe9   : > { %v1578_v28 = vrot.slane %v1551_v10, 5  ;;  %v1576_v29 = vrot.slane %v1547_v23, 5  ;;  %v3550_v15 = vunpack.c.l.bf16 %v4995_v6  ;;  %v5024_v18 = vadd.f32 %v5021_v17, %v1525_v57  ;;  %v4139_v10 = vld [vmem:[%s5494_s4 + $0x1e8] sm:$0xff]  }
  0xea   : > { %v1921_v30 = vpack.c.bf16 %v1912_v20, %v1911_v22  ;;  %v1650_v41 = vsel %vm1633_vm7, %v1641_v24, %v4952_v63 }
  0xeb   : > { %v1577_v48 = vsel %vm1568_vm5, %v1574_v25, %v1576_v29  ;;  %v1579_v34 = vsel %vm1568_vm5, %v1576_v29, %v1578_v28  ;;  %3871 = vmatmul.mubr.bf16.vlgmr.msra.gmra.mxu0 %v1650_v41  ;;  %v4136_v25 = vld [vmem:[%s5494_s4 + $0x1b0] sm:$0xff]   ;;  %v3551_v29 = vunpack.c.h.bf16 %v4995_v6 }
  0xec   : > { %v4967_v46 = vrot.slane %v1921_v30, 2  ;;  %v1603_v19 = vmul.f32 %v1577_v48, %v4542_v49  ;;  %v1604_v45 = vmul.f32 %v1579_v34, %v4580_v35  ;;  %v4971_v50 = vpop.permute.xlu1 %1860  ;;  %v1857_v47 = vpop.permute.xlu0 %1856  ;;  %3927 = vmatpush3.bf16.msra.mxu0 %v4134_v7  ;;  %3874 = vmatprep.mubr.msk.bf16.mxu0 %vm4183_vm0, %v4182_v5  ;;  %v2131_v48 = vmul.f32 %v4991_v59, %v3550_v15 }
  0xed   : > { %v1888_v37 = vrot.slane %v4971_v50, 4  ;;  %v1886_v52 = vrot.slane %v1857_v47, 4  ;;  %3928 = vmatprep.subr.bf16.mxu0 %v4182_v5 }
  0xee   : > { %v1612_v40 = vpack.c.bf16 %v1604_v45, %v1603_v19  ;;  %v1952_v54 = vsel %vm1949_vm8, %v1950_v39, %v4967_v46  ;;  %v1527_v39 = vmax.f32 %v5024_v18, 0.0  ;;  %v2141_v19 = vadd.f32 %v5021_v17, %v2130_v21 }
  0xef   : > { %v1887_v26 = vsel %vm1878_vm6, %v1884_v55, %v1886_v52  ;;  %v1889_v0 = vsel %vm1878_vm6, %v1886_v52, %v1888_v37  ;;  %3907 = vmatmul.mubr.bf16.vlgmr.msra.gmra.mxu1 %v1952_v54 }
  0xf0   : > { %v1913_v61 = vmul.f32 %v1887_v26, %v4542_v49  ;;  %v1914_v56 = vmul.f32 %v1889_v0, %v4580_v35  ;;  %v4999_v53 = vpop.permute.xlu1 %1558  ;;  %v1555_v1 = vpop.permute.xlu0 %1554  ;;  %3963 = vmatpush3.bf16.msra.mxu1 %v4135_v32  ;;  %3929 = vmatpush3.bf16.msra.mxu0 %v4136_v25  ;;  %v1652_v43 = vshrl.u32 %v1612_v40, 16  ;;  %v1655_v3 = vshll.u32 %v1612_v40, 16  ;;  %v4141_v25 = vld [vmem:[%s5494_s4 + $0x1e0] sm:$0xff]  }
  0xf1   : > { %v1582_v11 = vrot.slane %v4999_v53, 5  ;;  %v1580_v49 = vrot.slane %v1555_v1, 5  ;;  %3964 = vmatprep.subr.bf16.mxu1 %v4182_v5  ;;  %3910 = vmatprep.mubr.msk.bf16.mxu1 %vm4183_vm0, %v4182_v5  ;;  %v2129_v35 = vmul.f32 %v4991_v59, %v2108_v33  ;;  %v2132_v33 = vmul.f32 %v4991_v59, %v3551_v29  ;;  %v4143_v53 = vld [vmem:[%s5494_s4 + $0x1d8] sm:$0xff]  }
  0xf2   : > { %v1654_v12 = vrot.slane %v1652_v43, 1  ;;  %v1657_v13 = vrot.slane %v1655_v3, 2  ;;  %v1922_v14 = vpack.c.bf16 %v1914_v56, %v1913_v61  ;;  %3930 = vmatprep.subr.bf16.mxu0 %v4182_v5  ;;  %v2142_v0 = vadd.f32 %v5021_v17, %v2131_v48  ;;  %v5134_v48 = vld [vmem:[%s4474_s29 + $0x20] sm:$0xff]  }
  0xf3   : > { %v1581_v55 = vsel %vm1568_vm5, %v1578_v28, %v1580_v49  ;;  %v1583_v9 = vsel %vm1568_vm5, %v1580_v49, %v1582_v11  ;;  %v5045_v28 = vadd.f32 %v5021_v17, %v2129_v35  ;;  %v3554_v61 = vunpack.c.l.bf16 %v5069_v51 }
  0xf4   : > { %v1605_v24 = vmul.f32 %v1581_v55, %v4582_v36  ;;  %v1606_v42 = vmul.f32 %v1583_v9, %v4625_v60  ;;  %v5029_v44 = vpop.permute.xlu1 %1868  ;;  %v1865_v4 = vpop.permute.xlu0 %1864  ;;  %3965 = vmatpush3.bf16.msra.mxu1 %v4137_v2  ;;  %v5031_v22 = vor.u32 %v1657_v13, %v1654_v12  ;;  %v5033_v20 = vrot.slane %v1922_v14, 2  ;;  %3931 = vmatpush3.bf16.msra.mxu0 %v4138_v8  ;;  %v4144_v13 = vld [vmem:[%s5494_s4 + $0x190] sm:$0xff]  }
  0xf5   : > { %v1892_v23 = vrot.slane %v5029_v44, 4  ;;  %v1890_v7 = vrot.slane %v1865_v4, 4  ;;  %3966 = vmatprep.subr.bf16.mxu1 %v4182_v5  ;;  %3932 = vmatprep.subr.bf16.mxu0 %v4182_v5  ;;  %v5097_v12 = vmax.f32 %v2141_v19, 0.0  ;;  %v2143_v9 = vadd.f32 %v5021_v17, %v2132_v33 }
  0xf6   : > { %v1613_v30 = vpack.c.bf16 %v1606_v42, %v1605_v24  ;;  %v1659_v41 = vsel %vm1633_vm7, %v4952_v63, %v5031_v22  ;;  %v1954_v31 = vsel %vm1949_vm8, %v4967_v46, %v5033_v20  ;;  %v5114_v24 = vmax.f32 %v2142_v0, 0.0 }
  0xf7   : > { %v1891_v34 = vsel %vm1878_vm6, %v1888_v37, %v1890_v7  ;;  %v1893_v38 = vsel %vm1878_vm6, %v1890_v7, %v1892_v23  ;;  %3875 = vmatmul.mubr.bf16.gmra.mxu0 %v1659_v41  ;;  %3911 = vmatmul.mubr.bf16.gmra.mxu1 %v1954_v31  ;;  %v3555_v42 = vunpack.c.h.bf16 %v5069_v51  ;;  %v2133_v4 = vmul.f32 %v4991_v59, %v3554_v61 }
  0xf8   : > { %v1915_v63 = vmul.f32 %v1891_v34, %v4582_v36  ;;  %v1916_v45 = vmul.f32 %v1893_v38, %v4625_v60  ;;  %v1567_v46 = vpop.permute.xlu1 %1566  ;;  %v1563_v50 = vpop.permute.xlu0 %1562  ;;  %3967 = vmatpush3.bf16.msra.mxu1 %v4139_v10  ;;  %3878 = vmatprep.mubr.msk.bf16.mxu0 %vm4183_vm0, %v4182_v5  ;;  %v1661_v47 = vshrl.u32 %v1613_v30, 16  ;;  %v1664_v32 = vshll.u32 %v1613_v30, 16  ;;  %v4142_v60 = vld [vmem:[%s5494_s4 + $0x198] sm:$0xff]  }
  0xf9   : > { %v1586_v37 = vrot.slane %v1567_v46, 5  ;;  %v1584_v52 = vrot.slane %v1563_v50, 5  ;;  %3914 = vmatprep.mubr.msk.bf16.mxu1 %vm4183_vm0, %v4182_v5  ;;  %3933 = vmatpush3.bf16.msra.mxu0 %v4140_v27  ;;  %v2151_v36 = vmax.f32 %v5045_v28, 0.0  ;;  %v4145_v27 = vld [vmem:[%s5494_s4 + $0x1d0] sm:$0xff]   ;;  %v5138_v18 = vmax.f32 %v2143_v9, 0.0 }
  0xfa   : > { %v1663_v40 = vrot.slane %v1661_v47, 1  ;;  %v1666_v54 = vrot.slane %v1664_v32, 2  ;;  %v1923_v26 = vpack.c.bf16 %v1916_v45, %v1915_v63  ;;  %3968 = vmatprep.subr.bf16.mxu1 %v4182_v5  ;;  %3934 = vmatprep.subr.bf16.mxu0 %v4182_v5  ;;  %v2144_v45 = vadd.f32 %v5021_v17, %v2133_v4 }
  0xfb   : > { %v1609_v57 = vmul.f32 %v1586_v37, %v1527_v39  ;;  %v1585_v58 = vsel %vm1568_vm5, %v1582_v11, %v1584_v52  ;;  %v1587_v6 = vsel %vm1568_vm5, %v1584_v52, %v1586_v37  ;;  %v3558_v51 = vunpack.c.l.bf16 %v5134_v48 }
  0xfc   : > { %v1607_v56 = vmul.f32 %v1585_v58, %v4627_v16  ;;  %v1608_v1 = vmul.f32 %v1587_v6, %v4878_v62  ;;  %v1877_v2 = vpop.permute.xlu1 %1876  ;;  %v1873_v43 = vpop.permute.xlu0 %1872  ;;  %v5090_v3 = vor.u32 %v1666_v54, %v1663_v40  ;;  %v5092_v8 = vrot.slane %v1923_v26, 2  ;;  %3969 = vmatpush3.bf16.msra.mxu1 %v4141_v25  ;;  %v4147_v40 = vld [vmem:[%s5494_s4 + $0x1c8] sm:$0xff]   ;;  %v4148_v58 = vld [vmem:[%s5494_s4 + $0x180] sm:$0xff]  }
  0xfd   : > { %v1615_v11 = vpack.c.bf16 %v1609_v57, %v1609_v57  ;;  %v1896_v49 = vrot.slane %v1877_v2, 4  ;;  %v1894_v35 = vrot.slane %v1873_v43, 4  ;;  %3935 = vmatpush3.bf16.msra.mxu0 %v4142_v60  ;;  %3970 = vmatprep.subr.bf16.mxu1 %v4182_v5  ;;  %v2135_v9 = vmul.f32 %v4991_v59, %v3558_v51 }
  0xfe   : > { %v1614_v14 = vpack.c.bf16 %v1608_v1, %v1607_v56  ;;  %v1668_v15 = vsel %vm1633_vm7, %v5031_v22, %v5090_v3  ;;  %v1956_v55 = vsel %vm1949_vm8, %v5033_v20, %v5092_v8  ;;  %3936 = vmatprep.subr.bf16.mxu0 %v4182_v5 }
  0xff   : > { %v1895_v21 = vsel %vm1878_vm6, %v1892_v23, %v1894_v35  ;;  %3879 = vmatmul.mubr.bf16.gmra.mxu0 %v1668_v15  ;;  %3915 = vmatmul.mubr.bf16.gmra.mxu1 %v1956_v55  ;;  %v1897_v22 = vsel %vm1878_vm6, %v1894_v35, %v1896_v49  ;;  %v1679_v29 = vshrl.u32 %v1615_v11, 16  ;;  %v1682_v30 = vshll.u32 %v1615_v11, 16 }
 0x100   : > { %v1917_v20 = vmul.f32 %v1895_v21, %v4627_v16  ;;  %v2441_v10 = vpop.permute.xlu1 %2440  ;;  %v2437_v7 = vpop.permute.xlu0 %2436  ;;  %3971 = vmatpush3.bf16.msra.mxu1 %v4143_v53  ;;  %3882 = vmatprep.mubr.msk.bf16.mxu0 %vm4183_vm0, %v4182_v5  ;;  %v1670_v44 = vshrl.u32 %v1614_v14, 16  ;;  %v1673_v23 = vshll.u32 %v1614_v14, 16  ;;  %v1919_v41 = vmul.f32 %v1896_v49, %v1527_v39  ;;  %v4146_v16 = vld [vmem:[%s5494_s4 + $0x188] sm:$0xff]  }
 0x101   : > { %v1918_v31 = vmul.f32 %v1897_v22, %v4878_v62  ;;  %3918 = vmatprep.mubr.msk.bf16.mxu1 %vm4183_vm0, %v4182_v5  ;;  %3937 = vmatpush3.bf16.msra.mxu0 %v4144_v13  ;;  %v2476_v34 = vrot.slane %v2441_v10, 3  ;;  %v2475_v38 = vrot.slane %v2437_v7, 3  ;;  %v2134_v39 = vmul.f32 %v4991_v59, %v3555_v42 }
 0x102   : > { %v1672_v19 = vrot.slane %v1670_v44, 1  ;;  %v1675_v63 = vrot.slane %v1673_v23, 2  ;;  %3972 = vmatprep.subr.bf16.mxu1 %v4182_v5  ;;  %3938 = vmatprep.subr.bf16.mxu0 %v4182_v5  ;;  %v1681_v54 = vrot.slane %v1679_v29, 1  ;;  %v1684_v26 = vrot.slane %v1682_v30, 2 }
 0x103   : > { %v1924_v62 = vpack.c.bf16 %v1918_v31, %v1917_v20  ;;  %v2477_v46 = vsel %vm2474_vm9, %v2475_v38, %v2476_v34  ;;  %v2505_v50 = vmul.f32 %v2475_v38, %v2151_v36  ;;  %v1925_v0 = vpack.c.bf16 %v1919_v41, %v1919_v41  ;;  %v2419_v31 = vld [vmem:[%s4474_s29 + $0x30] sm:$0x7] }
 0x104   : > { %v5145_v47 = vpop.permute.xlu1 %2448  ;;  %v2445_v32 = vpop.permute.xlu0 %2444  ;;  %v1676_v25 = vor.u32 %v1675_v63, %v1672_v19  ;;  %3973 = vmatpush3.bf16.msra.mxu1 %v4145_v27  ;;  %v2506_v37 = vmul.f32 %v2477_v46, %v5097_v12  ;;  %v2145_v1 = vadd.f32 %v5021_v17, %v2134_v39  ;;  %v3559_v13 = vunpack.c.h.bf16 %v5134_v48 }
 0x105   : > { %v2480_v52 = vrot.slane %v5145_v47, 3  ;;  %v2478_v60 = vrot.slane %v2445_v32, 3  ;;  %v1957_v33 = vrot.slane %v1924_v62, 2  ;;  %3939 = vmatpush3.bf16.msra.mxu0 %v4146_v16  ;;  %3974 = vmatprep.subr.bf16.mxu1 %v4182_v5  ;;  %v1959_v14 = vrot.slane %v1925_v0, 2  ;;  %v3579_v62 = vld [vmem:[%s4474_s29 + $0x28] sm:$0xff]   ;;  %v4150_v47 = vld [vmem:[%s5494_s4 + $0x238] sm:$0xff]  }
 0x106   : > { %v1677_v57 = vsel %vm1633_vm7, %v5090_v3, %v1676_v25  ;;  %3940 = vmatprep.subr.bf16.mxu0 %v4182_v5  ;;  %v2516_v11 = vpack.c.bf16 %v2506_v37, %v2505_v50  ;;  %v1685_v55 = vor.u32 %v1684_v26, %v1681_v54  ;;  %v5180_v42 = vmax.f32 %v2144_v45, 0.0 }
 0x107   : > { %v2479_v6 = vsel %vm2474_vm9, %v2476_v34, %v2478_v60  ;;  %v2481_v61 = vsel %vm2474_vm9, %v2478_v60, %v2480_v52  ;;  %3883 = vmatmul.mubr.bf16.gmra.mxu0 %v1677_v57  ;;  %v1958_v56 = vsel %vm1949_vm8, %v5092_v8, %v1957_v33  ;;  %v4149_v8 = vld [vmem:[%s5494_s4 + $0x1c0] sm:$0xff]   ;;  %v5182_v4 = vmax.f32 %v2145_v1, 0.0 }
 0x108   : > { %v2507_v2 = vmul.f32 %v2479_v6, %v5114_v24  ;;  %v2508_v43 = vmul.f32 %v2481_v61, %v5138_v18  ;;  %3919 = vmatmul.mubr.bf16.gmra.mxu1 %v1958_v56  ;;  %v2169_v3 = vpop.permute.xlu1 %2168  ;;  %v2165_v53 = vpop.permute.xlu0 %2164  ;;  %3886 = vmatprep.mubr.msk.bf16.mxu0 %vm4183_vm0, %v4182_v5  ;;  %v2541_v27 = vshrl.u32 %v2516_v11, 16  ;;  %v2544_v29 = vshll.u32 %v2516_v11, 16 }
 0x109   : > { %v2203_v49 = vrot.slane %v2169_v3, 4  ;;  %v2202_v35 = vrot.slane %v2165_v53, 4  ;;  %3922 = vmatprep.mubr.msk.bf16.mxu1 %vm4183_vm0, %v4182_v5  ;;  %3975 = vmatpush3.bf16.msra.mxu1 %v4147_v40  ;;  %v1686_v16 = vsel %vm1633_vm7, %v1676_v25, %v1685_v55  ;;  %v1960_v48 = vsel %vm1949_vm8, %v1957_v33, %v1959_v14 }
 0x10a   : > { %v2517_v15 = vpack.c.bf16 %v2508_v43, %v2507_v2  ;;  %3941 = vmatpush3.bf16.msra.mxu0 %v4148_v58  ;;  %3976 = vmatprep.subr.bf16.mxu1 %v4182_v5  ;;  %v2136_v34 = vmul.f32 %v4991_v59, %v3559_v13  ;;  %v2146_v28 = vadd.f32 %v5021_v17, %v2135_v9  ;;  %v2420_v25 = vunpack.c.l.bf16 %v2419_v31 }
 0x10b   : > { %v2204_v21 = vsel %vm1878_vm6, %v2202_v35, %v2203_v49  ;;  %3998 = vmatprep.subr.bf16.mxu0 %v4182_v5  ;;  %v2232_v10 = vmul.f32 %v2202_v35, %v2151_v36  ;;  %v2543_v51 = vrot.slane %v2541_v27, 2  ;;  %v2546_v37 = vrot.slane %v2544_v29, 3  ;;  %v4151_v35 = vld [vmem:[%s5496_s6 + $0x38] sm:$0xff]   ;;  %v4152_v29 = vld [vmem:[%s5494_s4 + $0x230] sm:$0xff]  }
 0x10c   : > { %v2549_v22 = vshrl.u32 %v2517_v15, 16  ;;  %v2552_v20 = vshll.u32 %v2517_v15, 16  ;;  %v2233_v7 = vmul.f32 %v2204_v21, %v5097_v12  ;;  %v2177_v44 = vpop.permute.xlu1 %2176  ;;  %v2173_v23 = vpop.permute.xlu0 %2172  ;;  %v2147_v54 = vadd.f32 %v5021_v17, %v2136_v34 }
 0x10d   : > { %v2207_v30 = vrot.slane %v2177_v44, 4  ;;  %v2205_v41 = vrot.slane %v2173_v23, 4  ;;  %3977 = vmatpush3.bf16.msra.mxu1 %v4149_v8  ;;  %v5204_v26 = vmax.f32 %v2146_v28, 0.0  ;;  %v3562_v0 = vunpack.c.l.bf16 %v3579_v62 }
 0x10e   : > { %4034 = vmatprep.subr.bf16.mxu1 %v4182_v5  ;;  %v2551_v36 = vrot.slane %v2549_v22, 2  ;;  %v2554_v38 = vrot.slane %v2552_v20, 3  ;;  %v2243_v39 = vpack.c.bf16 %v2233_v7, %v2232_v10  ;;  %v3563_v61 = vunpack.c.h.bf16 %v3579_v62  ;;  %v2107_v10 = vld [vmem:[%s4474_s29 + $0x30] sm:$0x3] }
 0x10f   : > { %v2206_v19 = vsel %vm1878_vm6, %v2203_v49, %v2205_v41  ;;  %v2208_v63 = vsel %vm1878_vm6, %v2205_v41, %v2207_v30  ;;  %3887 = vmatmul.mubr.bf16.gmra.mxu0 %v1686_v16  ;;  %v2431_v8 = vmul.f32 %v4991_v59, %v2420_v25  ;;  %v5228_v15 = vmax.f32 %v2147_v54, 0.0 }
 0x110   : > { %v2234_v45 = vmul.f32 %v2206_v19, %v5114_v24  ;;  %v2235_v46 = vmul.f32 %v2208_v63, %v5138_v18  ;;  %3923 = vmatmul.mubr.bf16.gmra.mxu1 %v1960_v48  ;;  %v2457_v50 = vpop.permute.xlu1 %2456  ;;  %v2453_v32 = vpop.permute.xlu0 %2452  ;;  %3942 = vmatprep.mubr.msk.bf16.mxu0 %vm4183_vm0, %v4182_v5  ;;  %v5210_v6 = vor.u32 %v2554_v38, %v2551_v36  ;;  %v2272_v56 = vrot.slane %v2243_v39, 2  ;;  %v4153_v48 = vld [vmem:[%s5496_s6 + $0x30] sm:$0xff]  }
 0x111   : > { %v2484_v60 = vrot.slane %v2457_v50, 3  ;;  %v2482_v33 = vrot.slane %v2453_v32, 3  ;;  %3978 = vmatprep.mubr.msk.bf16.mxu1 %vm4183_vm0, %v4182_v5  ;;  %v2137_v55 = vmul.f32 %v4991_v59, %v3562_v0  ;;  %v2138_v20 = vmul.f32 %v4991_v59, %v3563_v61  ;;  %v4155_v0 = vld [vmem:[%s5496_s6 + $0x28] sm:$0xff]  }
 0x112   : > { %v2244_v40 = vpack.c.bf16 %v2235_v46, %v2234_v45  ;;  %v5250_v34 = vadd.f32 %v5021_v17, %v2431_v8  ;;  %v2118_v19 = vunpack.c.l.bf16 %v2107_v10 }
 0x113   : > { %v2483_v57 = vsel %vm2474_vm9, %v2480_v52, %v2482_v33  ;;  %v2485_v58 = vsel %vm2474_vm9, %v2482_v33, %v2484_v60  ;;  %v2547_v52 = vor.u32 %v2546_v37, %v2543_v51  ;;  %v2148_v39 = vadd.f32 %v5021_v17, %v2137_v55 }
 0x114   : > { %v5212_v1 = vrot.slane %v2244_v40, 2  ;;  %v2509_v2 = vmul.f32 %v2483_v57, %v5180_v42  ;;  %v2510_v43 = vmul.f32 %v2485_v58, %v5182_v4  ;;  %v5216_v3 = vpop.permute.xlu1 %2184  ;;  %v2181_v53 = vpop.permute.xlu0 %2180  ;;  %v2149_v45 = vadd.f32 %v5021_v17, %v2138_v20 }
 0x115   : > { %v2211_v11 = vrot.slane %v5216_v3, 4  ;;  %v2209_v49 = vrot.slane %v2181_v53, 4  ;;  %v2556_v22 = vsel %vm2539_vm10, %v2547_v52, %v5210_v6  ;;  %v2433_v54 = vmax.f32 %v5250_v34, 0.0  ;;  %v4170_v34 = vld [vmem:[%s4791_s16 + $0x20] sm:$0xff]  }
 0x116   : > { %v2518_v13 = vpack.c.bf16 %v2510_v43, %v2509_v2  ;;  %v2274_v14 = vsel %vm1949_vm8, %v2272_v56, %v5212_v1  ;;  %v2139_v56 = vmul.f32 %v4991_v59, %v2118_v19  ;;  %v5284_v3 = vmax.f32 %v2148_v39, 0.0 }
 0x117   : > { %v2210_v9 = vsel %vm1878_vm6, %v2207_v30, %v2209_v49  ;;  %v2212_v21 = vsel %vm1878_vm6, %v2209_v49, %v2211_v11  ;;  %3943 = vmatmul.mubr.bf16.vlgmr.msra.gmra.mxu0 %v2274_v14  ;;  %v5286_v53 = vmax.f32 %v2149_v45, 0.0  ;;  %v4157_v14 = vld [vmem:[%s5496_s6 + $0x20] sm:$0xff]  }
 0x118   : > { %v2236_v7 = vmul.f32 %v2210_v9, %v5180_v42  ;;  %v2237_v44 = vmul.f32 %v2212_v21, %v5182_v4  ;;  %3979 = vmatmul.mubr.bf16.vlgmr.msra.gmra.mxu1 %v2556_v22  ;;  %3999 = vmatpush3.bf16.msra.mxu0 %v4150_v47  ;;  %v5239_v23 = vpop.permute.xlu1 %2464  ;;  %v2461_v27 = vpop.permute.xlu0 %2460  ;;  %v2558_v30 = vshrl.u32 %v2518_v13, 16  ;;  %v2561_v41 = vshll.u32 %v2518_v13, 16  ;;  %v2729_v22 = vld [vmem:[%s4474_s29 + $0x8] sm:$0x8] }
 0x119   : > { %v2488_v31 = vrot.slane %v5239_v23, 3  ;;  %v2486_v16 = vrot.slane %v2461_v27, 3  ;;  %4035 = vmatpush3.bf16.msra.mxu1 %v4151_v35  ;;  %4000 = vmatprep.subr.bf16.mxu0 %v4182_v5  ;;  %v4158_v23 = vld [vmem:[%s5494_s4 + $0x218] sm:$0xff]  }
 0x11a   : > { %4036 = vmatprep.subr.bf16.mxu1 %v4182_v5  ;;  %3946 = vmatprep.mubr.msk.bf16.mxu0 %vm4183_vm0, %v4182_v5  ;;  %v2245_v28 = vpack.c.bf16 %v2237_v44, %v2236_v7  ;;  %v2560_v36 = vrot.slane %v2558_v30, 2  ;;  %v2563_v38 = vrot.slane %v2561_v41, 3  ;;  %v2150_v44 = vadd.f32 %v5021_v17, %v2139_v56 }
 0x11b   : > { %v2487_v63 = vsel %vm2474_vm9, %v2484_v60, %v2486_v16  ;;  %v2489_v62 = vsel %vm2474_vm9, %v2486_v16, %v2488_v31  ;;  %3982 = vmatprep.mubr.msk.bf16.mxu1 %vm4183_vm0, %v4182_v5  ;;  %v4154_v60 = vld [vmem:[%s5494_s4 + $0x228] sm:$0xff]  }
 0x11c   : > { %v2511_v46 = vmul.f32 %v2487_v63, %v5204_v26  ;;  %v2512_v50 = vmul.f32 %v2489_v62, %v5228_v15  ;;  %v5265_v32 = vpop.permute.xlu1 %2192  ;;  %v2189_v25 = vpop.permute.xlu0 %2188  ;;  %4001 = vmatpush3.bf16.msra.mxu0 %v4152_v29  ;;  %v2275_v51 = vrot.slane %v2245_v28, 2  ;;  %v2564_v37 = vor.u32 %v2563_v38, %v2560_v36  ;;  %v4159_v38 = vld [vmem:[%s5496_s6 + $0x18] sm:$0xff]  }
 0x11d   : > { %v2215_v33 = vrot.slane %v5265_v32, 4  ;;  %v2213_v40 = vrot.slane %v2189_v25, 4  ;;  %4037 = vmatpush3.bf16.msra.mxu1 %v4153_v48  ;;  %4002 = vmatprep.subr.bf16.mxu0 %v4182_v5  ;;  %v2730_v36 = vunpack.c.l.bf16 %v2729_v22  ;;  %v2161_v45 = vmax.f32 %v2150_v44, 0.0 }
 0x11e   : > { %v2519_v57 = vpack.c.bf16 %v2512_v50, %v2511_v46  ;;  %v2276_v58 = vsel %vm1949_vm8, %v5212_v1, %v2275_v51  ;;  %v2565_v61 = vsel %vm2539_vm10, %v5210_v6, %v2564_v37  ;;  %4038 = vmatprep.subr.bf16.mxu1 %v4182_v5 }
 0x11f   : > { %v2214_v2 = vsel %vm1878_vm6, %v2211_v11, %v2213_v40  ;;  %v2216_v43 = vsel %vm1878_vm6, %v2213_v40, %v2215_v33  ;;  %3947 = vmatmul.mubr.bf16.gmra.mxu0 %v2276_v58  ;;  %v4156_v11 = vld [vmem:[%s5494_s4 + $0x220] sm:$0xff]  }
 0x120   : > { %v2238_v47 = vmul.f32 %v2214_v2, %v5204_v26  ;;  %v2239_v1 = vmul.f32 %v2216_v43, %v5228_v15  ;;  %3983 = vmatmul.mubr.bf16.gmra.mxu1 %v2565_v61  ;;  %v2473_v52 = vpop.permute.xlu1 %2472  ;;  %v2469_v6 = vpop.permute.xlu0 %2468  ;;  %4003 = vmatpush3.bf16.msra.mxu0 %v4154_v60  ;;  %v2567_v49 = vshrl.u32 %v2519_v57, 16  ;;  %v2570_v35 = vshll.u32 %v2519_v57, 16 }
 0x121   : > { %v2492_v8 = vrot.slane %v2473_v52, 3  ;;  %v2490_v13 = vrot.slane %v2469_v6, 3  ;;  %4039 = vmatpush3.bf16.msra.mxu1 %v4155_v0  ;;  %4004 = vmatprep.subr.bf16.mxu0 %v4182_v5  ;;  %v2741_v57 = vmul.f32 %v4991_v59, %v2730_v36 }
 0x122   : > { %3950 = vmatprep.mubr.msk.bf16.mxu0 %vm4183_vm0, %v4182_v5  ;;  %3986 = vmatprep.mubr.msk.bf16.mxu1 %vm4183_vm0, %v4182_v5  ;;  %v2246_v55 = vpack.c.bf16 %v2239_v1, %v2238_v47  ;;  %v2569_v9 = vrot.slane %v2567_v49, 2  ;;  %v2572_v21 = vrot.slane %v2570_v35, 3 }
 0x123   : > { %v2515_v20 = vmul.f32 %v2492_v8, %v2433_v54  ;;  %v2491_v10 = vsel %vm2474_vm9, %v2488_v31, %v2490_v13  ;;  %v2493_v7 = vsel %vm2474_vm9, %v2490_v13, %v2492_v8  ;;  %4040 = vmatprep.subr.bf16.mxu1 %v4182_v5  ;;  %v2742_v6 = vadd.f32 %v5021_v17, %v2741_v57  ;;  %v4162_v8 = vld [vmem:[%s5494_s4 + $0x208] sm:$0xff]  }
 0x124   : > { %v2513_v27 = vmul.f32 %v2491_v10, %v5284_v3  ;;  %v2514_v29 = vmul.f32 %v2493_v7, %v5286_v53  ;;  %v2201_v30 = vpop.permute.xlu1 %2200  ;;  %v2197_v41 = vpop.permute.xlu0 %2196  ;;  %4005 = vmatpush3.bf16.msra.mxu0 %v4156_v11  ;;  %v2277_v16 = vrot.slane %v2246_v55, 2  ;;  %v2573_v48 = vor.u32 %v2572_v21, %v2569_v9  ;;  %v4163_v17 = vld [vmem:[%s5496_s6 + $0x8] sm:$0xff]  }
 0x125   : > { %v2219_v31 = vrot.slane %v2201_v30, 4  ;;  %v2217_v28 = vrot.slane %v2197_v41, 4  ;;  %4041 = vmatpush3.bf16.msra.mxu1 %v4157_v14  ;;  %4006 = vmatprep.subr.bf16.mxu0 %v4182_v5  ;;  %v2521_v39 = vpack.c.bf16 %v2515_v20, %v2515_v20  ;;  %v2743_v44 = vmax.f32 %v2742_v6, 0.0  ;;  %v4164_v30 = vld [vmem:[%s5494_s4 + $0x200] sm:$0xff]  }
 0x126   : > { %v2520_v19 = vpack.c.bf16 %v2514_v29, %v2513_v27  ;;  %v2278_v63 = vsel %vm1949_vm8, %v2275_v51, %v2277_v16  ;;  %v2574_v62 = vsel %vm2539_vm10, %v2564_v37, %v2573_v48  ;;  %4042 = vmatprep.subr.bf16.mxu1 %v4182_v5  ;;  %v4160_v51 = vld [vmem:[%s5494_s4 + $0x210] sm:$0xff]  }
 0x127   : > { %v2218_v46 = vsel %vm1878_vm6, %v2215_v33, %v2217_v28  ;;  %3951 = vmatmul.mubr.bf16.gmra.mxu0 %v2278_v63  ;;  %v2220_v50 = vsel %vm1878_vm6, %v2217_v28, %v2219_v31  ;;  %v4161_v33 = vld [vmem:[%s5496_s6 + $0x10] sm:$0xff]   ;;  %v2585_v56 = vshrl.u32 %v2521_v39, 16  ;;  %v2588_v2 = vshll.u32 %v2521_v39, 16 }
 0x128   : > { %v2240_v32 = vmul.f32 %v2218_v46, %v5284_v3  ;;  %3987 = vmatmul.mubr.bf16.gmra.mxu1 %v2574_v62  ;;  %v2751_v25 = vpop.permute.xlu1 %2750  ;;  %v2747_v60 = vpop.permute.xlu0 %2746  ;;  %4007 = vmatpush3.bf16.msra.mxu0 %v4158_v23  ;;  %v2576_v40 = vshrl.u32 %v2520_v19, 16  ;;  %v2579_v0 = vshll.u32 %v2520_v19, 16  ;;  %v2241_v37 = vmul.f32 %v2220_v50, %v5286_v53 }
 0x129   : > { %4043 = vmatpush3.bf16.msra.mxu1 %v4159_v38  ;;  %3954 = vmatprep.mubr.msk.bf16.mxu0 %vm4183_vm0, %v4182_v5  ;;  %v2242_v43 = vmul.f32 %v2219_v31, %v2161_v45  ;;  %v2786_v13 = vrot.slane %v2751_v25, 2  ;;  %v2785_v14 = vrot.slane %v2747_v60, 2  ;;  %v2587_v9 = vrot.slane %v2585_v56, 2 }
 0x12a   : > { %3990 = vmatprep.mubr.msk.bf16.mxu1 %vm4183_vm0, %v4182_v5  ;;  %v2578_v58 = vrot.slane %v2576_v40, 2  ;;  %v2581_v61 = vrot.slane %v2579_v0, 3  ;;  %4008 = vmatprep.subr.bf16.mxu0 %v4182_v5  ;;  %v2247_v47 = vpack.c.bf16 %v2241_v37, %v2240_v32  ;;  %v2590_v21 = vrot.slane %v2588_v2, 3 }
 0x12b   : > { %4044 = vmatprep.subr.bf16.mxu1 %v4182_v5  ;;  %v2248_v22 = vpack.c.bf16 %v2242_v43, %v2242_v43  ;;  %v2787_v41 = vsel %vm1949_vm8, %v2785_v14, %v2786_v13  ;;  %v2815_v19 = vmul.f32 %v2785_v14, %v2743_v44 }
 0x12c   : > { %v2759_v59 = vpop.permute.xlu1 %2758  ;;  %v2755_v1 = vpop.permute.xlu0 %2754  ;;  %v2582_v52 = vor.u32 %v2581_v61, %v2578_v58  ;;  %4009 = vmatpush3.bf16.msra.mxu0 %v4160_v51  ;;  %v2279_v35 = vrot.slane %v2247_v47, 2  ;;  %v2591_v28 = vor.u32 %v2590_v21, %v2587_v9  ;;  %v2816_v63 = vmul.f32 %v2787_v41, %v5097_v12  ;;  %v4166_v51 = vld [vmem:[%s4791_s16] sm:$0xff]  }
 0x12d   : > { %v2790_v11 = vrot.slane %v2759_v59, 2  ;;  %v2788_v49 = vrot.slane %v2755_v1, 2  ;;  %4045 = vmatpush3.bf16.msra.mxu1 %v4161_v33  ;;  %4010 = vmatprep.subr.bf16.mxu0 %v4182_v5  ;;  %v4167_v1 = vld [vmem:[%s4791_s16 + $0x8] sm:$0xff]  }
 0x12e   : > { %v2583_v55 = vsel %vm2539_vm10, %v2573_v48, %v2582_v52  ;;  %4046 = vmatprep.subr.bf16.mxu1 %v4182_v5  ;;  %v2280_v20 = vsel %vm1949_vm8, %v2277_v16, %v2279_v35  ;;  %v4165_v16 = vld [vmem:[%s5496_s6] sm:$0xff]   ;;  %v2281_v48 = vrot.slane %v2248_v22, 2  ;;  %v2826_v46 = vpack.c.bf16 %v2816_v63, %v2815_v19 }
 0x12f   : > { %v2789_v10 = vsel %vm1949_vm8, %v2786_v13, %v2788_v49  ;;  %v2791_v7 = vsel %vm1949_vm8, %v2788_v49, %v2790_v11  ;;  %3955 = vmatmul.mubr.bf16.gmra.mxu0 %v2280_v20 }
 0x130   : > { %3991 = vmatmul.mubr.bf16.gmra.mxu1 %v2583_v55  ;;  %v2767_v27 = vpop.permute.xlu1 %2766  ;;  %v2763_v29 = vpop.permute.xlu0 %2762  ;;  %4011 = vmatpush3.bf16.msra.mxu0 %v4162_v8  ;;  %v2817_v23 = vmul.f32 %v2789_v10, %v5114_v24  ;;  %v2818_v31 = vmul.f32 %v2791_v7, %v5138_v18  ;;  %v2282_v39 = vsel %vm1949_vm8, %v2279_v35, %v2281_v48  ;;  %v2856_v37 = vrot.slane %v2826_v46, 3  ;;  %v4168_v8 = vld [vmem:[%s4791_s16 + $0x10] sm:$0xff]  }
 0x131   : > { %3958 = vmatprep.mubr.msk.bf16.mxu0 %vm4183_vm0, %v4182_v5  ;;  %3994 = vmatprep.mubr.msk.bf16.mxu1 %vm4183_vm0, %v4182_v5  ;;  %v2794_v36 = vrot.slane %v2767_v27, 2  ;;  %v2792_v38 = vrot.slane %v2763_v29, 2  ;;  %v2592_v24 = vsel %vm2539_vm10, %v2582_v52, %v2591_v28 }
 0x132   : > { %4047 = vmatpush3.bf16.msra.mxu1 %v4163_v17  ;;  %4012 = vmatprep.subr.bf16.mxu0 %v4182_v5  ;;  %v2827_v62 = vpack.c.bf16 %v2818_v31, %v2817_v23  ;;  %v4169_v17 = vld [vmem:[%s4791_s16 + $0x18] sm:$0xff]   ;;  %s4072_s16 = smul.u32 80, %s5499_s25 }
 0x133   : > { %4048 = vmatprep.subr.bf16.mxu1 %v4182_v5  ;;  %v2793_v18 = vsel %vm1949_vm8, %v2790_v11, %v2792_v38  ;;  %v2795_v45 = vsel %vm1949_vm8, %v2792_v38, %v2794_v36 }
 0x134   : > { %4013 = vmatpush3.bf16.msra.mxu0 %v4164_v30  ;;  %v2775_v50 = vpop.permute.xlu1 %2774  ;;  %v2771_v32 = vpop.permute.xlu0 %2770  ;;  %v2857_v12 = vrot.slane %v2827_v62, 3  ;;  %v2819_v25 = vmul.f32 %v2793_v18, %v5180_v42  ;;  %v2820_v60 = vmul.f32 %v2795_v45, %v5182_v4  ;;  %s5458_s23 = scalar_lea.vmem %s5497_s7, %s4072_s16 }
 0x135   : > { %v2798_v40 = vrot.slane %v2775_v50, 2  ;;  %v2796_v0 = vrot.slane %v2771_v32, 2 }
 0x136   : > { %4049 = vmatpush3.bf16.msra.mxu1 %v4165_v16  ;;  %v2858_v57 = vsel %vm2474_vm9, %v2856_v37, %v2857_v12  ;;  %v2828_v33 = vpack.c.bf16 %v2820_v60, %v2819_v25 }
 0x137   : > { %3959 = vmatmul.mubr.bf16.gmra.mxu0 %v2282_v39  ;;  %v2797_v58 = vsel %vm1949_vm8, %v2794_v36, %v2796_v0  ;;  %v2799_v61 = vsel %vm1949_vm8, %v2796_v0, %v2798_v40 }
 0x138   : > { %3995 = vmatmul.mubr.bf16.gmra.mxu1 %v2592_v24  ;;  %4014 = vmatprep.mubr.msk.bf16.mxu0 %vm4183_vm0, %v4182_v5  ;;  %v2783_v56 = vpop.permute.xlu1 %2782  ;;  %v2779_v2 = vpop.permute.xlu0 %2778  ;;  %v2821_v42 = vmul.f32 %v2797_v58, %v5204_v26  ;;  %v2822_v4 = vmul.f32 %v2799_v61, %v5228_v15  ;;  %v2859_v43 = vrot.slane %v2828_v33, 3 }
 0x139   : > { %4050 = vmatprep.mubr.msk.bf16.mxu1 %vm4183_vm0, %v4182_v5  ;;  %v2802_v47 = vrot.slane %v2783_v56, 2  ;;  %v2800_v59 = vrot.slane %v2779_v2, 2 }
 0x13a   : > { %v2860_v52 = vsel %vm2474_vm9, %v2857_v12, %v2859_v43  ;;  %v2829_v6 = vpack.c.bf16 %v2822_v4, %v2821_v42 }
 0x13b   : > { %v2801_v11 = vsel %vm1949_vm8, %v2798_v40, %v2800_v59  ;;  %v2803_v49 = vsel %vm1949_vm8, %v2800_v59, %v2802_v47  ;;  %v2825_v55 = vmul.f32 %v2802_v47, %v2433_v54 }
 0x13c   : > { %v2823_v26 = vmul.f32 %v2801_v11, %v5284_v3  ;;  %v2824_v15 = vmul.f32 %v2803_v49, %v5286_v53  ;;  %v2861_v35 = vrot.slane %v2829_v6, 3 }
 0x13d   : > { %v2831_v53 = vpack.c.bf16 %v2825_v55, %v2825_v55 }
 0x13e   : > { %v2862_v13 = vsel %vm2474_vm9, %v2859_v43, %v2861_v35  ;;  %v2830_v14 = vpack.c.bf16 %v2824_v15, %v2823_v26 }
 0x13f   : > { %4015 = vmatmul.mubr.bf16.vlgmr.msra.gmra.mxu0 %v2858_v57  ;;  %v2865_v22 = vrot.slane %v2831_v53, 3 }
 0x140   : > { %4051 = vmatmul.mubr.bf16.vlgmr.msra.gmra.mxu1 %v4166_v51  ;;  %4018 = vmatprep.mubr.msk.bf16.mxu0 %vm4183_vm0, %v4182_v5  ;;  %v2863_v3 = vrot.slane %v2830_v14, 3 }
 0x141   : > { %4054 = vmatprep.mubr.msk.bf16.mxu1 %vm4183_vm0, %v4182_v5 }
 0x142   : > { %v2864_v9 = vsel %vm2474_vm9, %v2861_v35, %v2863_v3  ;;  %v2866_v29 = vsel %vm2474_vm9, %v2863_v3, %v2865_v22 }
 0x147   : > { %4019 = vmatmul.mubr.bf16.gmra.mxu0 %v2860_v52 }
 0x148   : > { %4055 = vmatmul.mubr.bf16.gmra.mxu1 %v4167_v1  ;;  %4022 = vmatprep.mubr.msk.bf16.mxu0 %vm4183_vm0, %v4182_v5 }
 0x149   : > { %4058 = vmatprep.mubr.msk.bf16.mxu1 %vm4183_vm0, %v4182_v5 }
 0x14f   : > { %4023 = vmatmul.mubr.bf16.gmra.mxu0 %v2862_v13 }
 0x150   : > { %4059 = vmatmul.mubr.bf16.gmra.mxu1 %v4168_v8  ;;  %4026 = vmatprep.mubr.msk.bf16.mxu0 %vm4183_vm0, %v4182_v5 }
 0x151   : > { %4062 = vmatprep.mubr.msk.bf16.mxu1 %vm4183_vm0, %v4182_v5 }
 0x157   : > { %4027 = vmatmul.mubr.bf16.gmra.mxu0 %v2864_v9 }
 0x158   : > { %4063 = vmatmul.mubr.bf16.gmra.mxu1 %v4169_v17  ;;  %4030 = vmatprep.mubr.msk.bf16.mxu0 %vm4183_vm0, %v4182_v5 }
 0x159   : > { %4066 = vmatprep.mubr.msk.bf16.mxu1 %vm4183_vm0, %v4182_v5 }
 0x15a   : > { %v878_v21 = vpop.f32.mrf.mxu1 }
 0x15b   : > { %v757_v20 = vpop.f32.mrf.mxu0 }
 0x15c   : > { %v879_v10 = vadd.f32 %v878_v21, %v757_v20  ;;  %v3764_v7 = vpop.f32.mrf.mxu1 }
 0x15d   : > { %v3728_v54 = vpop.f32.mrf.mxu0 }
 0x15e   : > { %v881_v44 = vpop.f32.mrf.mxu1 }
 0x15f   : > { %v760_v27 = vpop.f32.mrf.mxu0  ;;  %4031 = vmatmul.mubr.bf16.gmra.mxu0 %v2866_v29 }
 0x160   : > { %v882_v30 = vadd.f32 %v881_v44, %v760_v27  ;;  %v3765_v41 = vpop.f32.mrf.mxu1  ;;  %4067 = vmatmul.mubr.bf16.gmra.mxu1 %v4170_v34 }
 0x161   : > { %v3729_v16 = vpop.f32.mrf.mxu0 }
 0x162   : > { %v886_v48 = vpop.f32.mrf.mxu1 }
 0x163   : > { %v765_v23 = vpop.f32.mrf.mxu0 }
 0x164   : > { %v887_v31 = vadd.f32 %v886_v48, %v765_v23  ;;  %v3768_v5 = vpop.f32.mrf.mxu1 }
 0x165   : > { %v3732_v28 = vpop.f32.mrf.mxu0 }
 0x166   : > { %v889_v36 = vpop.f32.mrf.mxu1 }
 0x167   : > { %v768_v38 = vpop.f32.mrf.mxu0 }
 0x168   : > { %v890_v19 = vadd.f32 %v889_v36, %v768_v38  ;;  %v3769_v63 = vpop.f32.mrf.mxu1 }
 0x169   : > { %v3733_v62 = vpop.f32.mrf.mxu0 }
 0x16a   : > { %v894_v39 = vpop.f32.mrf.mxu1 }
 0x16b   : > { %v773_v24 = vpop.f32.mrf.mxu0 }
 0x16c   : > { %v895_v18 = vadd.f32 %v894_v39, %v773_v24  ;;  %v3772_v45 = vpop.f32.mrf.mxu1 }
 0x16d   : > { %v3736_v46 = vpop.f32.mrf.mxu0 }
 0x16e   : > { %v897_v50 = vpop.f32.mrf.mxu1 }
 0x16f   : > { %v776_v32 = vpop.f32.mrf.mxu0 }
 0x170   : > { %v898_v12 = vadd.f32 %v897_v50, %v776_v32  ;;  %v3773_v25 = vpop.f32.mrf.mxu1 }
 0x171   : > { %v3737_v60 = vpop.f32.mrf.mxu0 }
 0x172   : > { %v902_v40 = vpop.f32.mrf.mxu1 }
 0x173   : > { %v781_v0 = vpop.f32.mrf.mxu0 }
 0x174   : > { %v903_v51 = vadd.f32 %v902_v40, %v781_v0  ;;  %v3776_v37 = vpop.f32.mrf.mxu1 }
 0x175   : > { %v3740_v57 = vpop.f32.mrf.mxu0 }
 0x176   : > { %v905_v33 = vpop.f32.mrf.mxu1 }
 0x177   : > { %v784_v58 = vpop.f32.mrf.mxu0 }
 0x178   : > { %v906_v61 = vadd.f32 %v905_v33, %v784_v58  ;;  %v3777_v56 = vpop.f32.mrf.mxu1 }
 0x179   : > { %v3741_v2 = vpop.f32.mrf.mxu0 }
 0x17a   : > { %v910_v42 = vpop.f32.mrf.mxu1 }
 0x17b   : > { %v789_v4 = vpop.f32.mrf.mxu0 }
 0x17c   : > { %v911_v43 = vadd.f32 %v910_v42, %v789_v4  ;;  %v3780_v47 = vpop.f32.mrf.mxu1 }
 0x17d   : > { %v3744_v59 = vpop.f32.mrf.mxu0 }
 0x17e   : > { %v913_v1 = vpop.f32.mrf.mxu1 }
 0x17f   : > { %v792_v52 = vpop.f32.mrf.mxu0 }
 0x180   : > { %v914_v6 = vadd.f32 %v913_v1, %v792_v52  ;;  %v3781_v11 = vpop.f32.mrf.mxu1 }
 0x181   : > { %v3745_v49 = vpop.f32.mrf.mxu0 }
 0x183   : > { %v1142_v26 = vpop.f32.mrf.mxu0 }
 0x184   : > { %v1181_v15 = vadd.f32 %v1142_v26, %v879_v10 }
 0x185   : > { %v3800_v35 = vpop.f32.mrf.mxu0 }
 0x187   : > { %v1145_v8 = vpop.f32.mrf.mxu0  ;;  %v1464_v13 = vpop.f32.mrf.mxu1 }
 0x188   : > { %v1182_v14 = vadd.f32 %v1145_v8, %v882_v30  ;;  %v1503_v55 = vadd.f32 %v1464_v13, %v1181_v15 }
 0x189   : > { %v3801_v3 = vpop.f32.mrf.mxu0  ;;  %v3836_v17 = vpop.f32.mrf.mxu1 }
 0x18b   : > { %v1150_v53 = vpop.f32.mrf.mxu0  ;;  %v1467_v9 = vpop.f32.mrf.mxu1 }
 0x18c   : > { %v1183_v21 = vadd.f32 %v1150_v53, %v887_v31  ;;  %v1504_v22 = vadd.f32 %v1467_v9, %v1182_v14 }
 0x18d   : > { %v3804_v20 = vpop.f32.mrf.mxu0  ;;  %v3837_v7 = vpop.f32.mrf.mxu1 }
 0x18f   : > { %v1153_v34 = vpop.f32.mrf.mxu0  ;;  %v1472_v54 = vpop.f32.mrf.mxu1 }
 0x190   : > { %v1184_v44 = vadd.f32 %v1153_v34, %v890_v19  ;;  %v1505_v27 = vadd.f32 %v1472_v54, %v1183_v21 }
 0x191   : > { %v3805_v29 = vpop.f32.mrf.mxu0  ;;  %v3840_v41 = vpop.f32.mrf.mxu1 }
 0x193   : > { %v1158_v10 = vpop.f32.mrf.mxu0  ;;  %v1475_v16 = vpop.f32.mrf.mxu1 }
 0x194   : > { %v1185_v48 = vadd.f32 %v1158_v10, %v895_v18  ;;  %v1506_v23 = vadd.f32 %v1475_v16, %v1184_v44 }
 0x195   : > { %v3808_v30 = vpop.f32.mrf.mxu0  ;;  %v3841_v5 = vpop.f32.mrf.mxu1 }
 0x197   : > { %v1161_v28 = vpop.f32.mrf.mxu0  ;;  %v1480_v36 = vpop.f32.mrf.mxu1 }
 0x198   : > { %v1186_v38 = vadd.f32 %v1161_v28, %v898_v12  ;;  %v1507_v63 = vadd.f32 %v1480_v36, %v1185_v48 }
 0x199   : > { %v3809_v31 = vpop.f32.mrf.mxu0  ;;  %v3844_v62 = vpop.f32.mrf.mxu1 }
 0x19b   : > { %v1166_v39 = vpop.f32.mrf.mxu0  ;;  %v1483_v24 = vpop.f32.mrf.mxu1 }
 0x19c   : > { %v1187_v45 = vadd.f32 %v1166_v39, %v903_v51  ;;  %v1508_v46 = vadd.f32 %v1483_v24, %v1186_v38 }
 0x19d   : > { %v3812_v19 = vpop.f32.mrf.mxu0  ;;  %v3845_v50 = vpop.f32.mrf.mxu1 }
 0x19f   : > { %v1169_v32 = vpop.f32.mrf.mxu0  ;;  %v1488_v25 = vpop.f32.mrf.mxu1 }
 0x1a0   : > { %v1188_v60 = vadd.f32 %v1169_v32, %v906_v61  ;;  %v1509_v40 = vadd.f32 %v1488_v25, %v1187_v45 }
 0x1a1   : > { %v3813_v18 = vpop.f32.mrf.mxu0  ;;  %v3848_v0 = vpop.f32.mrf.mxu1 }
 0x1a3   : > { %v1174_v37 = vpop.f32.mrf.mxu0  ;;  %v1491_v57 = vpop.f32.mrf.mxu1 }
 0x1a4   : > { %v1189_v33 = vadd.f32 %v1174_v37, %v911_v43  ;;  %v1510_v58 = vadd.f32 %v1491_v57, %v1188_v60 }
 0x1a5   : > { %v3816_v12 = vpop.f32.mrf.mxu0  ;;  %v3849_v56 = vpop.f32.mrf.mxu1 }
 0x1a7   : > { %v1177_v2 = vpop.f32.mrf.mxu0  ;;  %v1496_v42 = vpop.f32.mrf.mxu1 }
 0x1a8   : > { %v1190_v4 = vadd.f32 %v1177_v2, %v914_v6  ;;  %v1511_v47 = vadd.f32 %v1496_v42, %v1189_v33 }
 0x1a9   : > { %v3817_v51 = vpop.f32.mrf.mxu0  ;;  %v3852_v59 = vpop.f32.mrf.mxu1 }
 0x1ab   : > { %v1499_v1 = vpop.f32.mrf.mxu1  ;;  %v1774_v52 = vpop.f32.mrf.mxu0 }
 0x1ac   : > { %v1512_v11 = vadd.f32 %v1499_v1, %v1190_v4  ;;  %v1813_v49 = vadd.f32 %v1774_v52, %v1503_v55 }
 0x1ad   : > { %v3853_v61 = vpop.f32.mrf.mxu1  ;;  %v3872_v26 = vpop.f32.mrf.mxu0 }
 0x1af   : > { %v1777_v15 = vpop.f32.mrf.mxu0  ;;  %v2048_v35 = vpop.f32.mrf.mxu1 }
 0x1b0   : > { %v1814_v8 = vadd.f32 %v1777_v15, %v1504_v22  ;;  %v5414_v13 = vadd.f32 %v2048_v35, %v1813_v49 }
 0x1b1   : > { %v3873_v43 = vpop.f32.mrf.mxu0  ;;  %v3908_v14 = vpop.f32.mrf.mxu1 }
 0x1b3   : > { %v2051_v3 = vpop.f32.mrf.mxu1 }
 0x1b4   : > { %v5416_v17 = vadd.f32 %v2051_v3, %v1814_v8 }
 0x1b5   : > { %v3909_v6 = vpop.f32.mrf.mxu1 }
 0x1b7   : > { %v1782_v53 = vpop.f32.mrf.mxu0  ;;  %v2056_v9 = vpop.f32.mrf.mxu1 }
 0x1b8   : > { %v1815_v21 = vadd.f32 %v1782_v53, %v1505_v27 }
 0x1b9   : > { %v3876_v20 = vpop.f32.mrf.mxu0  ;;  %v3912_v7 = vpop.f32.mrf.mxu1 }
 0x1ba   : > { %v5418_v34 = vadd.f32 %v2056_v9, %v1815_v21 }
 0x1bb   : > { %v1785_v55 = vpop.f32.mrf.mxu0  ;;  %v2059_v54 = vpop.f32.mrf.mxu1 }
 0x1bc   : > { %v1816_v44 = vadd.f32 %v1785_v55, %v1506_v23 }
 0x1bd   : > { %v3877_v29 = vpop.f32.mrf.mxu0  ;;  %v3913_v22 = vpop.f32.mrf.mxu1 }
 0x1be   : > { %v5420_v41 = vadd.f32 %v2059_v54, %v1816_v44 }
 0x1bf   : > { %v1790_v10 = vpop.f32.mrf.mxu0  ;;  %v2064_v16 = vpop.f32.mrf.mxu1 }
 0x1c0   : > { %v1817_v48 = vadd.f32 %v1790_v10, %v1507_v63 }
 0x1c1   : > { %v3880_v30 = vpop.f32.mrf.mxu0  ;;  %v3916_v5 = vpop.f32.mrf.mxu1 }
 0x1c2   : > { %v5422_v28 = vadd.f32 %v2064_v16, %v1817_v48 }
 0x1c3   : > { %v1793_v36 = vpop.f32.mrf.mxu0  ;;  %v2067_v27 = vpop.f32.mrf.mxu1 }
 0x1c4   : > { %v1818_v38 = vadd.f32 %v1793_v36, %v1508_v46 }
 0x1c5   : > { %v3881_v31 = vpop.f32.mrf.mxu0  ;;  %v3917_v62 = vpop.f32.mrf.mxu1 }
 0x1c6   : > { %v5424_v39 = vadd.f32 %v2067_v27, %v1818_v38 }
 0x1c7   : > { %v1798_v24 = vpop.f32.mrf.mxu0 }
 0x1c8   : > { %v1819_v23 = vadd.f32 %v1798_v24, %v1509_v40  ;;  %v2072_v45 = vpop.f32.mrf.mxu1 }
 0x1c9   : > { %v3884_v19 = vpop.f32.mrf.mxu0 }
 0x1ca   : > { %v5426_v50 = vadd.f32 %v2072_v45, %v1819_v23  ;;  %v3920_v32 = vpop.f32.mrf.mxu1 }
 0x1cb   : > { %v1801_v25 = vpop.f32.mrf.mxu0 }
 0x1cc   : > { %v1820_v63 = vadd.f32 %v1801_v25, %v1510_v58  ;;  %v2075_v60 = vpop.f32.mrf.mxu1 }
 0x1cd   : > { %v3885_v18 = vpop.f32.mrf.mxu0 }
 0x1ce   : > { %v5428_v0 = vadd.f32 %v2075_v60, %v1820_v63  ;;  %v3921_v37 = vpop.f32.mrf.mxu1 }
 0x1cf   : > { %v1806_v57 = vpop.f32.mrf.mxu0 }
 0x1d0   : > { %v1821_v46 = vadd.f32 %v1806_v57, %v1511_v47  ;;  %v2080_v33 = vpop.f32.mrf.mxu1 }
 0x1d1   : > { %v3888_v12 = vpop.f32.mrf.mxu0 }
 0x1d2   : > { %v5430_v56 = vadd.f32 %v2080_v33, %v1821_v46  ;;  %v3924_v2 = vpop.f32.mrf.mxu1 }
 0x1d3   : > { %v1809_v40 = vpop.f32.mrf.mxu0 }
 0x1d4   : > { %v1822_v42 = vadd.f32 %v1809_v40, %v1512_v11  ;;  %v2083_v4 = vpop.f32.mrf.mxu1 }
 0x1d5   : > { %v3889_v51 = vpop.f32.mrf.mxu0 }
 0x1d6   : > { %v5432_v59 = vadd.f32 %v2083_v4, %v1822_v42  ;;  %v3925_v1 = vpop.f32.mrf.mxu1 }
 0x1d7   : > { %v2370_v58 = vpop.f32.mrf.mxu0 }
 0x1d8   : > { %v2680_v52 = vpop.f32.mrf.mxu1  ;;  %v2409_v45 = vadd.f32 %v2370_v58, %v5414_v13 }
 0x1d9   : > { %v3944_v49 = vpop.f32.mrf.mxu0 }
 0x1da   : > { %v3980_v61 = vpop.f32.mrf.mxu1  ;;  %v2719_v60 = vadd.f32 %v2680_v52, %v2409_v45 }
 0x1db   : > { %v2373_v26 = vpop.f32.mrf.mxu0 }
 0x1dc   : > { %v2683_v15 = vpop.f32.mrf.mxu1  ;;  %v2410_v18 = vadd.f32 %v2373_v26, %v5416_v17 }
 0x1dd   : > { %v3945_v35 = vpop.f32.mrf.mxu0 }
 0x1de   : > { %v3981_v47 = vpop.f32.mrf.mxu1  ;;  %v2720_v12 = vadd.f32 %v2683_v15, %v2410_v18 }
 0x1df   : > { %v2378_v8 = vpop.f32.mrf.mxu0 }
 0x1e0   : > { %v2688_v43 = vpop.f32.mrf.mxu1  ;;  %v2411_v2 = vadd.f32 %v2378_v8, %v5418_v34 }
 0x1e1   : > { %v3948_v14 = vpop.f32.mrf.mxu0 }
 0x1e2   : > { %v3984_v3 = vpop.f32.mrf.mxu1  ;;  %v2721_v58 = vadd.f32 %v2688_v43, %v2411_v2 }
 0x1e3   : > { %v2381_v6 = vpop.f32.mrf.mxu0 }
 0x1e4   : > { %v2691_v53 = vpop.f32.mrf.mxu1  ;;  %v2412_v52 = vadd.f32 %v2381_v6, %v5420_v41 }
 0x1e5   : > { %v3949_v11 = vpop.f32.mrf.mxu0 }
 0x1e6   : > { %v3985_v9 = vpop.f32.mrf.mxu1  ;;  %v2722_v34 = vadd.f32 %v2691_v53, %v2412_v52 }
 0x1e7   : > { %v2386_v21 = vpop.f32.mrf.mxu0 }
 0x1e8   : > { %v2696_v20 = vpop.f32.mrf.mxu1  ;;  %v2413_v8 = vadd.f32 %v2386_v21, %v5422_v28 }
 0x1e9   : > { %v3952_v7 = vpop.f32.mrf.mxu0 }
 0x1ea   : > { %v3988_v55 = vpop.f32.mrf.mxu1  ;;  %v2723_v41 = vadd.f32 %v2696_v20, %v2413_v8 }
 0x1eb   : > { %v2389_v54 = vpop.f32.mrf.mxu0 }
 0x1ec   : > { %v5434_v44 = vpop.f32.mrf.mxu1  ;;  %v2414_v6 = vadd.f32 %v2389_v54, %v5424_v39 }
 0x1ed   : > { %v3953_v29 = vpop.f32.mrf.mxu0 }
 0x1ee   : > { %v3989_v22 = vpop.f32.mrf.mxu1  ;;  %v2724_v28 = vadd.f32 %v5434_v44, %v2414_v6 }
 0x1ef   : > { %v5436_v10 = vpop.f32.mrf.mxu0 }
 0x1f0   : > { %v5438_v16 = vpop.f32.mrf.mxu1  ;;  %v2415_v21 = vadd.f32 %v5436_v10, %v5426_v50 }
 0x1f1   : > { %v3956_v48 = vpop.f32.mrf.mxu0 }
 0x1f2   : > { %v3992_v30 = vpop.f32.mrf.mxu1  ;;  %v2725_v54 = vadd.f32 %v5438_v16, %v2415_v21 }
 0x1f3   : > { %v5440_v5 = vpop.f32.mrf.mxu0 }
 0x1f4   : > { %v5442_v36 = vpop.f32.mrf.mxu1  ;;  %v2416_v45 = vadd.f32 %v5440_v5, %v5428_v0 }
 0x1f5   : > { %v3957_v27 = vpop.f32.mrf.mxu0 }
 0x1f6   : > { %v3993_v38 = vpop.f32.mrf.mxu1  ;;  %v2726_v10 = vadd.f32 %v5442_v36, %v2416_v45 }
 0x1f7   : > { %v5444_v31 = vpop.f32.mrf.mxu0 }
 0x1f8   : > { %v5446_v62 = vpop.f32.mrf.mxu1 }
 0x1f9   : > { %v3960_v24 = vpop.f32.mrf.mxu0 }
 0x1fa   : > { %v3996_v23 = vpop.f32.mrf.mxu1 }
 0x1fb   : > { %v5449_v19 = vpop.f32.mrf.mxu0 }
 0x1fc   : > { %v5451_v32 = vpop.f32.mrf.mxu1 }
 0x1fd   : > { %v3961_v25 = vpop.f32.mrf.mxu0 }
 0x1fe   : > { %v3997_v63 = vpop.f32.mrf.mxu1 }
 0x1ff   : > { %v2954_v37 = vpop.f32.mrf.mxu0 }
 0x200   : > { %v3141_v57 = vpop.f32.mrf.mxu1  ;;  %v2993_v46 = vadd.f32 %v2954_v37, %v2719_v60  ;;  %v2417_v37 = vadd.f32 %v5444_v31, %v5430_v56 }
 0x201   : > { %v4016_v13 = vpop.f32.mrf.mxu0 }
 0x202   : > { %v4052_v33 = vpop.f32.mrf.mxu1  ;;  %v3180_v40 = vadd.f32 %v3141_v57, %v2993_v46 }
 0x203   : > { %v2957_v42 = vpop.f32.mrf.mxu0  ;;  %v2727_v33 = vadd.f32 %v5446_v62, %v2417_v37 }
 0x204   : > { %v3144_v4 = vpop.f32.mrf.mxu1  ;;  %3190 = vst [vmem:[%s5458_s23] sm:$0xff] %v3180_v40  ;;  %v2994_v17 = vadd.f32 %v2957_v42, %v2720_v12  ;;  %v2418_v12 = vadd.f32 %v5449_v19, %v5432_v59 }
 0x205   : > { %v4017_v51 = vpop.f32.mrf.mxu0 }
 0x206   : > { %v4053_v1 = vpop.f32.mrf.mxu1  ;;  %v3181_v49 = vadd.f32 %v3144_v4, %v2994_v17  ;;  %v2728_v4 = vadd.f32 %v5451_v32, %v2418_v12 }
 0x207   : > { %v2962_v61 = vpop.f32.mrf.mxu0 }
 0x208   : > { %v3149_v26 = vpop.f32.mrf.mxu1  ;;  %3191 = vst [vmem:[%s5458_s23 + $0x8] sm:$0xff] %v3181_v49  ;;  %v2995_v35 = vadd.f32 %v2962_v61, %v2721_v58 }
 0x209   : > { %v4020_v47 = vpop.f32.mrf.mxu0 }
 0x20a   : > { %v4056_v15 = vpop.f32.mrf.mxu1  ;;  %v3182_v14 = vadd.f32 %v3149_v26, %v2995_v35 }
 0x20b   : > { %v2965_v3 = vpop.f32.mrf.mxu0 }
 0x20c   : > { %v3152_v11 = vpop.f32.mrf.mxu1  ;;  %3192 = vst [vmem:[%s5458_s23 + $0x10] sm:$0xff] %v3182_v14  ;;  %v2996_v9 = vadd.f32 %v2965_v3, %v2722_v34 }
 0x20d   : > { %v4021_v7 = vpop.f32.mrf.mxu0 }
 0x20e   : > { %v4057_v43 = vpop.f32.mrf.mxu1  ;;  %v3183_v55 = vadd.f32 %v3152_v11, %v2996_v9 }
 0x20f   : > { %v2970_v29 = vpop.f32.mrf.mxu0 }
 0x210   : > { %v3157_v22 = vpop.f32.mrf.mxu1  ;;  %3193 = vst [vmem:[%s5458_s23 + $0x18] sm:$0xff] %v3183_v55  ;;  %v2997_v48 = vadd.f32 %v2970_v29, %v2723_v41 }
 0x211   : > { %v4024_v30 = vpop.f32.mrf.mxu0 }
 0x212   : > { %v4060_v53 = vpop.f32.mrf.mxu1  ;;  %v3184_v27 = vadd.f32 %v3157_v22, %v2997_v48 }
 0x213   : > { %v2973_v38 = vpop.f32.mrf.mxu0 }
 0x214   : > { %v3160_v24 = vpop.f32.mrf.mxu1  ;;  %3194 = vst [vmem:[%s5458_s23 + $0x20] sm:$0xff] %v3184_v27  ;;  %v2998_v20 = vadd.f32 %v2973_v38, %v2724_v28 }
 0x215   : > { %v4025_v23 = vpop.f32.mrf.mxu0 }
 0x216   : > { %v4061_v39 = vpop.f32.mrf.mxu1  ;;  %v3185_v25 = vadd.f32 %v3160_v24, %v2998_v20 }
 0x217   : > { %v2978_v63 = vpop.f32.mrf.mxu0 }
 0x218   : > { %v3165_v60 = vpop.f32.mrf.mxu1  ;;  %3195 = vst [vmem:[%s5458_s23 + $0x28] sm:$0xff] %v3185_v25  ;;  %v2999_v44 = vadd.f32 %v2978_v63, %v2725_v54 }
 0x219   : > { %v4028_v18 = vpop.f32.mrf.mxu0 }
 0x21a   : > { %v4064_v50 = vpop.f32.mrf.mxu1  ;;  %v3186_v57 = vadd.f32 %v3165_v60, %v2999_v44 }
 0x21b   : > { %v2981_v46 = vpop.f32.mrf.mxu0 }
 0x21c   : > { %v3168_v13 = vpop.f32.mrf.mxu1  ;;  %3196 = vst [vmem:[%s5458_s23 + $0x30] sm:$0xff] %v3186_v57  ;;  %v3000_v16 = vadd.f32 %v2981_v46, %v2726_v10 }
 0x21d   : > { %v4029_v0 = vpop.f32.mrf.mxu0 }
 0x21e   : > { %v4065_v5 = vpop.f32.mrf.mxu1  ;;  %v3187_v2 = vadd.f32 %v3168_v13, %v3000_v16 }
 0x21f   : > { %v2986_v40 = vpop.f32.mrf.mxu0 }
 0x220   : > { %v3173_v36 = vpop.f32.mrf.mxu1  ;;  %3197 = vst [vmem:[%s5458_s23 + $0x38] sm:$0xff] %v3187_v2  ;;  %v3001_v42 = vadd.f32 %v2986_v40, %v2727_v33 }
 0x221   : > { %v4032_v56 = vpop.f32.mrf.mxu0 }
 0x222   : > { %v4068_v31 = vpop.f32.mrf.mxu1  ;;  %v3188_v17 = vadd.f32 %v3173_v36, %v3001_v42 }
 0x223   : > { %v2989_v51 = vpop.f32.mrf.mxu0 }
 0x224   : > { %v3176_v1 = vpop.f32.mrf.mxu1  ;;  %3198 = vst [vmem:[%s5458_s23 + $0x40] sm:$0xff] %v3188_v17  ;;  %v3002_v58 = vadd.f32 %v2989_v51, %v2728_v4 }
 0x225   : > { %v4033_v52 = vpop.f32.mrf.mxu0 }
 0x226   : > { %v4069_v62 = vpop.f32.mrf.mxu1  ;;  %v3189_v49 = vadd.f32 %v3176_v1, %v3002_v58 }
 0x228   : > { %3199 = vst [vmem:[%s5458_s23 + $0x48] sm:$0xff] %v3189_v49 }
 0x229 PF: > { %s17_s24 = sadd.s32 1, %s4179_s24  }
 0x22a   : > { %p14_p4 = scmp.ge.s32.totalorder %s17_s24, 4  }
 0x22c   :  { %16 = sbr.rel (!%p14_p4) target bundleno = 1 (0x1), region = 89 }

</bundles_post_ra>
